<compile_context>
chip_gen: v7x
topology: tpu7x:2x2x1
jax: 0.10.0
libtpu: 0.0.40
codegen_flags: <defaults>
</compile_context>

<pallas_src>
import jax
import jax.numpy as jnp
import numpy as np
from jax import lax
from jax.experimental import pallas as pl
from jax.experimental.pallas import tpu as pltpu

LANE = 128     # lane width: hidden / gate / output padding quantum
SUBLANE = 8    # f32 sublane height: batch padding quantum


def _round_up(x, m):
    return (x + m - 1) // m * m


# ----------------------------------------------------------------------------
# Fused Pallas kernel: all LSTM layers + FC + sigmoid, VMEM-resident throughout
# ----------------------------------------------------------------------------
def _fused_lstm_kernel(x_ref, wih_ref, whh_ref, b_ref, fcw_ref, fcb_ref,
                       out_ref, seq_a, seq_b, xproj_ref):
    """Whole LSTMNet forward in one kernel.

    x_ref:     (T*Bp, P)       zero-padded, time-major, flattened input
    wih_ref:   (L, P, 4P)      per-layer input->gate weights (padded, pre-transposed)
    whh_ref:   (L, P, 4P)      per-layer hidden->gate weights (padded, pre-transposed)
    b_ref:     (L, 1, 4P)      per-layer fused bias (b_ih + b_hh, padded)
    fcw_ref:   (P, Op)         FC weight (padded, pre-transposed)
    fcb_ref:   (1, Op)         FC bias (padded)
    out_ref:   (Bp, Op)        sigmoid(FC(h_T))
    seq_a/b:   (T*Bp, P)       ping-pong hidden-sequence scratch (VMEM)
    xproj_ref: (T*Bp, 4P)      hoisted input-projection scratch (VMEM)
    Gate layout: gate k (i,f,g,o) occupies lanes [k*P, k*P + H); the rest is 0.
    """
    Bp = out_ref.shape[0]
    T = x_ref.shape[0] // Bp
    L, Hp, _ = whh_ref.shape          # Hp = padded hidden width (=P)

    seq_bufs = (seq_a, seq_b)
    h_last = jnp.zeros((Bp, Hp), jnp.float32)

    for layer in range(L):            # L is static -> unrolled at trace time
        # ---- hoisted weight / bias loads (resident across the time loop) ----
        wih = wih_ref[layer]          # (P, 4P)
        whh = whh_ref[layer]          # (P, 4P)
        bias = b_ref[layer]           # (1, 4P)

        # ---- hoisted input projection: ONE big MXU matmul for the whole
        #      sequence, off the serial h/c critical path ----
        if layer == 0:
            xin = x_ref[...]                               # (T*Bp, P)
        else:
            xin = seq_bufs[(layer - 1) % 2][...]           # previous layer's h-seq
        xproj_ref[...] = (
            jnp.dot(xin, wih, preferred_element_type=jnp.float32) + bias)

        write_seq = layer < L - 1     # last layer: only h_T is needed
        out_buf = seq_bufs[layer % 2]

        def step(t, carry, whh=whh, out_buf=out_buf, write_seq=write_seq):
            h, c = carry
            row = t * Bp              # Bp-aligned (Bp == sublane tile height)
            # recurrent half of the gate pre-activation only
            g = (xproj_ref[pl.ds(row, Bp), :]
                 + jnp.dot(h, whh, preferred_element_type=jnp.float32))
            # two full-width EUP passes; gate slices are whole 128-lane blocks
            sg = jax.nn.sigmoid(g)
            tg = jnp.tanh(g)
            i_g = sg[:, 0 * Hp:1 * Hp]
            f_g = sg[:, 1 * Hp:2 * Hp]
            g_g = tg[:, 2 * Hp:3 * Hp]
            o_g = sg[:, 3 * Hp:4 * Hp]
            c_new = f_g * c + i_g * g_g          # padded lanes stay exactly 0
            h_new = o_g * jnp.tanh(c_new)
            if write_seq:
                out_buf[pl.ds(row, Bp), :] = h_new
            return h_new, c_new

        h0 = jnp.zeros((Bp, Hp), jnp.float32)
        c0 = jnp.zeros((Bp, Hp), jnp.float32)
        h_last, _ = lax.fori_loop(0, T, step, (h0, c0), unroll=True)

    # ---- FC + sigmoid on the last hidden state (lane-dense (Bp, Op) store) ----
    out_ref[...] = jax.nn.sigmoid(
        jnp.dot(h_last, fcw_ref[...], preferred_element_type=jnp.float32)
        + fcb_ref[...])


# ----------------------------------------------------------------------------
# Host-side padding helpers (gate-blocked, zero-filled)
# ----------------------------------------------------------------------------
def _pad_gate_matrix(w, d_pad, h, h_pad):
    """(d, 4h) -> (d_pad, 4*h_pad); gate k's columns land at lanes [k*h_pad, k*h_pad+h)."""
    d = w.shape[0]
    out = jnp.zeros((d_pad, 4 * h_pad), jnp.float32)
    for k in range(4):
        out = out.at[:d, k * h_pad:k * h_pad + h].set(w[:, k * h:(k + 1) * h])
    return out


def _pad_gate_bias(b, h, h_pad):
    b = b.reshape(-1)
    out = jnp.zeros((4 * h_pad,), jnp.float32)
    for k in range(4):
        out = out.at[k * h_pad:k * h_pad + h].set(b[k * h:(k + 1) * h])
    return out


# ----------------------------------------------------------------------------
# Wrapper: pad, pack, single pallas_call, slice back
# ----------------------------------------------------------------------------
def lstm_net_forward(x, params):
    """x: (B, T, I) batch_first, exactly like the PyTorch module's forward."""
    B, T, I = x.shape
    H = params["lstm"][0][1].shape[0]          # whh: (H, 4H)
    O = params["fc_w"].shape[1]
    L = len(params["lstm"])

    P = _round_up(max(I, H), LANE)             # shared padded feature width
    G = 4 * P
    Bp = _round_up(B, SUBLANE)
    Op = _round_up(O, LANE)

    # time-major, zero-padded, flattened input: (T*Bp, P)
    x_tm = jnp.transpose(x.astype(jnp.float32), (1, 0, 2))       # (T, B, I)
    x_p = (jnp.zeros((T, Bp, P), jnp.float32)
           .at[:, :B, :I].set(x_tm)
           .reshape(T * Bp, P))

    wih_all = jnp.stack([_pad_gate_matrix(wih, P, H, P)
                         for (wih, _, _) in params["lstm"]])      # (L, P, 4P)
    whh_all = jnp.stack([_pad_gate_matrix(whh, P, H, P)
                         for (_, whh, _) in params["lstm"]])      # (L, P, 4P)
    b_all = jnp.stack([_pad_gate_bias(b, H, P)[None, :]
                       for (_, _, b) in params["lstm"]])          # (L, 1, 4P)

    fcw_p = jnp.zeros((P, Op), jnp.float32).at[:H, :O].set(params["fc_w"])
    fcb_p = jnp.zeros((1, Op), jnp.float32).at[:, :O].set(
        params["fc_b"].reshape(1, -1))

    out_p = pl.pallas_call(
        _fused_lstm_kernel,
        out_shape=jax.ShapeDtypeStruct((Bp, Op), jnp.float32),
        in_specs=[
            pl.BlockSpec((T * Bp, P), lambda: (0, 0)),
            pl.BlockSpec((L, P, G), lambda: (0, 0, 0)),
            pl.BlockSpec((L, P, G), lambda: (0, 0, 0)),
            pl.BlockSpec((L, 1, G), lambda: (0, 0, 0)),
            pl.BlockSpec((P, Op), lambda: (0, 0)),
            pl.BlockSpec((1, Op), lambda: (0, 0)),
        ],
        out_specs=pl.BlockSpec((Bp, Op), lambda: (0, 0)),
        scratch_shapes=[
            pltpu.VMEM((T * Bp, P), jnp.float32),   # hidden-seq ping
            pltpu.VMEM((T * Bp, P), jnp.float32),   # hidden-seq pong
            pltpu.VMEM((T * Bp, G), jnp.float32),   # hoisted input projection
        ],
    )(x_p, wih_all, whh_all, b_all, fcw_p, fcb_p)

    return out_p[:B, :O]


# ----------------------------------------------------------------------------
# Deterministic parameter init (mirrors nn.LSTM / nn.Linear shapes)
# ----------------------------------------------------------------------------
def init_params(key, input_size, hidden_size, num_layers, output_size):
    k = 1.0 / np.sqrt(hidden_size)
    params = {"lstm": []}
    for layer in range(num_layers):
        d_in = input_size if layer == 0 else hidden_size
        key, k1, k2, k3, k4 = jax.random.split(key, 5)
        # PyTorch stores (4H, D); we keep the transposed (D, 4H) for x @ W.
        wih = jax.random.uniform(k1, (d_in, 4 * hidden_size), jnp.float32, -k, k)
        whh = jax.random.uniform(k2, (hidden_size, 4 * hidden_size), jnp.float32, -k, k)
        b_ih = jax.random.uniform(k3, (4 * hidden_size,), jnp.float32, -k, k)
        b_hh = jax.random.uniform(k4, (4 * hidden_size,), jnp.float32, -k, k)
        params["lstm"].append((wih, whh, (b_ih + b_hh)[None, :]))
    kf = 1.0 / np.sqrt(hidden_size)
    key, k5, k6 = jax.random.split(key, 3)
    params["fc_w"] = jax.random.uniform(k5, (hidden_size, output_size), jnp.float32, -kf, kf)
    params["fc_b"] = jax.random.uniform(k6, (1, output_size), jnp.float32, -kf, kf)
    return params


# ----------------------------------------------------------------------------
# Pure-JAX reference (sanity check against the Pallas path)
# ----------------------------------------------------------------------------
def lstm_net_reference(x, params):
    h_seq = jnp.transpose(x, (1, 0, 2)).astype(jnp.float32)
    for (wih, whh, b) in params["lstm"]:
        T, B, _ = h_seq.shape
        H = whh.shape[0]

        def step(carry, x_t):
            h, c = carry
            g = x_t @ wih + h @ whh + b
            i = jax.nn.sigmoid(g[:, :H])
            f = jax.nn.sigmoid(g[:, H:2 * H])
            gg = jnp.tanh(g[:, 2 * H:3 * H])
            o = jax.nn.sigmoid(g[:, 3 * H:])
            c = f * c + i * gg
            h = o * jnp.tanh(c)
            return (h, c), h

        init = (jnp.zeros((B, H), jnp.float32), jnp.zeros((B, H), jnp.float32))
        _, h_seq = lax.scan(step, init, h_seq)
    return jax.nn.sigmoid(h_seq[-1] @ params["fc_w"] + params["fc_b"])


if __name__ == "__main__":
    # Small shapes consistent with the module's forward:
    batch, seq_len = 2, 8
    input_size, hidden_size, num_layers, output_size = 16, 32, 2, 45

    key = jax.random.PRNGKey(0)
    key, xk, pk = jax.random.split(key, 3)
    x = jax.random.normal(xk, (batch, seq_len, input_size), jnp.float32)
    params = init_params(pk, input_size, hidden_size, num_layers, output_size)

    out = lstm_net_forward(x, params)
    out = jax.block_until_ready(out)

    ref = jax.block_until_ready(lstm_net_reference(x, params))
    assert out.shape == (batch, output_size)
    np.testing.assert_allclose(np.asarray(out), np.asarray(ref), atol=1e-4, rtol=1e-4)

    print("KERNEL_OK")
</pallas_src>

<mosaic_0001>
module attributes {stable_mosaic.version = 11 : i64} {
  func.func @_fused_lstm_kernel(%arg0: memref<64x128xf32, #tpu.memory_space<vmem>>, %arg1: memref<2x128x512xf32, #tpu.memory_space<vmem>>, %arg2: memref<2x128x512xf32, #tpu.memory_space<vmem>>, %arg3: memref<2x1x512xf32, #tpu.memory_space<vmem>>, %arg4: memref<128x128xf32, #tpu.memory_space<vmem>>, %arg5: memref<1x128xf32, #tpu.memory_space<vmem>>, %arg6: memref<8x128xf32, #tpu.memory_space<vmem>>, %arg7: memref<64x128xf32, #tpu.memory_space<vmem>>, %arg8: memref<64x128xf32, #tpu.memory_space<vmem>>, %arg9: memref<64x512xf32, #tpu.memory_space<vmem>>) attributes {dimension_semantics = [], scalar_prefetch = 0 : i64, scratch_operands = 3 : i64, tpu.core_type = #tpu.core_type<tc>} {
    %c0 = arith.constant 0 : index
    %c0_0 = arith.constant 0 : index
    %c0_1 = arith.constant 0 : index
    %0 = vector.load %arg1[%c0, %c0_0, %c0_1] : memref<2x128x512xf32, #tpu.memory_space<vmem>>, vector<1x128x512xf32>
    %1 = vector.shape_cast %0 : vector<1x128x512xf32> to vector<128x512xf32>
    %c0_2 = arith.constant 0 : index
    %c0_3 = arith.constant 0 : index
    %c0_4 = arith.constant 0 : index
    %2 = vector.load %arg2[%c0_2, %c0_3, %c0_4] : memref<2x128x512xf32, #tpu.memory_space<vmem>>, vector<1x128x512xf32>
    %3 = vector.shape_cast %2 : vector<1x128x512xf32> to vector<128x512xf32>
    %c0_5 = arith.constant 0 : index
    %c0_6 = arith.constant 0 : index
    %c0_7 = arith.constant 0 : index
    %4 = vector.load %arg3[%c0_5, %c0_6, %c0_7] : memref<2x1x512xf32, #tpu.memory_space<vmem>>, vector<1x1x512xf32>
    %5 = vector.shape_cast %4 : vector<1x1x512xf32> to vector<1x512xf32>
    %c0_8 = arith.constant 0 : index
    %c0_9 = arith.constant 0 : index
    %6 = vector.load %arg0[%c0_8, %c0_9] : memref<64x128xf32, #tpu.memory_space<vmem>>, vector<64x128xf32>
    %cst = arith.constant dense<0.000000e+00> : vector<64x512xf32>
    %7 = tpu.matmul %6, %1, %cst {dimension_numbers = #tpu.dot_dimension_numbers<[1], [0], [0], [1], [0, 0, 1, 1], [], []>} : vector<64x128xf32>, vector<128x512xf32>, vector<64x512xf32> -> vector<64x512xf32>
    %8 = vector.broadcast %5 : vector<1x512xf32> to vector<64x512xf32>
    %9 = arith.addf %7, %8 : vector<64x512xf32>
    %c0_10 = arith.constant 0 : index
    %c0_11 = arith.constant 0 : index
    %10 = vector.load %arg9[%c0_10, %c0_11] : memref<64x512xf32, #tpu.memory_space<vmem>>, vector<64x512xf32>
    tpu.vector_store %arg9[%c0_10, %c0_11], %9 {strides = array<i32>} : memref<64x512xf32, #tpu.memory_space<vmem>>, vector<64x512xf32>,
    %cst_12 = arith.constant 0.000000e+00 : f32
    %11 = vector.broadcast %cst_12 : f32 to vector<8x128xf32>
    %cst_13 = arith.constant 0.000000e+00 : f32
    %12 = vector.broadcast %cst_13 : f32 to vector<8x128xf32>
    %c0_i32 = arith.constant 0 : i32
    %c8_i32 = arith.constant 8 : i32
    %13 = arith.muli %c0_i32, %c8_i32 : i32
    %14 = arith.index_cast %13 : i32 to index
    %c0_14 = arith.constant 0 : index
    %15 = vector.load %arg9[%14, %c0_14] : memref<64x512xf32, #tpu.memory_space<vmem>>, vector<8x512xf32>
    %cst_15 = arith.constant dense<0.000000e+00> : vector<8x512xf32>
    %16 = tpu.matmul %11, %3, %cst_15 {dimension_numbers = #tpu.dot_dimension_numbers<[1], [0], [0], [1], [0, 0, 1, 1], [], []>} : vector<8x128xf32>, vector<128x512xf32>, vector<8x512xf32> -> vector<8x512xf32>
    %17 = arith.addf %15, %16 : vector<8x512xf32>
    %18 = arith.negf %17 : vector<8x512xf32>
    %19 = math.exp %18 : vector<8x512xf32>
    %cst_16 = arith.constant 1.000000e+00 : f32
    %20 = vector.broadcast %cst_16 : f32 to vector<8x512xf32>
    %21 = arith.addf %20, %19 : vector<8x512xf32>
    %22 = arith.divf %20, %21 : vector<8x512xf32>
    %23 = math.tanh %17 : vector<8x512xf32>
    %24 = vector.extract_strided_slice %22 {offsets = [0, 0], sizes = [8, 128], strides = [1, 1]} : vector<8x512xf32> to vector<8x128xf32>
    %25 = vector.extract_strided_slice %22 {offsets = [0, 128], sizes = [8, 128], strides = [1, 1]} : vector<8x512xf32> to vector<8x128xf32>
    %26 = vector.extract_strided_slice %23 {offsets = [0, 256], sizes = [8, 128], strides = [1, 1]} : vector<8x512xf32> to vector<8x128xf32>
    %27 = vector.extract_strided_slice %22 {offsets = [0, 384], sizes = [8, 128], strides = [1, 1]} : vector<8x512xf32> to vector<8x128xf32>
    %28 = arith.mulf %25, %12 : vector<8x128xf32>
    %29 = arith.mulf %24, %26 : vector<8x128xf32>
    %30 = arith.addf %28, %29 : vector<8x128xf32>
    %31 = math.tanh %30 : vector<8x128xf32>
    %32 = arith.mulf %27, %31 : vector<8x128xf32>
    %33 = arith.index_cast %13 : i32 to index
    %c0_17 = arith.constant 0 : index
    %34 = vector.load %arg7[%33, %c0_17] : memref<64x128xf32, #tpu.memory_space<vmem>>, vector<8x128xf32>
    tpu.vector_store %arg7[%33, %c0_17], %32 {strides = array<i32>} : memref<64x128xf32, #tpu.memory_space<vmem>>, vector<8x128xf32>,
    %c1_i32 = arith.constant 1 : i32
    %c8_i32_18 = arith.constant 8 : i32
    %35 = arith.muli %c1_i32, %c8_i32_18 : i32
    %36 = arith.index_cast %35 : i32 to index
    %c0_19 = arith.constant 0 : index
    %37 = vector.load %arg9[%36, %c0_19] : memref<64x512xf32, #tpu.memory_space<vmem>>, vector<8x512xf32>
    %cst_20 = arith.constant dense<0.000000e+00> : vector<8x512xf32>
    %38 = tpu.matmul %32, %3, %cst_20 {dimension_numbers = #tpu.dot_dimension_numbers<[1], [0], [0], [1], [0, 0, 1, 1], [], []>} : vector<8x128xf32>, vector<128x512xf32>, vector<8x512xf32> -> vector<8x512xf32>
    %39 = arith.addf %37, %38 : vector<8x512xf32>
    %40 = arith.negf %39 : vector<8x512xf32>
    %41 = math.exp %40 : vector<8x512xf32>
    %cst_21 = arith.constant 1.000000e+00 : f32
    %42 = vector.broadcast %cst_21 : f32 to vector<8x512xf32>
    %43 = arith.addf %42, %41 : vector<8x512xf32>
    %44 = arith.divf %42, %43 : vector<8x512xf32>
    %45 = math.tanh %39 : vector<8x512xf32>
    %46 = vector.extract_strided_slice %44 {offsets = [0, 0], sizes = [8, 128], strides = [1, 1]} : vector<8x512xf32> to vector<8x128xf32>
    %47 = vector.extract_strided_slice %44 {offsets = [0, 128], sizes = [8, 128], strides = [1, 1]} : vector<8x512xf32> to vector<8x128xf32>
    %48 = vector.extract_strided_slice %45 {offsets = [0, 256], sizes = [8, 128], strides = [1, 1]} : vector<8x512xf32> to vector<8x128xf32>
    %49 = vector.extract_strided_slice %44 {offsets = [0, 384], sizes = [8, 128], strides = [1, 1]} : vector<8x512xf32> to vector<8x128xf32>
    %50 = arith.mulf %47, %30 : vector<8x128xf32>
    %51 = arith.mulf %46, %48 : vector<8x128xf32>
    %52 = arith.addf %50, %51 : vector<8x128xf32>
    %53 = math.tanh %52 : vector<8x128xf32>
    %54 = arith.mulf %49, %53 : vector<8x128xf32>
    %55 = arith.index_cast %35 : i32 to index
    %c0_22 = arith.constant 0 : index
    %56 = vector.load %arg7[%55, %c0_22] : memref<64x128xf32, #tpu.memory_space<vmem>>, vector<8x128xf32>
    tpu.vector_store %arg7[%55, %c0_22], %54 {strides = array<i32>} : memref<64x128xf32, #tpu.memory_space<vmem>>, vector<8x128xf32>,
    %c2_i32 = arith.constant 2 : i32
    %c8_i32_23 = arith.constant 8 : i32
    %57 = arith.muli %c2_i32, %c8_i32_23 : i32
    %58 = arith.index_cast %57 : i32 to index
    %c0_24 = arith.constant 0 : index
    %59 = vector.load %arg9[%58, %c0_24] : memref<64x512xf32, #tpu.memory_space<vmem>>, vector<8x512xf32>
    %cst_25 = arith.constant dense<0.000000e+00> : vector<8x512xf32>
    %60 = tpu.matmul %54, %3, %cst_25 {dimension_numbers = #tpu.dot_dimension_numbers<[1], [0], [0], [1], [0, 0, 1, 1], [], []>} : vector<8x128xf32>, vector<128x512xf32>, vector<8x512xf32> -> vector<8x512xf32>
    %61 = arith.addf %59, %60 : vector<8x512xf32>
    %62 = arith.negf %61 : vector<8x512xf32>
    %63 = math.exp %62 : vector<8x512xf32>
    %cst_26 = arith.constant 1.000000e+00 : f32
    %64 = vector.broadcast %cst_26 : f32 to vector<8x512xf32>
    %65 = arith.addf %64, %63 : vector<8x512xf32>
    %66 = arith.divf %64, %65 : vector<8x512xf32>
    %67 = math.tanh %61 : vector<8x512xf32>
    %68 = vector.extract_strided_slice %66 {offsets = [0, 0], sizes = [8, 128], strides = [1, 1]} : vector<8x512xf32> to vector<8x128xf32>
    %69 = vector.extract_strided_slice %66 {offsets = [0, 128], sizes = [8, 128], strides = [1, 1]} : vector<8x512xf32> to vector<8x128xf32>
    %70 = vector.extract_strided_slice %67 {offsets = [0, 256], sizes = [8, 128], strides = [1, 1]} : vector<8x512xf32> to vector<8x128xf32>
    %71 = vector.extract_strided_slice %66 {offsets = [0, 384], sizes = [8, 128], strides = [1, 1]} : vector<8x512xf32> to vector<8x128xf32>
    %72 = arith.mulf %69, %52 : vector<8x128xf32>
    %73 = arith.mulf %68, %70 : vector<8x128xf32>
    %74 = arith.addf %72, %73 : vector<8x128xf32>
    %75 = math.tanh %74 : vector<8x128xf32>
    %76 = arith.mulf %71, %75 : vector<8x128xf32>
    %77 = arith.index_cast %57 : i32 to index
    %c0_27 = arith.constant 0 : index
    %78 = vector.load %arg7[%77, %c0_27] : memref<64x128xf32, #tpu.memory_space<vmem>>, vector<8x128xf32>
    tpu.vector_store %arg7[%77, %c0_27], %76 {strides = array<i32>} : memref<64x128xf32, #tpu.memory_space<vmem>>, vector<8x128xf32>,
    %c3_i32 = arith.constant 3 : i32
    %c8_i32_28 = arith.constant 8 : i32
    %79 = arith.muli %c3_i32, %c8_i32_28 : i32
    %80 = arith.index_cast %79 : i32 to index
    %c0_29 = arith.constant 0 : index
    %81 = vector.load %arg9[%80, %c0_29] : memref<64x512xf32, #tpu.memory_space<vmem>>, vector<8x512xf32>
    %cst_30 = arith.constant dense<0.000000e+00> : vector<8x512xf32>
    %82 = tpu.matmul %76, %3, %cst_30 {dimension_numbers = #tpu.dot_dimension_numbers<[1], [0], [0], [1], [0, 0, 1, 1], [], []>} : vector<8x128xf32>, vector<128x512xf32>, vector<8x512xf32> -> vector<8x512xf32>
    %83 = arith.addf %81, %82 : vector<8x512xf32>
    %84 = arith.negf %83 : vector<8x512xf32>
    %85 = math.exp %84 : vector<8x512xf32>
    %cst_31 = arith.constant 1.000000e+00 : f32
    %86 = vector.broadcast %cst_31 : f32 to vector<8x512xf32>
    %87 = arith.addf %86, %85 : vector<8x512xf32>
    %88 = arith.divf %86, %87 : vector<8x512xf32>
    %89 = math.tanh %83 : vector<8x512xf32>
    %90 = vector.extract_strided_slice %88 {offsets = [0, 0], sizes = [8, 128], strides = [1, 1]} : vector<8x512xf32> to vector<8x128xf32>
    %91 = vector.extract_strided_slice %88 {offsets = [0, 128], sizes = [8, 128], strides = [1, 1]} : vector<8x512xf32> to vector<8x128xf32>
    %92 = vector.extract_strided_slice %89 {offsets = [0, 256], sizes = [8, 128], strides = [1, 1]} : vector<8x512xf32> to vector<8x128xf32>
    %93 = vector.extract_strided_slice %88 {offsets = [0, 384], sizes = [8, 128], strides = [1, 1]} : vector<8x512xf32> to vector<8x128xf32>
    %94 = arith.mulf %91, %74 : vector<8x128xf32>
    %95 = arith.mulf %90, %92 : vector<8x128xf32>
    %96 = arith.addf %94, %95 : vector<8x128xf32>
    %97 = math.tanh %96 : vector<8x128xf32>
    %98 = arith.mulf %93, %97 : vector<8x128xf32>
    %99 = arith.index_cast %79 : i32 to index
    %c0_32 = arith.constant 0 : index
    %100 = vector.load %arg7[%99, %c0_32] : memref<64x128xf32, #tpu.memory_space<vmem>>, vector<8x128xf32>
    tpu.vector_store %arg7[%99, %c0_32], %98 {strides = array<i32>} : memref<64x128xf32, #tpu.memory_space<vmem>>, vector<8x128xf32>,
    %c4_i32 = arith.constant 4 : i32
    %c8_i32_33 = arith.constant 8 : i32
    %101 = arith.muli %c4_i32, %c8_i32_33 : i32
    %102 = arith.index_cast %101 : i32 to index
    %c0_34 = arith.constant 0 : index
    %103 = vector.load %arg9[%102, %c0_34] : memref<64x512xf32, #tpu.memory_space<vmem>>, vector<8x512xf32>
    %cst_35 = arith.constant dense<0.000000e+00> : vector<8x512xf32>
    %104 = tpu.matmul %98, %3, %cst_35 {dimension_numbers = #tpu.dot_dimension_numbers<[1], [0], [0], [1], [0, 0, 1, 1], [], []>} : vector<8x128xf32>, vector<128x512xf32>, vector<8x512xf32> -> vector<8x512xf32>
    %105 = arith.addf %103, %104 : vector<8x512xf32>
    %106 = arith.negf %105 : vector<8x512xf32>
    %107 = math.exp %106 : vector<8x512xf32>
    %cst_36 = arith.constant 1.000000e+00 : f32
    %108 = vector.broadcast %cst_36 : f32 to vector<8x512xf32>
    %109 = arith.addf %108, %107 : vector<8x512xf32>
    %110 = arith.divf %108, %109 : vector<8x512xf32>
    %111 = math.tanh %105 : vector<8x512xf32>
    %112 = vector.extract_strided_slice %110 {offsets = [0, 0], sizes = [8, 128], strides = [1, 1]} : vector<8x512xf32> to vector<8x128xf32>
    %113 = vector.extract_strided_slice %110 {offsets = [0, 128], sizes = [8, 128], strides = [1, 1]} : vector<8x512xf32> to vector<8x128xf32>
    %114 = vector.extract_strided_slice %111 {offsets = [0, 256], sizes = [8, 128], strides = [1, 1]} : vector<8x512xf32> to vector<8x128xf32>
    %115 = vector.extract_strided_slice %110 {offsets = [0, 384], sizes = [8, 128], strides = [1, 1]} : vector<8x512xf32> to vector<8x128xf32>
    %116 = arith.mulf %113, %96 : vector<8x128xf32>
    %117 = arith.mulf %112, %114 : vector<8x128xf32>
    %118 = arith.addf %116, %117 : vector<8x128xf32>
    %119 = math.tanh %118 : vector<8x128xf32>
    %120 = arith.mulf %115, %119 : vector<8x128xf32>
    %121 = arith.index_cast %101 : i32 to index
    %c0_37 = arith.constant 0 : index
    %122 = vector.load %arg7[%121, %c0_37] : memref<64x128xf32, #tpu.memory_space<vmem>>, vector<8x128xf32>
    tpu.vector_store %arg7[%121, %c0_37], %120 {strides = array<i32>} : memref<64x128xf32, #tpu.memory_space<vmem>>, vector<8x128xf32>,
    %c5_i32 = arith.constant 5 : i32
    %c8_i32_38 = arith.constant 8 : i32
    %123 = arith.muli %c5_i32, %c8_i32_38 : i32
    %124 = arith.index_cast %123 : i32 to index
    %c0_39 = arith.constant 0 : index
    %125 = vector.load %arg9[%124, %c0_39] : memref<64x512xf32, #tpu.memory_space<vmem>>, vector<8x512xf32>
    %cst_40 = arith.constant dense<0.000000e+00> : vector<8x512xf32>
    %126 = tpu.matmul %120, %3, %cst_40 {dimension_numbers = #tpu.dot_dimension_numbers<[1], [0], [0], [1], [0, 0, 1, 1], [], []>} : vector<8x128xf32>, vector<128x512xf32>, vector<8x512xf32> -> vector<8x512xf32>
    %127 = arith.addf %125, %126 : vector<8x512xf32>
    %128 = arith.negf %127 : vector<8x512xf32>
    %129 = math.exp %128 : vector<8x512xf32>
    %cst_41 = arith.constant 1.000000e+00 : f32
    %130 = vector.broadcast %cst_41 : f32 to vector<8x512xf32>
    %131 = arith.addf %130, %129 : vector<8x512xf32>
    %132 = arith.divf %130, %131 : vector<8x512xf32>
    %133 = math.tanh %127 : vector<8x512xf32>
    %134 = vector.extract_strided_slice %132 {offsets = [0, 0], sizes = [8, 128], strides = [1, 1]} : vector<8x512xf32> to vector<8x128xf32>
    %135 = vector.extract_strided_slice %132 {offsets = [0, 128], sizes = [8, 128], strides = [1, 1]} : vector<8x512xf32> to vector<8x128xf32>
    %136 = vector.extract_strided_slice %133 {offsets = [0, 256], sizes = [8, 128], strides = [1, 1]} : vector<8x512xf32> to vector<8x128xf32>
    %137 = vector.extract_strided_slice %132 {offsets = [0, 384], sizes = [8, 128], strides = [1, 1]} : vector<8x512xf32> to vector<8x128xf32>
    %138 = arith.mulf %135, %118 : vector<8x128xf32>
    %139 = arith.mulf %134, %136 : vector<8x128xf32>
    %140 = arith.addf %138, %139 : vector<8x128xf32>
    %141 = math.tanh %140 : vector<8x128xf32>
    %142 = arith.mulf %137, %141 : vector<8x128xf32>
    %143 = arith.index_cast %123 : i32 to index
    %c0_42 = arith.constant 0 : index
    %144 = vector.load %arg7[%143, %c0_42] : memref<64x128xf32, #tpu.memory_space<vmem>>, vector<8x128xf32>
    tpu.vector_store %arg7[%143, %c0_42], %142 {strides = array<i32>} : memref<64x128xf32, #tpu.memory_space<vmem>>, vector<8x128xf32>,
    %c6_i32 = arith.constant 6 : i32
    %c8_i32_43 = arith.constant 8 : i32
    %145 = arith.muli %c6_i32, %c8_i32_43 : i32
    %146 = arith.index_cast %145 : i32 to index
    %c0_44 = arith.constant 0 : index
    %147 = vector.load %arg9[%146, %c0_44] : memref<64x512xf32, #tpu.memory_space<vmem>>, vector<8x512xf32>
    %cst_45 = arith.constant dense<0.000000e+00> : vector<8x512xf32>
    %148 = tpu.matmul %142, %3, %cst_45 {dimension_numbers = #tpu.dot_dimension_numbers<[1], [0], [0], [1], [0, 0, 1, 1], [], []>} : vector<8x128xf32>, vector<128x512xf32>, vector<8x512xf32> -> vector<8x512xf32>
    %149 = arith.addf %147, %148 : vector<8x512xf32>
    %150 = arith.negf %149 : vector<8x512xf32>
    %151 = math.exp %150 : vector<8x512xf32>
    %cst_46 = arith.constant 1.000000e+00 : f32
    %152 = vector.broadcast %cst_46 : f32 to vector<8x512xf32>
    %153 = arith.addf %152, %151 : vector<8x512xf32>
    %154 = arith.divf %152, %153 : vector<8x512xf32>
    %155 = math.tanh %149 : vector<8x512xf32>
    %156 = vector.extract_strided_slice %154 {offsets = [0, 0], sizes = [8, 128], strides = [1, 1]} : vector<8x512xf32> to vector<8x128xf32>
    %157 = vector.extract_strided_slice %154 {offsets = [0, 128], sizes = [8, 128], strides = [1, 1]} : vector<8x512xf32> to vector<8x128xf32>
    %158 = vector.extract_strided_slice %155 {offsets = [0, 256], sizes = [8, 128], strides = [1, 1]} : vector<8x512xf32> to vector<8x128xf32>
    %159 = vector.extract_strided_slice %154 {offsets = [0, 384], sizes = [8, 128], strides = [1, 1]} : vector<8x512xf32> to vector<8x128xf32>
    %160 = arith.mulf %157, %140 : vector<8x128xf32>
    %161 = arith.mulf %156, %158 : vector<8x128xf32>
    %162 = arith.addf %160, %161 : vector<8x128xf32>
    %163 = math.tanh %162 : vector<8x128xf32>
    %164 = arith.mulf %159, %163 : vector<8x128xf32>
    %165 = arith.index_cast %145 : i32 to index
    %c0_47 = arith.constant 0 : index
    %166 = vector.load %arg7[%165, %c0_47] : memref<64x128xf32, #tpu.memory_space<vmem>>, vector<8x128xf32>
    tpu.vector_store %arg7[%165, %c0_47], %164 {strides = array<i32>} : memref<64x128xf32, #tpu.memory_space<vmem>>, vector<8x128xf32>,
    %c7_i32 = arith.constant 7 : i32
    %c8_i32_48 = arith.constant 8 : i32
    %167 = arith.muli %c7_i32, %c8_i32_48 : i32
    %168 = arith.index_cast %167 : i32 to index
    %c0_49 = arith.constant 0 : index
    %169 = vector.load %arg9[%168, %c0_49] : memref<64x512xf32, #tpu.memory_space<vmem>>, vector<8x512xf32>
    %cst_50 = arith.constant dense<0.000000e+00> : vector<8x512xf32>
    %170 = tpu.matmul %164, %3, %cst_50 {dimension_numbers = #tpu.dot_dimension_numbers<[1], [0], [0], [1], [0, 0, 1, 1], [], []>} : vector<8x128xf32>, vector<128x512xf32>, vector<8x512xf32> -> vector<8x512xf32>
    %171 = arith.addf %169, %170 : vector<8x512xf32>
    %172 = arith.negf %171 : vector<8x512xf32>
    %173 = math.exp %172 : vector<8x512xf32>
    %cst_51 = arith.constant 1.000000e+00 : f32
    %174 = vector.broadcast %cst_51 : f32 to vector<8x512xf32>
    %175 = arith.addf %174, %173 : vector<8x512xf32>
    %176 = arith.divf %174, %175 : vector<8x512xf32>
    %177 = math.tanh %171 : vector<8x512xf32>
    %178 = vector.extract_strided_slice %176 {offsets = [0, 0], sizes = [8, 128], strides = [1, 1]} : vector<8x512xf32> to vector<8x128xf32>
    %179 = vector.extract_strided_slice %176 {offsets = [0, 128], sizes = [8, 128], strides = [1, 1]} : vector<8x512xf32> to vector<8x128xf32>
    %180 = vector.extract_strided_slice %177 {offsets = [0, 256], sizes = [8, 128], strides = [1, 1]} : vector<8x512xf32> to vector<8x128xf32>
    %181 = vector.extract_strided_slice %176 {offsets = [0, 384], sizes = [8, 128], strides = [1, 1]} : vector<8x512xf32> to vector<8x128xf32>
    %182 = arith.mulf %179, %162 : vector<8x128xf32>
    %183 = arith.mulf %178, %180 : vector<8x128xf32>
    %184 = arith.addf %182, %183 : vector<8x128xf32>
    %185 = math.tanh %184 : vector<8x128xf32>
    %186 = arith.mulf %181, %185 : vector<8x128xf32>
    %187 = arith.index_cast %167 : i32 to index
    %c0_52 = arith.constant 0 : index
    %188 = vector.load %arg7[%187, %c0_52] : memref<64x128xf32, #tpu.memory_space<vmem>>, vector<8x128xf32>
    tpu.vector_store %arg7[%187, %c0_52], %186 {strides = array<i32>} : memref<64x128xf32, #tpu.memory_space<vmem>>, vector<8x128xf32>,
    %c8_i32_53 = arith.constant 8 : i32
    %c1 = arith.constant 1 : index
    %c0_54 = arith.constant 0 : index
    %c0_55 = arith.constant 0 : index
    %189 = vector.load %arg1[%c1, %c0_54, %c0_55] : memref<2x128x512xf32, #tpu.memory_space<vmem>>, vector<1x128x512xf32>
    %190 = vector.shape_cast %189 : vector<1x128x512xf32> to vector<128x512xf32>
    %c1_56 = arith.constant 1 : index
    %c0_57 = arith.constant 0 : index
    %c0_58 = arith.constant 0 : index
    %191 = vector.load %arg2[%c1_56, %c0_57, %c0_58] : memref<2x128x512xf32, #tpu.memory_space<vmem>>, vector<1x128x512xf32>
    %192 = vector.shape_cast %191 : vector<1x128x512xf32> to vector<128x512xf32>
    %c1_59 = arith.constant 1 : index
    %c0_60 = arith.constant 0 : index
    %c0_61 = arith.constant 0 : index
    %193 = vector.load %arg3[%c1_59, %c0_60, %c0_61] : memref<2x1x512xf32, #tpu.memory_space<vmem>>, vector<1x1x512xf32>
    %194 = vector.shape_cast %193 : vector<1x1x512xf32> to vector<1x512xf32>
    %c0_62 = arith.constant 0 : index
    %c0_63 = arith.constant 0 : index
    %195 = vector.load %arg7[%c0_62, %c0_63] : memref<64x128xf32, #tpu.memory_space<vmem>>, vector<64x128xf32>
    %cst_64 = arith.constant dense<0.000000e+00> : vector<64x512xf32>
    %196 = tpu.matmul %195, %190, %cst_64 {dimension_numbers = #tpu.dot_dimension_numbers<[1], [0], [0], [1], [0, 0, 1, 1], [], []>} : vector<64x128xf32>, vector<128x512xf32>, vector<64x512xf32> -> vector<64x512xf32>
    %197 = vector.broadcast %194 : vector<1x512xf32> to vector<64x512xf32>
    %198 = arith.addf %196, %197 : vector<64x512xf32>
    %c0_65 = arith.constant 0 : index
    %c0_66 = arith.constant 0 : index
    %199 = vector.load %arg9[%c0_65, %c0_66] : memref<64x512xf32, #tpu.memory_space<vmem>>, vector<64x512xf32>
    tpu.vector_store %arg9[%c0_65, %c0_66], %198 {strides = array<i32>} : memref<64x512xf32, #tpu.memory_space<vmem>>, vector<64x512xf32>,
    %cst_67 = arith.constant 0.000000e+00 : f32
    %200 = vector.broadcast %cst_67 : f32 to vector<8x128xf32>
    %cst_68 = arith.constant 0.000000e+00 : f32
    %201 = vector.broadcast %cst_68 : f32 to vector<8x128xf32>
    %c0_i32_69 = arith.constant 0 : i32
    %c8_i32_70 = arith.constant 8 : i32
    %202 = arith.muli %c0_i32_69, %c8_i32_70 : i32
    %203 = arith.index_cast %202 : i32 to index
    %c0_71 = arith.constant 0 : index
    %204 = vector.load %arg9[%203, %c0_71] : memref<64x512xf32, #tpu.memory_space<vmem>>, vector<8x512xf32>
    %cst_72 = arith.constant dense<0.000000e+00> : vector<8x512xf32>
    %205 = tpu.matmul %200, %192, %cst_72 {dimension_numbers = #tpu.dot_dimension_numbers<[1], [0], [0], [1], [0, 0, 1, 1], [], []>} : vector<8x128xf32>, vector<128x512xf32>, vector<8x512xf32> -> vector<8x512xf32>
    %206 = arith.addf %204, %205 : vector<8x512xf32>
    %207 = arith.negf %206 : vector<8x512xf32>
    %208 = math.exp %207 : vector<8x512xf32>
    %cst_73 = arith.constant 1.000000e+00 : f32
    %209 = vector.broadcast %cst_73 : f32 to vector<8x512xf32>
    %210 = arith.addf %209, %208 : vector<8x512xf32>
    %211 = arith.divf %209, %210 : vector<8x512xf32>
    %212 = math.tanh %206 : vector<8x512xf32>
    %213 = vector.extract_strided_slice %211 {offsets = [0, 0], sizes = [8, 128], strides = [1, 1]} : vector<8x512xf32> to vector<8x128xf32>
    %214 = vector.extract_strided_slice %211 {offsets = [0, 128], sizes = [8, 128], strides = [1, 1]} : vector<8x512xf32> to vector<8x128xf32>
    %215 = vector.extract_strided_slice %212 {offsets = [0, 256], sizes = [8, 128], strides = [1, 1]} : vector<8x512xf32> to vector<8x128xf32>
    %216 = vector.extract_strided_slice %211 {offsets = [0, 384], sizes = [8, 128], strides = [1, 1]} : vector<8x512xf32> to vector<8x128xf32>
    %217 = arith.mulf %214, %201 : vector<8x128xf32>
    %218 = arith.mulf %213, %215 : vector<8x128xf32>
    %219 = arith.addf %217, %218 : vector<8x128xf32>
    %220 = math.tanh %219 : vector<8x128xf32>
    %221 = arith.mulf %216, %220 : vector<8x128xf32>
    %c1_i32_74 = arith.constant 1 : i32
    %c8_i32_75 = arith.constant 8 : i32
    %222 = arith.muli %c1_i32_74, %c8_i32_75 : i32
    %223 = arith.index_cast %222 : i32 to index
    %c0_76 = arith.constant 0 : index
    %224 = vector.load %arg9[%223, %c0_76] : memref<64x512xf32, #tpu.memory_space<vmem>>, vector<8x512xf32>
    %cst_77 = arith.constant dense<0.000000e+00> : vector<8x512xf32>
    %225 = tpu.matmul %221, %192, %cst_77 {dimension_numbers = #tpu.dot_dimension_numbers<[1], [0], [0], [1], [0, 0, 1, 1], [], []>} : vector<8x128xf32>, vector<128x512xf32>, vector<8x512xf32> -> vector<8x512xf32>
    %226 = arith.addf %224, %225 : vector<8x512xf32>
    %227 = arith.negf %226 : vector<8x512xf32>
    %228 = math.exp %227 : vector<8x512xf32>
    %cst_78 = arith.constant 1.000000e+00 : f32
    %229 = vector.broadcast %cst_78 : f32 to vector<8x512xf32>
    %230 = arith.addf %229, %228 : vector<8x512xf32>
    %231 = arith.divf %229, %230 : vector<8x512xf32>
    %232 = math.tanh %226 : vector<8x512xf32>
    %233 = vector.extract_strided_slice %231 {offsets = [0, 0], sizes = [8, 128], strides = [1, 1]} : vector<8x512xf32> to vector<8x128xf32>
    %234 = vector.extract_strided_slice %231 {offsets = [0, 128], sizes = [8, 128], strides = [1, 1]} : vector<8x512xf32> to vector<8x128xf32>
    %235 = vector.extract_strided_slice %232 {offsets = [0, 256], sizes = [8, 128], strides = [1, 1]} : vector<8x512xf32> to vector<8x128xf32>
    %236 = vector.extract_strided_slice %231 {offsets = [0, 384], sizes = [8, 128], strides = [1, 1]} : vector<8x512xf32> to vector<8x128xf32>
    %237 = arith.mulf %234, %219 : vector<8x128xf32>
    %238 = arith.mulf %233, %235 : vector<8x128xf32>
    %239 = arith.addf %237, %238 : vector<8x128xf32>
    %240 = math.tanh %239 : vector<8x128xf32>
    %241 = arith.mulf %236, %240 : vector<8x128xf32>
    %c2_i32_79 = arith.constant 2 : i32
    %c8_i32_80 = arith.constant 8 : i32
    %242 = arith.muli %c2_i32_79, %c8_i32_80 : i32
    %243 = arith.index_cast %242 : i32 to index
    %c0_81 = arith.constant 0 : index
    %244 = vector.load %arg9[%243, %c0_81] : memref<64x512xf32, #tpu.memory_space<vmem>>, vector<8x512xf32>
    %cst_82 = arith.constant dense<0.000000e+00> : vector<8x512xf32>
    %245 = tpu.matmul %241, %192, %cst_82 {dimension_numbers = #tpu.dot_dimension_numbers<[1], [0], [0], [1], [0, 0, 1, 1], [], []>} : vector<8x128xf32>, vector<128x512xf32>, vector<8x512xf32> -> vector<8x512xf32>
    %246 = arith.addf %244, %245 : vector<8x512xf32>
    %247 = arith.negf %246 : vector<8x512xf32>
    %248 = math.exp %247 : vector<8x512xf32>
    %cst_83 = arith.constant 1.000000e+00 : f32
    %249 = vector.broadcast %cst_83 : f32 to vector<8x512xf32>
    %250 = arith.addf %249, %248 : vector<8x512xf32>
    %251 = arith.divf %249, %250 : vector<8x512xf32>
    %252 = math.tanh %246 : vector<8x512xf32>
    %253 = vector.extract_strided_slice %251 {offsets = [0, 0], sizes = [8, 128], strides = [1, 1]} : vector<8x512xf32> to vector<8x128xf32>
    %254 = vector.extract_strided_slice %251 {offsets = [0, 128], sizes = [8, 128], strides = [1, 1]} : vector<8x512xf32> to vector<8x128xf32>
    %255 = vector.extract_strided_slice %252 {offsets = [0, 256], sizes = [8, 128], strides = [1, 1]} : vector<8x512xf32> to vector<8x128xf32>
    %256 = vector.extract_strided_slice %251 {offsets = [0, 384], sizes = [8, 128], strides = [1, 1]} : vector<8x512xf32> to vector<8x128xf32>
    %257 = arith.mulf %254, %239 : vector<8x128xf32>
    %258 = arith.mulf %253, %255 : vector<8x128xf32>
    %259 = arith.addf %257, %258 : vector<8x128xf32>
    %260 = math.tanh %259 : vector<8x128xf32>
    %261 = arith.mulf %256, %260 : vector<8x128xf32>
    %c3_i32_84 = arith.constant 3 : i32
    %c8_i32_85 = arith.constant 8 : i32
    %262 = arith.muli %c3_i32_84, %c8_i32_85 : i32
    %263 = arith.index_cast %262 : i32 to index
    %c0_86 = arith.constant 0 : index
    %264 = vector.load %arg9[%263, %c0_86] : memref<64x512xf32, #tpu.memory_space<vmem>>, vector<8x512xf32>
    %cst_87 = arith.constant dense<0.000000e+00> : vector<8x512xf32>
    %265 = tpu.matmul %261, %192, %cst_87 {dimension_numbers = #tpu.dot_dimension_numbers<[1], [0], [0], [1], [0, 0, 1, 1], [], []>} : vector<8x128xf32>, vector<128x512xf32>, vector<8x512xf32> -> vector<8x512xf32>
    %266 = arith.addf %264, %265 : vector<8x512xf32>
    %267 = arith.negf %266 : vector<8x512xf32>
    %268 = math.exp %267 : vector<8x512xf32>
    %cst_88 = arith.constant 1.000000e+00 : f32
    %269 = vector.broadcast %cst_88 : f32 to vector<8x512xf32>
    %270 = arith.addf %269, %268 : vector<8x512xf32>
    %271 = arith.divf %269, %270 : vector<8x512xf32>
    %272 = math.tanh %266 : vector<8x512xf32>
    %273 = vector.extract_strided_slice %271 {offsets = [0, 0], sizes = [8, 128], strides = [1, 1]} : vector<8x512xf32> to vector<8x128xf32>
    %274 = vector.extract_strided_slice %271 {offsets = [0, 128], sizes = [8, 128], strides = [1, 1]} : vector<8x512xf32> to vector<8x128xf32>
    %275 = vector.extract_strided_slice %272 {offsets = [0, 256], sizes = [8, 128], strides = [1, 1]} : vector<8x512xf32> to vector<8x128xf32>
    %276 = vector.extract_strided_slice %271 {offsets = [0, 384], sizes = [8, 128], strides = [1, 1]} : vector<8x512xf32> to vector<8x128xf32>
    %277 = arith.mulf %274, %259 : vector<8x128xf32>
    %278 = arith.mulf %273, %275 : vector<8x128xf32>
    %279 = arith.addf %277, %278 : vector<8x128xf32>
    %280 = math.tanh %279 : vector<8x128xf32>
    %281 = arith.mulf %276, %280 : vector<8x128xf32>
    %c4_i32_89 = arith.constant 4 : i32
    %c8_i32_90 = arith.constant 8 : i32
    %282 = arith.muli %c4_i32_89, %c8_i32_90 : i32
    %283 = arith.index_cast %282 : i32 to index
    %c0_91 = arith.constant 0 : index
    %284 = vector.load %arg9[%283, %c0_91] : memref<64x512xf32, #tpu.memory_space<vmem>>, vector<8x512xf32>
    %cst_92 = arith.constant dense<0.000000e+00> : vector<8x512xf32>
    %285 = tpu.matmul %281, %192, %cst_92 {dimension_numbers = #tpu.dot_dimension_numbers<[1], [0], [0], [1], [0, 0, 1, 1], [], []>} : vector<8x128xf32>, vector<128x512xf32>, vector<8x512xf32> -> vector<8x512xf32>
    %286 = arith.addf %284, %285 : vector<8x512xf32>
    %287 = arith.negf %286 : vector<8x512xf32>
    %288 = math.exp %287 : vector<8x512xf32>
    %cst_93 = arith.constant 1.000000e+00 : f32
    %289 = vector.broadcast %cst_93 : f32 to vector<8x512xf32>
    %290 = arith.addf %289, %288 : vector<8x512xf32>
    %291 = arith.divf %289, %290 : vector<8x512xf32>
    %292 = math.tanh %286 : vector<8x512xf32>
    %293 = vector.extract_strided_slice %291 {offsets = [0, 0], sizes = [8, 128], strides = [1, 1]} : vector<8x512xf32> to vector<8x128xf32>
    %294 = vector.extract_strided_slice %291 {offsets = [0, 128], sizes = [8, 128], strides = [1, 1]} : vector<8x512xf32> to vector<8x128xf32>
    %295 = vector.extract_strided_slice %292 {offsets = [0, 256], sizes = [8, 128], strides = [1, 1]} : vector<8x512xf32> to vector<8x128xf32>
    %296 = vector.extract_strided_slice %291 {offsets = [0, 384], sizes = [8, 128], strides = [1, 1]} : vector<8x512xf32> to vector<8x128xf32>
    %297 = arith.mulf %294, %279 : vector<8x128xf32>
    %298 = arith.mulf %293, %295 : vector<8x128xf32>
    %299 = arith.addf %297, %298 : vector<8x128xf32>
    %300 = math.tanh %299 : vector<8x128xf32>
    %301 = arith.mulf %296, %300 : vector<8x128xf32>
    %c5_i32_94 = arith.constant 5 : i32
    %c8_i32_95 = arith.constant 8 : i32
    %302 = arith.muli %c5_i32_94, %c8_i32_95 : i32
    %303 = arith.index_cast %302 : i32 to index
    %c0_96 = arith.constant 0 : index
    %304 = vector.load %arg9[%303, %c0_96] : memref<64x512xf32, #tpu.memory_space<vmem>>, vector<8x512xf32>
    %cst_97 = arith.constant dense<0.000000e+00> : vector<8x512xf32>
    %305 = tpu.matmul %301, %192, %cst_97 {dimension_numbers = #tpu.dot_dimension_numbers<[1], [0], [0], [1], [0, 0, 1, 1], [], []>} : vector<8x128xf32>, vector<128x512xf32>, vector<8x512xf32> -> vector<8x512xf32>
    %306 = arith.addf %304, %305 : vector<8x512xf32>
    %307 = arith.negf %306 : vector<8x512xf32>
    %308 = math.exp %307 : vector<8x512xf32>
    %cst_98 = arith.constant 1.000000e+00 : f32
    %309 = vector.broadcast %cst_98 : f32 to vector<8x512xf32>
    %310 = arith.addf %309, %308 : vector<8x512xf32>
    %311 = arith.divf %309, %310 : vector<8x512xf32>
    %312 = math.tanh %306 : vector<8x512xf32>
    %313 = vector.extract_strided_slice %311 {offsets = [0, 0], sizes = [8, 128], strides = [1, 1]} : vector<8x512xf32> to vector<8x128xf32>
    %314 = vector.extract_strided_slice %311 {offsets = [0, 128], sizes = [8, 128], strides = [1, 1]} : vector<8x512xf32> to vector<8x128xf32>
    %315 = vector.extract_strided_slice %312 {offsets = [0, 256], sizes = [8, 128], strides = [1, 1]} : vector<8x512xf32> to vector<8x128xf32>
    %316 = vector.extract_strided_slice %311 {offsets = [0, 384], sizes = [8, 128], strides = [1, 1]} : vector<8x512xf32> to vector<8x128xf32>
    %317 = arith.mulf %314, %299 : vector<8x128xf32>
    %318 = arith.mulf %313, %315 : vector<8x128xf32>
    %319 = arith.addf %317, %318 : vector<8x128xf32>
    %320 = math.tanh %319 : vector<8x128xf32>
    %321 = arith.mulf %316, %320 : vector<8x128xf32>
    %c6_i32_99 = arith.constant 6 : i32
    %c8_i32_100 = arith.constant 8 : i32
    %322 = arith.muli %c6_i32_99, %c8_i32_100 : i32
    %323 = arith.index_cast %322 : i32 to index
    %c0_101 = arith.constant 0 : index
    %324 = vector.load %arg9[%323, %c0_101] : memref<64x512xf32, #tpu.memory_space<vmem>>, vector<8x512xf32>
    %cst_102 = arith.constant dense<0.000000e+00> : vector<8x512xf32>
    %325 = tpu.matmul %321, %192, %cst_102 {dimension_numbers = #tpu.dot_dimension_numbers<[1], [0], [0], [1], [0, 0, 1, 1], [], []>} : vector<8x128xf32>, vector<128x512xf32>, vector<8x512xf32> -> vector<8x512xf32>
    %326 = arith.addf %324, %325 : vector<8x512xf32>
    %327 = arith.negf %326 : vector<8x512xf32>
    %328 = math.exp %327 : vector<8x512xf32>
    %cst_103 = arith.constant 1.000000e+00 : f32
    %329 = vector.broadcast %cst_103 : f32 to vector<8x512xf32>
    %330 = arith.addf %329, %328 : vector<8x512xf32>
    %331 = arith.divf %329, %330 : vector<8x512xf32>
    %332 = math.tanh %326 : vector<8x512xf32>
    %333 = vector.extract_strided_slice %331 {offsets = [0, 0], sizes = [8, 128], strides = [1, 1]} : vector<8x512xf32> to vector<8x128xf32>
    %334 = vector.extract_strided_slice %331 {offsets = [0, 128], sizes = [8, 128], strides = [1, 1]} : vector<8x512xf32> to vector<8x128xf32>
    %335 = vector.extract_strided_slice %332 {offsets = [0, 256], sizes = [8, 128], strides = [1, 1]} : vector<8x512xf32> to vector<8x128xf32>
    %336 = vector.extract_strided_slice %331 {offsets = [0, 384], sizes = [8, 128], strides = [1, 1]} : vector<8x512xf32> to vector<8x128xf32>
    %337 = arith.mulf %334, %319 : vector<8x128xf32>
    %338 = arith.mulf %333, %335 : vector<8x128xf32>
    %339 = arith.addf %337, %338 : vector<8x128xf32>
    %340 = math.tanh %339 : vector<8x128xf32>
    %341 = arith.mulf %336, %340 : vector<8x128xf32>
    %c7_i32_104 = arith.constant 7 : i32
    %c8_i32_105 = arith.constant 8 : i32
    %342 = arith.muli %c7_i32_104, %c8_i32_105 : i32
    %343 = arith.index_cast %342 : i32 to index
    %c0_106 = arith.constant 0 : index
    %344 = vector.load %arg9[%343, %c0_106] : memref<64x512xf32, #tpu.memory_space<vmem>>, vector<8x512xf32>
    %cst_107 = arith.constant dense<0.000000e+00> : vector<8x512xf32>
    %345 = tpu.matmul %341, %192, %cst_107 {dimension_numbers = #tpu.dot_dimension_numbers<[1], [0], [0], [1], [0, 0, 1, 1], [], []>} : vector<8x128xf32>, vector<128x512xf32>, vector<8x512xf32> -> vector<8x512xf32>
    %346 = arith.addf %344, %345 : vector<8x512xf32>
    %347 = arith.negf %346 : vector<8x512xf32>
    %348 = math.exp %347 : vector<8x512xf32>
    %cst_108 = arith.constant 1.000000e+00 : f32
    %349 = vector.broadcast %cst_108 : f32 to vector<8x512xf32>
    %350 = arith.addf %349, %348 : vector<8x512xf32>
    %351 = arith.divf %349, %350 : vector<8x512xf32>
    %352 = math.tanh %346 : vector<8x512xf32>
    %353 = vector.extract_strided_slice %351 {offsets = [0, 0], sizes = [8, 128], strides = [1, 1]} : vector<8x512xf32> to vector<8x128xf32>
    %354 = vector.extract_strided_slice %351 {offsets = [0, 128], sizes = [8, 128], strides = [1, 1]} : vector<8x512xf32> to vector<8x128xf32>
    %355 = vector.extract_strided_slice %352 {offsets = [0, 256], sizes = [8, 128], strides = [1, 1]} : vector<8x512xf32> to vector<8x128xf32>
    %356 = vector.extract_strided_slice %351 {offsets = [0, 384], sizes = [8, 128], strides = [1, 1]} : vector<8x512xf32> to vector<8x128xf32>
    %357 = arith.mulf %354, %339 : vector<8x128xf32>
    %358 = arith.mulf %353, %355 : vector<8x128xf32>
    %359 = arith.addf %357, %358 : vector<8x128xf32>
    %360 = math.tanh %359 : vector<8x128xf32>
    %361 = arith.mulf %356, %360 : vector<8x128xf32>
    %c8_i32_109 = arith.constant 8 : i32
    %c0_110 = arith.constant 0 : index
    %c0_111 = arith.constant 0 : index
    %362 = vector.load %arg4[%c0_110, %c0_111] : memref<128x128xf32, #tpu.memory_space<vmem>>, vector<128x128xf32>
    %cst_112 = arith.constant dense<0.000000e+00> : vector<8x128xf32>
    %363 = tpu.matmul %361, %362, %cst_112 {dimension_numbers = #tpu.dot_dimension_numbers<[1], [0], [0], [1], [0, 0, 1, 1], [], []>} : vector<8x128xf32>, vector<128x128xf32>, vector<8x128xf32> -> vector<8x128xf32>
    %c0_113 = arith.constant 0 : index
    %c0_114 = arith.constant 0 : index
    %364 = vector.load %arg5[%c0_113, %c0_114] : memref<1x128xf32, #tpu.memory_space<vmem>>, vector<1x128xf32>
    %365 = vector.broadcast %364 : vector<1x128xf32> to vector<8x128xf32>
    %366 = arith.addf %363, %365 : vector<8x128xf32>
    %367 = arith.negf %366 : vector<8x128xf32>
    %368 = math.exp %367 : vector<8x128xf32>
    %cst_115 = arith.constant 1.000000e+00 : f32
    %369 = vector.broadcast %cst_115 : f32 to vector<8x128xf32>
    %370 = arith.addf %369, %368 : vector<8x128xf32>
    %371 = arith.divf %369, %370 : vector<8x128xf32>
    %c0_116 = arith.constant 0 : index
    %c0_117 = arith.constant 0 : index
    %372 = vector.load %arg6[%c0_116, %c0_117] : memref<8x128xf32, #tpu.memory_space<vmem>>, vector<8x128xf32>
    tpu.vector_store %arg6[%c0_116, %c0_117], %371 {strides = array<i32>} : memref<8x128xf32, #tpu.memory_space<vmem>>, vector<8x128xf32>,
    return
  }
}

</mosaic_0001>

<bundles_post_ra>
// kernel: tpu_custom_call.1
= control target key start
LH: loop header
LB: loop body
LE: loop exit
PB: predicated region body
PF: predicated region fallthrough
CT: control target
= control target key end

     0   :  { %11 = vsyncpa [#allocation6], 0  ;;  %s6664_s0 = inlined_call_operand.hbm [shape: f32[64,128], index: 0, kind: input, shape index: {}]   ;;  %s6665_s1 = inlined_call_operand.hbm [shape: f32[2,128,512], index: 1, kind: input, shape index: {}]   ;;  %s6666_s2 = inlined_call_operand.hbm [shape: f32[2,128,512], index: 2, kind: input, shape index: {}]   ;;  %s6667_s3 = inlined_call_operand.vmem [shape: f32[2,1,512], index: 3, kind: input, shape index: {}]   ;;  %s6668_s4 = inlined_call_operand.hbm [shape: f32[128,128], index: 4, kind: input, shape index: {}]   ;;  %s6669_s5 = inlined_call_operand.vmem [shape: f32[1,128], index: 5, kind: input, shape index: {}]   ;;  %s6670_s6 = inlined_call_operand.hbm [shape: f32[8,128], index: 6, kind: output, shape index: {}]  }
   0x1   :  { %12 = vsyncpa [#allocation9], 0 }
   0x2   :  { %13 = vsyncpa [#allocation12], 0 }
   0x3   :  { %14 = vsyncpa [#allocation7], 0  ;;  %s5620_s21 = smov [#allocation8]   ;;  %s5502_s25 = scalar_lea.hbm %s6665_s1, 16384 }
   0x4   :  { %s32_s22 = sshll.u32 %s5620_s21, 4  ;;  %p5503_p0 = scmp.ne.s32.totalorder %s6665_s1, %s5502_s25  ;;  %s33_s22 = int_to_ptr.vmem [resolvable:$true] %s32_s22 }
   0x5   :  { %p5506_p1 = scmp.lt.u32.totalorder %s5502_s25, %s6665_s1 }
   0x7   :  { %p5508_p2 = pnand %p5506_p1, %p5503_p0 }
   0x9   :  { %5511 = shalt.err (!%p5508_p2)
}
   0xa   :  { %s5512_s30 = scalar_lea.vmem %s33_s22, 16384  ;;  %p5517_p4 = scmp.lt.s32.totalorder %s33_s22, %s33_s22 }
   0xb   :  { %p5513_p3 = scmp.ne.s32.totalorder %s33_s22, %s5512_s30  ;;  %p5518_p5 = scmp.lt.s32.totalorder %s5512_s30, %s5512_s30 }
   0xd   :  { %p5519_p6 = por %p5518_p5, %p5517_p4 }
   0xf   :  { %p5520_p7 = pnand %p5519_p6, %p5513_p3 }
  0x11   :  { %5523 = shalt.err (!%p5520_p7)
}
  0x12   :  { %s5621_s7 = smov 512   ;;  %s5622_s8 = smov 32  }
  0x13   :  { %38 = dma.hbm_to_vmem [thread:$0]  %s6665_s1, 16384, %s33_s22, [#allocation9], %s5621_s7, %s5621_s7, %s5622_s8  }
  0x14   :  { %s5623_s11 = smov [#allocation5]   ;;  %s5524_s15 = scalar_lea.hbm %s6664_s0, 1024 }
  0x15   :  { %s20_s12 = sshll.u32 %s5623_s11, 4  ;;  %p5525_p8 = scmp.ne.s32.totalorder %s6664_s0, %s5524_s15  ;;  %s21_s12 = int_to_ptr.vmem [resolvable:$true] %s20_s12 }
  0x16   :  { %p5528_p9 = scmp.lt.u32.totalorder %s5524_s15, %s6664_s0 }
  0x18   :  { %p5530_p10 = pnand %p5528_p9, %p5525_p8 }
  0x1a   :  { %5533 = shalt.err (!%p5530_p10)
}
  0x1b   :  { %s5534_s20 = scalar_lea.vmem %s21_s12, 1024  ;;  %p5539_p12 = scmp.lt.s32.totalorder %s21_s12, %s21_s12 }
  0x1c   :  { %p5535_p11 = scmp.ne.s32.totalorder %s21_s12, %s5534_s20  ;;  %p5540_p13 = scmp.lt.s32.totalorder %s5534_s20, %s5534_s20 }
  0x1e   :  { %p5541_p0 = por %p5540_p13, %p5539_p12 }
  0x20   :  { %p5542_p1 = pnand %p5541_p0, %p5535_p11 }
  0x22   :  { %5545 = shalt.err (!%p5542_p1)
}
  0x23   :  { %s5624_s1 = smov 128   ;;  %s5625_s21 = smov 8  }
  0x24   :  { %26 = dma.hbm_to_vmem [thread:$0]  %s6664_s0, 1024, %s21_s12, [#allocation6], %s5624_s1, %s5624_s1, %s5625_s21  }
  0x25   :  { %s5626_s24 = smov [#allocation10]   ;;  %s5627_s26 = smov [#allocation11]  }
  0x26   :  { %s44_s25 = sshll.u32 %s5626_s24, 4  ;;  %s58_s27 = sshll.u32 %s5627_s26, 4  ;;  %s45_s25 = int_to_ptr.vmem [resolvable:$true] %s44_s25  ;;  %s5697_s27 = int_to_ptr.vmem [resolvable:$true] %s58_s27 }
  0x27   :  { %s5546_s30 = scalar_lea.hbm %s6666_s2, 16384 }
  0x28   :  { %p5547_p2 = scmp.ne.s32.totalorder %s6666_s2, %s5546_s30  ;;  %p5550_p3 = scmp.lt.u32.totalorder %s5546_s30, %s6666_s2 }
  0x2a   :  { %p5552_p4 = pnand %p5550_p3, %p5547_p2 }
  0x2c   :  { %5555 = shalt.err (!%p5552_p4)
}
  0x2d   :  { %s5556_s0 = scalar_lea.vmem %s45_s25, 16384  ;;  %p5561_p6 = scmp.lt.s32.totalorder %s45_s25, %s45_s25 }
  0x2e   :  { %p5557_p5 = scmp.ne.s32.totalorder %s45_s25, %s5556_s0  ;;  %p5562_p7 = scmp.lt.s32.totalorder %s5556_s0, %s5556_s0 }
  0x30   :  { %p5563_p8 = por %p5562_p7, %p5561_p6 }
  0x32   :  { %p5564_p9 = pnand %p5563_p8, %p5557_p5 }
  0x34   :  { %5567 = shalt.err (!%p5564_p9)
}
  0x35   :  { %50 = dma.hbm_to_vmem [thread:$0]  %s6666_s2, 16384, %s45_s25, [#allocation9], %s5621_s7, %s5621_s7, %s5622_s8  }
  0x36   :  { %s5568_s17 = scalar_lea.hbm %s6668_s4, 2048 }
  0x37   :  { %p5569_p10 = scmp.ne.s32.totalorder %s6668_s4, %s5568_s17  ;;  %p5572_p11 = scmp.lt.u32.totalorder %s5568_s17, %s6668_s4 }
  0x39   :  { %p5574_p12 = pnand %p5572_p11, %p5569_p10 }
  0x3b   :  { %5577 = shalt.err (!%p5574_p12)
}
  0x3c   :  { %s5578_s23 = scalar_lea.vmem %s5697_s27, 2048  ;;  %p5583_p0 = scmp.lt.s32.totalorder %s5697_s27, %s5697_s27 }
  0x3d   :  { %p5579_p13 = scmp.ne.s32.totalorder %s5697_s27, %s5578_s23  ;;  %p5584_p1 = scmp.lt.s32.totalorder %s5578_s23, %s5578_s23 }
  0x3f   :  { %p5585_p2 = por %p5584_p1, %p5583_p0 }
  0x41   :  { %p5586_p3 = pnand %p5585_p2, %p5579_p13 }
  0x43   :  { %5589 = shalt.err (!%p5586_p3)
}
  0x44   :  { %64 = dma.hbm_to_vmem [thread:$0]  %s6668_s4, 2048, %s5697_s27, [#allocation12], %s5624_s1, %s5624_s1, %s5625_s21  }
  0x45   :  { %5612 = dma.done.wait [#allocation6], 1024  }
  0x46   :  { %5613 = vsyncadd [#allocation6], 4294966272 }
  0x47   :  { %5614 = dma.done.wait [#allocation9], 32768  }
  0x48   :  { %5615 = vsyncadd [#allocation9], 4294934528 }
  0x49   :  { %5616 = dma.done.wait [#allocation12], 2048  }
  0x4a   :  { %5617 = vsyncadd [#allocation12], 4294965248  ;;  %v5628_v0 = vmov 0.0   ;;  %v80_v1 = vld [vmem:[#allocation8 + $0x8] sm:$0xff]  ;;  %v82_v3 = vld [vmem:[#allocation8 + $0x18] sm:$0xff]  ;;  %vm5630_vm0 = vmmov 0  }
  0x4b   :  { %301 = vmatprep.mubr.f32.mxu0 %v5628_v0  ;;  %414 = vmatprep.mubr.f32.mxu1 %v5628_v0  ;;  %v84_v2 = vld [vmem:[#allocation8 + $0x28] sm:$0xff]  ;;  %v86_v5 = vld [vmem:[#allocation8 + $0x38] sm:$0xff]  ;;  %v79_v6 = vld [vmem:[#allocation8] sm:$0xff]  ;;  %s5631_s25 = smov [#allocation13]  }
  0x4c   :  { %v3926_v4 = vpack.c.bf16 %v84_v2, %v80_v1  ;;  %v83_v7 = vld [vmem:[#allocation8 + $0x20] sm:$0xff]  ;;  %v3958_v8 = vpack.c.bf16 %v86_v5, %v82_v3  ;;  %v81_v10 = vld [vmem:[#allocation8 + $0x10] sm:$0xff]  ;;  %v88_v12 = vld [vmem:[#allocation8 + $0x48] sm:$0xff]  ;;  %s3812_s26 = sshll.u32 %s5631_s25, 4  ;;  %s3813_s26 = int_to_ptr.vmem [resolvable:$true] %s3812_s26 }
  0x4d   :  { %v3928_v9 = vpack.c.bf16 %v83_v7, %v79_v6  ;;  %v85_v11 = vld [vmem:[#allocation8 + $0x30] sm:$0xff]  ;;  %v92_v14 = vld [vmem:[#allocation8 + $0x68] sm:$0xff]  ;;  %v90_v15 = vld [vmem:[#allocation8 + $0x58] sm:$0xff]  ;;  %s5590_s27 = scalar_lea.vmem %s3813_s26, 128  ;;  %p5595_p5 = scmp.lt.s32.totalorder %s3813_s26, %s3813_s26 }
  0x4e   :  { %3927 = vmatprep.subr.bf16.mxu0 %v3926_v4  ;;  %v3960_v13 = vpack.c.bf16 %v85_v11, %v81_v10  ;;  %v94_v16 = vld [vmem:[#allocation8 + $0x78] sm:$0xff]  ;;  %3959 = vmatprep.subr.bf16.mxu1 %v3958_v8  ;;  %v3930_v17 = vpack.c.bf16 %v92_v14, %v88_v12  ;;  %v87_v19 = vld [vmem:[#allocation8 + $0x40] sm:$0xff]  ;;  %v89_v21 = vld [vmem:[#allocation8 + $0x50] sm:$0xff]  ;;  %p5591_p4 = scmp.ne.s32.totalorder %s3813_s26, %s5590_s27  ;;  %p5596_p6 = scmp.lt.s32.totalorder %s5590_s27, %s5590_s27 }
  0x4f   :  { %3929 = vmatpush1.bf16.msra.mxu0 %v3928_v9  ;;  %v3962_v18 = vpack.c.bf16 %v94_v16, %v90_v15  ;;  %v91_v20 = vld [vmem:[#allocation8 + $0x60] sm:$0xff]  ;;  %v93_v23 = vld [vmem:[#allocation8 + $0x70] sm:$0xff]  ;;  %v96_v24 = vld [vmem:[#allocation8 + $0x88] sm:$0xff] }
  0x50   :  { %3961 = vmatpush1.bf16.msra.mxu1 %v3960_v13  ;;  %v3932_v22 = vpack.c.bf16 %v91_v20, %v87_v19  ;;  %v100_v25 = vld [vmem:[#allocation8 + $0xa8] sm:$0xff]  ;;  %3931 = vmatprep.subr.bf16.mxu0 %v3930_v17  ;;  %v3964_v26 = vpack.c.bf16 %v93_v23, %v89_v21  ;;  %v98_v28 = vld [vmem:[#allocation8 + $0x98] sm:$0xff]  ;;  %v95_v30 = vld [vmem:[#allocation8 + $0x80] sm:$0xff]  ;;  %p5597_p7 = por %p5596_p6, %p5595_p5 }
  0x51   :  { %3963 = vmatprep.subr.bf16.mxu1 %v3962_v18  ;;  %v3934_v27 = vpack.c.bf16 %v100_v25, %v96_v24  ;;  %v102_v29 = vld [vmem:[#allocation8 + $0xb8] sm:$0xff]  ;;  %v99_v32 = vld [vmem:[#allocation8 + $0xa0] sm:$0xff]  ;;  %v97_v33 = vld [vmem:[#allocation8 + $0x90] sm:$0xff] }
  0x52   :  { %v3966_v31 = vpack.c.bf16 %v102_v29, %v98_v28  ;;  %v101_v34 = vld [vmem:[#allocation8 + $0xb0] sm:$0xff]  ;;  %v3936_v35 = vpack.c.bf16 %v99_v32, %v95_v30  ;;  %v104_v36 = vld [vmem:[#allocation8 + $0xc8] sm:$0xff]  ;;  %v106_v38 = vld [vmem:[#allocation8 + $0xd8] sm:$0xff]  ;;  %p5598_p8 = pnand %p5597_p7, %p5591_p4 }
  0x53   :  { %3933 = vmatpush1.bf16.msra.mxu0 %v3932_v22  ;;  %v108_v37 = vld [vmem:[#allocation8 + $0xe8] sm:$0xff]  ;;  %v3968_v39 = vpack.c.bf16 %v101_v34, %v97_v33  ;;  %v110_v41 = vld [vmem:[#allocation8 + $0xf8] sm:$0xff]  ;;  %v103_v42 = vld [vmem:[#allocation8 + $0xc0] sm:$0xff] }
  0x54   :  { %3965 = vmatpush1.bf16.msra.mxu1 %v3964_v26  ;;  %3935 = vmatprep.subr.bf16.mxu0 %v3934_v27  ;;  %v3938_v40 = vpack.c.bf16 %v108_v37, %v104_v36  ;;  %v107_v43 = vld [vmem:[#allocation8 + $0xe0] sm:$0xff]  ;;  %v3970_v44 = vpack.c.bf16 %v110_v41, %v106_v38  ;;  %v105_v45 = vld [vmem:[#allocation8 + $0xd0] sm:$0xff]  ;;  %v112_v47 = vld [vmem:[#allocation8 + $0x108] sm:$0xff] }
  0x55   :  { %3967 = vmatprep.subr.bf16.mxu1 %v3966_v31  ;;  %v109_v46 = vld [vmem:[#allocation8 + $0xf0] sm:$0xff]  ;;  %v116_v48 = vld [vmem:[#allocation8 + $0x128] sm:$0xff]  ;;  %v114_v49 = vld [vmem:[#allocation8 + $0x118] sm:$0xff]  ;;  %v3940_v51 = vpack.c.bf16 %v107_v43, %v103_v42 }
  0x56   :  { %v118_v50 = vld [vmem:[#allocation8 + $0x138] sm:$0xff]  ;;  %v3972_v52 = vpack.c.bf16 %v109_v46, %v105_v45  ;;  %v3942_v53 = vpack.c.bf16 %v116_v48, %v112_v47  ;;  %v111_v54 = vld [vmem:[#allocation8 + $0x100] sm:$0xff]  ;;  %v113_v56 = vld [vmem:[#allocation8 + $0x110] sm:$0xff] }
  0x57   :  { %3937 = vmatpush1.bf16.msra.mxu0 %v3936_v35  ;;  %v115_v55 = vld [vmem:[#allocation8 + $0x120] sm:$0xff]  ;;  %v3974_v57 = vpack.c.bf16 %v118_v50, %v114_v49  ;;  %v117_v58 = vld [vmem:[#allocation8 + $0x130] sm:$0xff]  ;;  %v120_v59 = vld [vmem:[#allocation8 + $0x148] sm:$0xff] }
  0x58   :  { %3969 = vmatpush1.bf16.msra.mxu1 %v3968_v39  ;;  %3939 = vmatprep.subr.bf16.mxu0 %v3938_v40  ;;  %v124_v60 = vld [vmem:[#allocation8 + $0x168] sm:$0xff]  ;;  %v122_v61 = vld [vmem:[#allocation8 + $0x158] sm:$0xff]  ;;  %v3944_v63 = vpack.c.bf16 %v115_v55, %v111_v54  ;;  %v3976_v1 = vpack.c.bf16 %v117_v58, %v113_v56  ;;  %v119_v3 = vld [vmem:[#allocation8 + $0x140] sm:$0xff] }
  0x59   :  { %3971 = vmatprep.subr.bf16.mxu1 %v3970_v44  ;;  %v126_v62 = vld [vmem:[#allocation8 + $0x178] sm:$0xff]  ;;  %v3946_v2 = vpack.c.bf16 %v124_v60, %v120_v59  ;;  %v123_v4 = vld [vmem:[#allocation8 + $0x160] sm:$0xff]  ;;  %v121_v5 = vld [vmem:[#allocation8 + $0x150] sm:$0xff] }
  0x5a   :  { %v3978_v6 = vpack.c.bf16 %v126_v62, %v122_v61  ;;  %v125_v7 = vld [vmem:[#allocation8 + $0x170] sm:$0xff]  ;;  %v128_v8 = vld [vmem:[#allocation8 + $0x188] sm:$0xff]  ;;  %v130_v10 = vld [vmem:[#allocation8 + $0x198] sm:$0xff]  ;;  %v3948_v12 = vpack.c.bf16 %v123_v4, %v119_v3 }
  0x5b   :  { %3941 = vmatpush1.bf16.msra.mxu0 %v3940_v51  ;;  %v132_v9 = vld [vmem:[#allocation8 + $0x1a8] sm:$0xff]  ;;  %v134_v11 = vld [vmem:[#allocation8 + $0x1b8] sm:$0xff]  ;;  %v3980_v13 = vpack.c.bf16 %v125_v7, %v121_v5  ;;  %v127_v15 = vld [vmem:[#allocation8 + $0x180] sm:$0xff] }
  0x5c   :  { %3973 = vmatpush1.bf16.msra.mxu1 %v3972_v52  ;;  %3943 = vmatprep.subr.bf16.mxu0 %v3942_v53  ;;  %v3950_v14 = vpack.c.bf16 %v132_v9, %v128_v8  ;;  %v131_v16 = vld [vmem:[#allocation8 + $0x1a0] sm:$0xff]  ;;  %v129_v17 = vld [vmem:[#allocation8 + $0x190] sm:$0xff]  ;;  %v3982_v18 = vpack.c.bf16 %v134_v11, %v130_v10  ;;  %v136_v20 = vld [vmem:[#allocation8 + $0x1c8] sm:$0xff] }
  0x5d   :  { %3975 = vmatprep.subr.bf16.mxu1 %v3974_v57  ;;  %v133_v19 = vld [vmem:[#allocation8 + $0x1b0] sm:$0xff]  ;;  %v140_v21 = vld [vmem:[#allocation8 + $0x1e8] sm:$0xff]  ;;  %v138_v22 = vld [vmem:[#allocation8 + $0x1d8] sm:$0xff]  ;;  %v3952_v24 = vpack.c.bf16 %v131_v16, %v127_v15 }
  0x5e   :  { %v142_v23 = vld [vmem:[#allocation8 + $0x1f8] sm:$0xff]  ;;  %v3984_v25 = vpack.c.bf16 %v133_v19, %v129_v17  ;;  %v3954_v26 = vpack.c.bf16 %v140_v21, %v136_v20  ;;  %v135_v27 = vld [vmem:[#allocation8 + $0x1c0] sm:$0xff]  ;;  %v137_v29 = vld [vmem:[#allocation8 + $0x1d0] sm:$0xff] }
  0x5f   :  { %3945 = vmatpush1.bf16.msra.mxu0 %v3944_v63  ;;  %v139_v28 = vld [vmem:[#allocation8 + $0x1e0] sm:$0xff]  ;;  %v3986_v30 = vpack.c.bf16 %v142_v23, %v138_v22  ;;  %v141_v31 = vld [vmem:[#allocation8 + $0x1f0] sm:$0xff]  ;;  %v144_v32 = vld [vmem:[#allocation10 + $0x8] sm:$0xff] }
  0x60   :  { %3977 = vmatpush1.bf16.msra.mxu1 %v3976_v1  ;;  %3947 = vmatprep.subr.bf16.mxu0 %v3946_v2  ;;  %v148_v33 = vld [vmem:[#allocation10 + $0x28] sm:$0xff]  ;;  %v146_v34 = vld [vmem:[#allocation10 + $0x18] sm:$0xff]  ;;  %v3956_v36 = vpack.c.bf16 %v139_v28, %v135_v27  ;;  %v3988_v37 = vpack.c.bf16 %v141_v31, %v137_v29  ;;  %v143_v39 = vld [vmem:[#allocation10] sm:$0xff] }
  0x61   :  { %3979 = vmatprep.subr.bf16.mxu1 %v3978_v6  ;;  %v150_v35 = vld [vmem:[#allocation10 + $0x38] sm:$0xff]  ;;  %v5736_v38 = vpack.c.bf16 %v148_v33, %v144_v32  ;;  %v147_v40 = vld [vmem:[#allocation10 + $0x20] sm:$0xff]  ;;  %v145_v42 = vld [vmem:[#allocation10 + $0x10] sm:$0xff] }
  0x62   :  { %v5738_v41 = vpack.c.bf16 %v150_v35, %v146_v34  ;;  %v149_v43 = vld [vmem:[#allocation10 + $0x30] sm:$0xff]  ;;  %v152_v44 = vld [vmem:[#allocation10 + $0x48] sm:$0xff]  ;;  %v208_v46 = vld [vmem:[#allocation5] sm:$0xff]  ;;  %v5740_v47 = vpack.c.bf16 %v147_v40, %v143_v39 }
  0x63   :  { %3949 = vmatpush1.bf16.msra.mxu0 %v3948_v12  ;;  %v156_v45 = vld [vmem:[#allocation10 + $0x68] sm:$0xff]  ;;  %v154_v48 = vld [vmem:[#allocation10 + $0x58] sm:$0xff]  ;;  %v5743_v50 = vpack.c.bf16 %v149_v43, %v145_v42  ;;  %v151_v51 = vld [vmem:[#allocation10 + $0x40] sm:$0xff] }
  0x64   :  { %3981 = vmatpush1.bf16.msra.mxu1 %v3980_v13  ;;  %3951 = vmatprep.subr.bf16.mxu0 %v3950_v14  ;;  %v158_v49 = vld [vmem:[#allocation10 + $0x78] sm:$0xff]  ;;  %v155_v52 = vld [vmem:[#allocation10 + $0x60] sm:$0xff]  ;;  %v5746_v53 = vpack.c.bf16 %v156_v45, %v152_v44  ;;  %v153_v54 = vld [vmem:[#allocation10 + $0x50] sm:$0xff] }
  0x65   :  { %3983 = vmatprep.subr.bf16.mxu1 %v3982_v18  ;;  %v157_v55 = vld [vmem:[#allocation10 + $0x70] sm:$0xff]  ;;  %v5748_v56 = vpack.c.bf16 %v158_v49, %v154_v48  ;;  %v160_v57 = vld [vmem:[#allocation10 + $0x88] sm:$0xff]  ;;  %v5751_v60 = vpack.c.bf16 %v155_v52, %v151_v51  ;;  %v162_v61 = vld [vmem:[#allocation10 + $0x98] sm:$0xff] }
  0x66   :  { %v164_v58 = vld [vmem:[#allocation10 + $0xa8] sm:$0xff]  ;;  %v166_v62 = vld [vmem:[#allocation10 + $0xb8] sm:$0xff]  ;;  %v5755_v63 = vpack.c.bf16 %v157_v55, %v153_v54  ;;  %v159_v1 = vld [vmem:[#allocation10 + $0x80] sm:$0xff] }
  0x67   :  { %3953 = vmatpush1.bf16.msra.mxu0 %v3952_v24  ;;  %v209_v59 = vld [vmem:[#allocation5 + $0x8] sm:$0xff]  ;;  %v163_v2 = vld [vmem:[#allocation10 + $0xa0] sm:$0xff]  ;;  %v5759_v3 = vpack.c.bf16 %v164_v58, %v160_v57  ;;  %v161_v4 = vld [vmem:[#allocation10 + $0x90] sm:$0xff]  ;;  %v5762_v6 = vpack.c.bf16 %v166_v62, %v162_v61 }
  0x68   :  { %3985 = vmatpush1.bf16.msra.mxu1 %v3984_v25  ;;  %3955 = vmatprep.subr.bf16.mxu0 %v3954_v26  ;;  %v165_v5 = vld [vmem:[#allocation10 + $0xb0] sm:$0xff]  ;;  %v168_v7 = vld [vmem:[#allocation10 + $0xc8] sm:$0xff]  ;;  %v5765_v10 = vpack.c.bf16 %v163_v2, %v159_v1  ;;  %v170_v11 = vld [vmem:[#allocation10 + $0xd8] sm:$0xff] }
  0x69   :  { %3987 = vmatprep.subr.bf16.mxu1 %v3986_v30  ;;  %v172_v8 = vld [vmem:[#allocation10 + $0xe8] sm:$0xff]  ;;  %v210_v9 = vld [vmem:[#allocation5 + $0x10] sm:$0xff]  ;;  %v174_v12 = vld [vmem:[#allocation10 + $0xf8] sm:$0xff]  ;;  %v5769_v13 = vpack.c.bf16 %v165_v5, %v161_v4 }
  0x6a   :  { %v167_v14 = vld [vmem:[#allocation10 + $0xc0] sm:$0xff]  ;;  %v5773_v16 = vpack.c.bf16 %v172_v8, %v168_v7  ;;  %v169_v17 = vld [vmem:[#allocation10 + $0xd0] sm:$0xff]  ;;  %v5776_v19 = vpack.c.bf16 %v174_v12, %v170_v11  ;;  %v176_v20 = vld [vmem:[#allocation10 + $0x108] sm:$0xff] }
  0x6b   :  { %3957 = vmatpush1.bf16.msra.mxu0 %v3956_v36  ;;  %v171_v15 = vld [vmem:[#allocation10 + $0xe0] sm:$0xff]  ;;  %v173_v18 = vld [vmem:[#allocation10 + $0xf0] sm:$0xff]  ;;  %v180_v21 = vld [vmem:[#allocation10 + $0x128] sm:$0xff] }
  0x6c   :  { %3989 = vmatpush1.bf16.msra.mxu1 %v3988_v37  ;;  %3991 = vmatprep.subr.bf16.mxu0 %v5736_v38  ;;  %v211_v22 = vld [vmem:[#allocation5 + $0x18] sm:$0xff]  ;;  %v5779_v23 = vpack.c.bf16 %v171_v15, %v167_v14  ;;  %v5783_v26 = vpack.c.bf16 %v173_v18, %v169_v17  ;;  %v175_v27 = vld [vmem:[#allocation10 + $0x100] sm:$0xff]  ;;  %v5787_v29 = vpack.c.bf16 %v180_v21, %v176_v20  ;;  %v177_v30 = vld [vmem:[#allocation10 + $0x110] sm:$0xff] }
  0x6d   :  { %4023 = vmatprep.subr.bf16.mxu1 %v5738_v41  ;;  %v178_v24 = vld [vmem:[#allocation10 + $0x118] sm:$0xff]  ;;  %v179_v28 = vld [vmem:[#allocation10 + $0x120] sm:$0xff]  ;;  %v181_v31 = vld [vmem:[#allocation10 + $0x130] sm:$0xff] }
  0x6e   :  { %302 = vmatmul.mubr.f32.vlgmr.msra.gmra.mrb[0].mxu0 %v208_v46  ;;  %v182_v25 = vld [vmem:[#allocation10 + $0x138] sm:$0xff]  ;;  %v184_v33 = vld [vmem:[#allocation10 + $0x148] sm:$0xff]  ;;  %v212_v35 = vld [vmem:[#allocation5 + $0x20] sm:$0xff]  ;;  %v5793_v36 = vpack.c.bf16 %v179_v28, %v175_v27  ;;  %v5797_v40 = vpack.c.bf16 %v181_v31, %v177_v30  ;;  %v217_v28 = vlaneseq }
  0x6f   :  { %415 = vmatmul.mubr.f32.vlgmr.msra.gmra.mrb[0].mxu1 %v208_v46  ;;  %3993 = vmatpush1.bf16.msra.mxu0 %v5740_v47  ;;  %v5790_v32 = vpack.c.bf16 %v182_v25, %v178_v24  ;;  %v188_v34 = vld [vmem:[#allocation10 + $0x168] sm:$0xff]  ;;  %v186_v37 = vld [vmem:[#allocation10 + $0x158] sm:$0xff]  ;;  %v183_v42 = vld [vmem:[#allocation10 + $0x140] sm:$0xff] }
  0x70   :  { %4025 = vmatpush1.bf16.msra.mxu1 %v5743_v50  ;;  %307 = vmatprep.mubr.f32.mxu0 %v5628_v0  ;;  %v190_v39 = vld [vmem:[#allocation10 + $0x178] sm:$0xff]  ;;  %v187_v43 = vld [vmem:[#allocation10 + $0x160] sm:$0xff]  ;;  %v5801_v44 = vpack.c.bf16 %v188_v34, %v184_v33  ;;  %v185_v45 = vld [vmem:[#allocation10 + $0x150] sm:$0xff]  ;;  %v5886_v30 = vshrl.u32 %v217_v28, 7 }
  0x71   :  { %420 = vmatprep.mubr.f32.mxu1 %v5628_v0  ;;  %3995 = vmatprep.subr.bf16.mxu0 %v5746_v53  ;;  %v189_v46 = vld [vmem:[#allocation10 + $0x170] sm:$0xff]  ;;  %v5804_v48 = vpack.c.bf16 %v190_v39, %v186_v37  ;;  %v192_v49 = vld [vmem:[#allocation10 + $0x188] sm:$0xff]  ;;  %v5807_v54 = vpack.c.bf16 %v187_v43, %v183_v42  ;;  %v194_v55 = vld [vmem:[#allocation10 + $0x198] sm:$0xff] }
  0x72   :  { %308 = vmatmul.mubr.f32.gmra.mrb[2].mxu0 %v209_v59  ;;  %4027 = vmatprep.subr.bf16.mxu1 %v5748_v56  ;;  %v196_v51 = vld [vmem:[#allocation10 + $0x1a8] sm:$0xff]  ;;  %v198_v57 = vld [vmem:[#allocation10 + $0x1b8] sm:$0xff]  ;;  %v5811_v58 = vpack.c.bf16 %v189_v46, %v185_v45  ;;  %v195_v61 = vld [vmem:[#allocation10 + $0x1a0] sm:$0xff]  ;;  %v219_v31 = vsub.s32 0, %v5886_v30  ;;  %v223_v34 = vsub.s32 1, %v5886_v30  ;;  %v231_v42 = vsub.s32 3, %v5886_v30 }
  0x73   :  { %421 = vmatmul.mubr.f32.gmra.mrb[2].mxu1 %v209_v59  ;;  %3997 = vmatpush1.bf16.msra.mxu0 %v5751_v60  ;;  %v213_v52 = vld [vmem:[#allocation5 + $0x28] sm:$0xff]  ;;  %v191_v59 = vld [vmem:[#allocation10 + $0x180] sm:$0xff]  ;;  %v5815_v62 = vpack.c.bf16 %v196_v51, %v192_v49  ;;  %v193_v1 = vld [vmem:[#allocation10 + $0x190] sm:$0xff]  ;;  %v5818_v4 = vpack.c.bf16 %v198_v57, %v194_v55 }
  0x74   :  { %4029 = vmatpush1.bf16.msra.mxu1 %v5755_v63  ;;  %313 = vmatprep.mubr.f32.mxu0 %v5628_v0  ;;  %v197_v2 = vld [vmem:[#allocation10 + $0x1b0] sm:$0xff]  ;;  %v200_v5 = vld [vmem:[#allocation10 + $0x1c8] sm:$0xff]  ;;  %v202_v11 = vld [vmem:[#allocation10 + $0x1d8] sm:$0xff] }
  0x75   :  { %426 = vmatprep.mubr.f32.mxu1 %v5628_v0  ;;  %3999 = vmatprep.subr.bf16.mxu0 %v5759_v3  ;;  %v204_v7 = vld [vmem:[#allocation10 + $0x1e8] sm:$0xff]  ;;  %v214_v8 = vld [vmem:[#allocation5 + $0x30] sm:$0xff]  ;;  %v206_v12 = vld [vmem:[#allocation10 + $0x1f8] sm:$0xff]  ;;  %v5825_v14 = vpack.c.bf16 %v197_v2, %v193_v1 }
  0x76   :  { %314 = vmatmul.mubr.f32.gmra.mrb[4].mxu0 %v210_v9  ;;  %4031 = vmatprep.subr.bf16.mxu1 %v5762_v6  ;;  %v199_v15 = vld [vmem:[#allocation10 + $0x1c0] sm:$0xff]  ;;  %v5829_v18 = vpack.c.bf16 %v204_v7, %v200_v5  ;;  %v201_v20 = vld [vmem:[#allocation10 + $0x1d0] sm:$0xff]  ;;  %v215_v24 = vld [vmem:[#allocation5 + $0x38] sm:$0xff] }
  0x77   :  { %427 = vmatmul.mubr.f32.gmra.mrb[4].mxu1 %v210_v9  ;;  %4001 = vmatpush1.bf16.msra.mxu0 %v5765_v10  ;;  %v5821_v9 = vpack.c.bf16 %v195_v61, %v191_v59  ;;  %v203_v17 = vld [vmem:[#allocation10 + $0x1e0] sm:$0xff]  ;;  %v205_v21 = vld [vmem:[#allocation10 + $0x1f0] sm:$0xff]  ;;  %v227_v59 = vsub.s32 2, %v5886_v30 }
  0x78   :  { %4033 = vmatpush1.bf16.msra.mxu1 %v5769_v13  ;;  %319 = vmatprep.mubr.f32.mxu0 %v5628_v0  ;;  %v5835_v25 = vpack.c.bf16 %v203_v17, %v199_v15  ;;  %v5839_v27 = vpack.c.bf16 %v205_v21, %v201_v20  ;;  %v207_v33 = vld [vmem:[%s6667_s3] sm:$0xf] }
  0x79   :  { %432 = vmatprep.mubr.f32.mxu1 %v5628_v0  ;;  %4003 = vmatprep.subr.bf16.mxu0 %v5773_v16  ;;  %v5899_v37 = vrot.slane %v207_v33, %v223_v34  ;;  %v5906_v57 = vrot.slane %v207_v33, %v231_v42  ;;  %v5912_v1 = vrot.slane %v207_v33, %v227_v59 }
  0x7a   :  { %320 = vmatmul.mubr.f32.gmra.mrb[6].mxu0 %v211_v22  ;;  %4035 = vmatprep.subr.bf16.mxu1 %v5776_v19 }
  0x7b   :  { %433 = vmatmul.mubr.f32.gmra.mrb[6].mxu1 %v211_v22  ;;  %4005 = vmatpush1.bf16.msra.mxu0 %v5779_v23  ;;  %v5832_v22 = vpack.c.bf16 %v206_v12, %v202_v11 }
  0x7c   :  { %4037 = vmatpush1.bf16.msra.mxu1 %v5783_v26  ;;  %325 = vmatprep.mubr.f32.mxu0 %v5628_v0 }
  0x7d   :  { %438 = vmatprep.mubr.f32.mxu1 %v5628_v0  ;;  %4007 = vmatprep.subr.bf16.mxu0 %v5787_v29 }
  0x7e   :  { %326 = vmatmul.mubr.f32.gmra.mrb[8].mxu0 %v212_v35  ;;  %4039 = vmatprep.subr.bf16.mxu1 %v5790_v32 }
  0x7f   :  { %439 = vmatmul.mubr.f32.gmra.mrb[8].mxu1 %v212_v35  ;;  %4009 = vmatpush1.bf16.msra.mxu0 %v5793_v36  ;;  %v5895_v35 = vrot.slane %v207_v33, %v219_v31 }
  0x80   :  { %4041 = vmatpush1.bf16.msra.mxu1 %v5797_v40  ;;  %331 = vmatprep.mubr.f32.mxu0 %v5628_v0 }
  0x81   :  { %444 = vmatprep.mubr.f32.mxu1 %v5628_v0  ;;  %4011 = vmatprep.subr.bf16.mxu0 %v5801_v44 }
  0x82   :  { %332 = vmatmul.mubr.f32.gmra.mrb[10].mxu0 %v213_v52  ;;  %4043 = vmatprep.subr.bf16.mxu1 %v5804_v48 }
  0x83   :  { %445 = vmatmul.mubr.f32.gmra.mrb[10].mxu1 %v213_v52  ;;  %4013 = vmatpush1.bf16.msra.mxu0 %v5807_v54 }
  0x84   :  { %4045 = vmatpush1.bf16.msra.mxu1 %v5811_v58  ;;  %337 = vmatprep.mubr.f32.mxu0 %v5628_v0 }
  0x85   :  { %450 = vmatprep.mubr.f32.mxu1 %v5628_v0  ;;  %4015 = vmatprep.subr.bf16.mxu0 %v5815_v62 }
  0x86   :  { %338 = vmatmul.mubr.f32.gmra.mrb[12].mxu0 %v214_v8  ;;  %4047 = vmatprep.subr.bf16.mxu1 %v5818_v4 }
  0x87   :  { %451 = vmatmul.mubr.f32.gmra.mrb[12].mxu1 %v214_v8  ;;  %4017 = vmatpush1.bf16.msra.mxu0 %v5821_v9 }
  0x88   :  { %4049 = vmatpush1.bf16.msra.mxu1 %v5825_v14  ;;  %343 = vmatprep.mubr.f32.mxu0 %v5628_v0 }
  0x89   :  { %456 = vmatprep.mubr.f32.mxu1 %v5628_v0  ;;  %4019 = vmatprep.subr.bf16.mxu0 %v5829_v18 }
  0x8a   :  { %344 = vmatmul.mubr.f32.gmra.mrb[14].mxu0 %v215_v24  ;;  %4051 = vmatprep.subr.bf16.mxu1 %v5832_v22 }
  0x8b   :  { %457 = vmatmul.mubr.f32.gmra.mrb[14].mxu1 %v215_v24  ;;  %4021 = vmatpush1.bf16.msra.mxu0 %v5835_v25 }
  0x8c   :  { %4053 = vmatpush1.bf16.msra.mxu1 %v5839_v27  ;;  %563 = vmatprep.mubr.f32.mxu0 %v5628_v0 }
  0x8d   :  { %634 = vmatprep.mubr.f32.mxu1 %v5628_v0  ;;  %4055 = vmatprep.subr.bf16.mxu0 %v5736_v38 }
  0x8e   :  { %564 = vmatmul.mubr.f32.vlgmr.msra.gmra.mrb[0].mxu0 %v5628_v0  ;;  %4087 = vmatprep.subr.bf16.mxu1 %v5738_v41 }
  0x8f   :  { %635 = vmatmul.mubr.f32.vlgmr.msra.gmra.mrb[0].mxu1 %v5628_v0  ;;  %4057 = vmatpush1.bf16.msra.mxu0 %v5740_v47 }
  0x90   :  { %4089 = vmatpush1.bf16.msra.mxu1 %v5743_v50  ;;  %4059 = vmatprep.subr.bf16.mxu0 %v5746_v53 }
  0x91   :  { %4091 = vmatprep.subr.bf16.mxu1 %v5748_v56  ;;  %738 = vmatprep.mubr.f32.mxu0 %v5628_v0 }
  0x92   :  { %809 = vmatprep.mubr.f32.mxu1 %v5628_v0 }
  0x93   :  { %4061 = vmatpush1.bf16.msra.mxu0 %v5751_v60 }
  0x94   :  { %4093 = vmatpush1.bf16.msra.mxu1 %v5755_v63  ;;  %4063 = vmatprep.subr.bf16.mxu0 %v5759_v3 }
  0x95   :  { %4095 = vmatprep.subr.bf16.mxu1 %v5762_v6 }
  0x97   :  { %4065 = vmatpush1.bf16.msra.mxu0 %v5765_v10 }
  0x98   :  { %4097 = vmatpush1.bf16.msra.mxu1 %v5769_v13  ;;  %4067 = vmatprep.subr.bf16.mxu0 %v5773_v16 }
  0x99   :  { %4099 = vmatprep.subr.bf16.mxu1 %v5776_v19 }
  0x9b   :  { %4069 = vmatpush1.bf16.msra.mxu0 %v5779_v23 }
  0x9c   :  { %4101 = vmatpush1.bf16.msra.mxu1 %v5783_v26  ;;  %4071 = vmatprep.subr.bf16.mxu0 %v5787_v29 }
  0x9d   :  { %4103 = vmatprep.subr.bf16.mxu1 %v5790_v32 }
  0x9f   :  { %4073 = vmatpush1.bf16.msra.mxu0 %v5793_v36 }
  0xa0   :  { %4105 = vmatpush1.bf16.msra.mxu1 %v5797_v40  ;;  %4075 = vmatprep.subr.bf16.mxu0 %v5801_v44 }
  0xa1   :  { %4107 = vmatprep.subr.bf16.mxu1 %v5804_v48 }
  0xa3   :  { %4077 = vmatpush1.bf16.msra.mxu0 %v5807_v54 }
  0xa4   :  { %4109 = vmatpush1.bf16.msra.mxu1 %v5811_v58  ;;  %4079 = vmatprep.subr.bf16.mxu0 %v5815_v62 }
  0xa5   :  { %4111 = vmatprep.subr.bf16.mxu1 %v5818_v4 }
  0xa7   :  { %4081 = vmatpush1.bf16.msra.mxu0 %v5821_v9 }
  0xa8   :  { %4113 = vmatpush1.bf16.msra.mxu1 %v5825_v14  ;;  %4083 = vmatprep.subr.bf16.mxu0 %v5829_v18 }
  0xa9   :  { %4115 = vmatprep.subr.bf16.mxu1 %v5832_v22 }
  0xab   :  { %4085 = vmatpush1.bf16.msra.mxu0 %v5835_v25 }
  0xac   :  { %4117 = vmatpush1.bf16.msra.mxu1 %v5839_v27  ;;  %4119 = vmatprep.subr.bf16.mxu0 %v5736_v38 }
  0xad   :  { %4151 = vmatprep.subr.bf16.mxu1 %v5738_v41 }
 0x161   :  { %v565_v39 = vpop.f32.mrb[0].mxu0 }
 0x162   :  { %v5102_v43 = vadd.f32 %v565_v39, %v5895_v35  ;;  %v636_v45 = vpop.f32.mrb[0].mxu1  ;;  %v567_v46 = vpop.f32.mrb[1].mxu0 }
 0x163   :  { %v5103_v49 = vadd.f32 %v567_v46, %v5899_v37  ;;  %v638_v51 = vpop.f32.mrb[1].mxu1  ;;  %v5118_v5 = vadd.f32 %v636_v45, %v5912_v1 }
 0x164   :  { %v3823_v52 = vmul.f32 -1.442695, %v5102_v43  ;;  %v5119_v61 = vadd.f32 %v638_v51, %v5906_v57 }
 0x165   :  { %v3824_v55 = vmul.f32 -1.442695, %v5103_v49 }
 0x166   :  { %5242 = vpow2.f32 %v3823_v52  ;;  %v3825_v2 = vmul.f32 -1.442695, %v5119_v61 }
 0x167   :  { %5244 = vpow2.f32 %v3824_v55 }
 0x168   :  { %5246 = vpow2.f32 %v3825_v2 }
 0x169   :  { %5248 = vtanh.f32 %v5118_v5 }
 0x170   :  { %v5243_v7 = vpop.eup %5242 }
 0x171   :  { %v5245_v8 = vpop.eup %5244  ;;  %v654_v11 = vadd.f32 1.0, %v5243_v7 }
 0x172   :  { %v655_v12 = vadd.f32 1.0, %v5245_v8  ;;  %v5247_v15 = vpop.eup %5246 }
 0x173   :  { %5250 = vrcp.f32 %v654_v11  ;;  %v5249_v17 = vpop.eup %5248  ;;  %v656_v28 = vadd.f32 1.0, %v5247_v15 }
 0x174   :  { %5252 = vrcp.f32 %v655_v12 }
 0x175   :  { %5254 = vrcp.f32 %v656_v28 }
 0x17d   :  { %v5251_v20 = vpop.eup %5250 }
 0x17e   :  { %v5253_v21 = vpop.eup %5252  ;;  %v665_v24 = vmul.f32 %v5251_v20, %v5249_v17 }
 0x17f   :  { %v664_v39 = vmul.f32 0.0, %v5253_v21  ;;  %v5255_v43 = vpop.eup %5254 }
 0x181   :  { %v5915_v33 = vadd.f32 %v665_v24, %v664_v39 }
 0x183   :  { %5256 = vtanh.f32 %v5915_v33 }
 0x18d   :  { %v5257_v45 = vpop.eup %5256 }
 0x18e   :  { %v5918_v46 = vmul.f32 %v5257_v45, %v5255_v43 }
 0x190   :  { %739 = vmatmul.mubr.f32.vlgmr.msra.gmra.mrb[2].mxu0 %v5918_v46  ;;  %810 = vmatmul.mubr.f32.vlgmr.msra.gmra.mrb[2].mxu1 %v5918_v46 }
 0x191   :  { %4121 = vmatpush1.bf16.msra.mxu0 %v5740_v47  ;;  %4153 = vmatpush1.bf16.msra.mxu1 %v5743_v50 }
 0x192   :  { %4123 = vmatprep.subr.bf16.mxu0 %v5746_v53  ;;  %4155 = vmatprep.subr.bf16.mxu1 %v5748_v56 }
 0x193   :  { %913 = vmatprep.mubr.f32.mxu0 %v5628_v0  ;;  %984 = vmatprep.mubr.f32.mxu1 %v5628_v0 }
 0x195   :  { %4125 = vmatpush1.bf16.msra.mxu0 %v5751_v60  ;;  %4157 = vmatpush1.bf16.msra.mxu1 %v5755_v63 }
 0x196   :  { %4127 = vmatprep.subr.bf16.mxu0 %v5759_v3  ;;  %4159 = vmatprep.subr.bf16.mxu1 %v5762_v6 }
 0x199   :  { %4129 = vmatpush1.bf16.msra.mxu0 %v5765_v10  ;;  %4161 = vmatpush1.bf16.msra.mxu1 %v5769_v13 }
 0x19a   :  { %4131 = vmatprep.subr.bf16.mxu0 %v5773_v16  ;;  %4163 = vmatprep.subr.bf16.mxu1 %v5776_v19 }
 0x19d   :  { %4133 = vmatpush1.bf16.msra.mxu0 %v5779_v23  ;;  %4165 = vmatpush1.bf16.msra.mxu1 %v5783_v26 }
 0x19e   :  { %4135 = vmatprep.subr.bf16.mxu0 %v5787_v29  ;;  %4167 = vmatprep.subr.bf16.mxu1 %v5790_v32 }
 0x1a1   :  { %4137 = vmatpush1.bf16.msra.mxu0 %v5793_v36  ;;  %4169 = vmatpush1.bf16.msra.mxu1 %v5797_v40 }
 0x1a2   :  { %4139 = vmatprep.subr.bf16.mxu0 %v5801_v44  ;;  %4171 = vmatprep.subr.bf16.mxu1 %v5804_v48 }
 0x1a5   :  { %4141 = vmatpush1.bf16.msra.mxu0 %v5807_v54  ;;  %4173 = vmatpush1.bf16.msra.mxu1 %v5811_v58 }
 0x1a6   :  { %4143 = vmatprep.subr.bf16.mxu0 %v5815_v62  ;;  %4175 = vmatprep.subr.bf16.mxu1 %v5818_v4 }
 0x1a9   :  { %4145 = vmatpush1.bf16.msra.mxu0 %v5821_v9  ;;  %4177 = vmatpush1.bf16.msra.mxu1 %v5825_v14 }
 0x1aa   :  { %4147 = vmatprep.subr.bf16.mxu0 %v5829_v18  ;;  %4179 = vmatprep.subr.bf16.mxu1 %v5832_v22 }
 0x1ad   :  { %4149 = vmatpush1.bf16.msra.mxu0 %v5835_v25  ;;  %4181 = vmatpush1.bf16.msra.mxu1 %v5839_v27 }
 0x1ae   :  { %4183 = vmatprep.subr.bf16.mxu0 %v5736_v38  ;;  %4215 = vmatprep.subr.bf16.mxu1 %v5738_v41 }
 0x263   :  { %v740_v49 = vpop.f32.mrb[2].mxu0  ;;  %v811_v51 = vpop.f32.mrb[2].mxu1 }
 0x264   :  { %v5104_v52 = vadd.f32 %v740_v49, %v5895_v35  ;;  %v742_v55 = vpop.f32.mrb[3].mxu0  ;;  %v813_v61 = vpop.f32.mrb[3].mxu1  ;;  %v5120_v12 = vadd.f32 %v811_v51, %v5912_v1 }
 0x265   :  { %v5105_v2 = vadd.f32 %v742_v55, %v5899_v37  ;;  %v5121_v8 = vadd.f32 %v813_v61, %v5906_v57 }
 0x266   :  { %v3826_v5 = vmul.f32 -1.442695, %v5104_v52 }
 0x267   :  { %v3827_v7 = vmul.f32 -1.442695, %v5105_v2  ;;  %v3828_v11 = vmul.f32 -1.442695, %v5121_v8 }
 0x268   :  { %5258 = vpow2.f32 %v3826_v5 }
 0x269   :  { %5260 = vpow2.f32 %v3827_v7 }
 0x26a   :  { %5262 = vpow2.f32 %v3828_v11 }
 0x26b   :  { %5264 = vtanh.f32 %v5120_v12 }
 0x272   :  { %v5259_v15 = vpop.eup %5258 }
 0x273   :  { %v5261_v17 = vpop.eup %5260  ;;  %v829_v20 = vadd.f32 1.0, %v5259_v15 }
 0x274   :  { %v830_v21 = vadd.f32 1.0, %v5261_v17  ;;  %v5263_v24 = vpop.eup %5262 }
 0x275   :  { %5266 = vrcp.f32 %v829_v20  ;;  %v5265_v28 = vpop.eup %5264  ;;  %v831_v49 = vadd.f32 1.0, %v5263_v24 }
 0x276   :  { %5268 = vrcp.f32 %v830_v21 }
 0x277   :  { %5270 = vrcp.f32 %v831_v49 }
 0x27f   :  { %v5267_v39 = vpop.eup %5266 }
 0x280   :  { %v5269_v43 = vpop.eup %5268  ;;  %v840_v45 = vmul.f32 %v5267_v39, %v5265_v28 }
 0x281   :  { %v839_v52 = vmul.f32 %v5269_v43, %v5915_v33  ;;  %v5271_v51 = vpop.eup %5270 }
 0x283   :  { %v5961_v55 = vadd.f32 %v840_v45, %v839_v52 }
 0x285   :  { %5272 = vtanh.f32 %v5961_v55 }
 0x28f   :  { %v5273_v61 = vpop.eup %5272 }
 0x290   :  { %v5964_v2 = vmul.f32 %v5273_v61, %v5271_v51 }
 0x292   :  { %914 = vmatmul.mubr.f32.vlgmr.msra.gmra.mrb[4].mxu0 %v5964_v2  ;;  %985 = vmatmul.mubr.f32.vlgmr.msra.gmra.mrb[4].mxu1 %v5964_v2 }
 0x293   :  { %4185 = vmatpush1.bf16.msra.mxu0 %v5740_v47  ;;  %4217 = vmatpush1.bf16.msra.mxu1 %v5743_v50 }
 0x294   :  { %4187 = vmatprep.subr.bf16.mxu0 %v5746_v53  ;;  %4219 = vmatprep.subr.bf16.mxu1 %v5748_v56 }
 0x295   :  { %1088 = vmatprep.mubr.f32.mxu0 %v5628_v0  ;;  %1159 = vmatprep.mubr.f32.mxu1 %v5628_v0 }
 0x297   :  { %4189 = vmatpush1.bf16.msra.mxu0 %v5751_v60  ;;  %4221 = vmatpush1.bf16.msra.mxu1 %v5755_v63 }
 0x298   :  { %4191 = vmatprep.subr.bf16.mxu0 %v5759_v3  ;;  %4223 = vmatprep.subr.bf16.mxu1 %v5762_v6 }
 0x29b   :  { %4193 = vmatpush1.bf16.msra.mxu0 %v5765_v10  ;;  %4225 = vmatpush1.bf16.msra.mxu1 %v5769_v13 }
 0x29c   :  { %4195 = vmatprep.subr.bf16.mxu0 %v5773_v16  ;;  %4227 = vmatprep.subr.bf16.mxu1 %v5776_v19 }
 0x29f   :  { %4197 = vmatpush1.bf16.msra.mxu0 %v5779_v23  ;;  %4229 = vmatpush1.bf16.msra.mxu1 %v5783_v26 }
 0x2a0   :  { %4199 = vmatprep.subr.bf16.mxu0 %v5787_v29  ;;  %4231 = vmatprep.subr.bf16.mxu1 %v5790_v32 }
 0x2a3   :  { %4201 = vmatpush1.bf16.msra.mxu0 %v5793_v36  ;;  %4233 = vmatpush1.bf16.msra.mxu1 %v5797_v40 }
 0x2a4   :  { %4203 = vmatprep.subr.bf16.mxu0 %v5801_v44  ;;  %4235 = vmatprep.subr.bf16.mxu1 %v5804_v48 }
 0x2a7   :  { %4205 = vmatpush1.bf16.msra.mxu0 %v5807_v54  ;;  %4237 = vmatpush1.bf16.msra.mxu1 %v5811_v58 }
 0x2a8   :  { %4207 = vmatprep.subr.bf16.mxu0 %v5815_v62  ;;  %4239 = vmatprep.subr.bf16.mxu1 %v5818_v4 }
 0x2ab   :  { %4209 = vmatpush1.bf16.msra.mxu0 %v5821_v9  ;;  %4241 = vmatpush1.bf16.msra.mxu1 %v5825_v14 }
 0x2ac   :  { %4211 = vmatprep.subr.bf16.mxu0 %v5829_v18  ;;  %4243 = vmatprep.subr.bf16.mxu1 %v5832_v22 }
 0x2af   :  { %4213 = vmatpush1.bf16.msra.mxu0 %v5835_v25  ;;  %4245 = vmatpush1.bf16.msra.mxu1 %v5839_v27 }
 0x2b0   :  { %4247 = vmatprep.subr.bf16.mxu0 %v5736_v38  ;;  %4279 = vmatprep.subr.bf16.mxu1 %v5738_v41 }
 0x365   :  { %v915_v33 = vpop.f32.mrb[4].mxu0  ;;  %v986_v5 = vpop.f32.mrb[4].mxu1 }
 0x366   :  { %v5106_v7 = vadd.f32 %v915_v33, %v5895_v35  ;;  %v917_v8 = vpop.f32.mrb[5].mxu0  ;;  %v988_v11 = vpop.f32.mrb[5].mxu1  ;;  %v5122_v24 = vadd.f32 %v986_v5, %v5912_v1 }
 0x367   :  { %v5107_v12 = vadd.f32 %v917_v8, %v5899_v37  ;;  %v5123_v20 = vadd.f32 %v988_v11, %v5906_v57 }
 0x368   :  { %v3829_v15 = vmul.f32 -1.442695, %v5106_v7 }
 0x369   :  { %v3830_v17 = vmul.f32 -1.442695, %v5107_v12  ;;  %v3831_v21 = vmul.f32 -1.442695, %v5123_v20 }
 0x36a   :  { %5274 = vpow2.f32 %v3829_v15 }
 0x36b   :  { %5276 = vpow2.f32 %v3830_v17 }
 0x36c   :  { %5278 = vpow2.f32 %v3831_v21 }
 0x36d   :  { %5280 = vtanh.f32 %v5122_v24 }
 0x374   :  { %v5275_v28 = vpop.eup %5274 }
 0x375   :  { %v5277_v39 = vpop.eup %5276  ;;  %v1004_v43 = vadd.f32 1.0, %v5275_v28 }
 0x376   :  { %v1005_v45 = vadd.f32 1.0, %v5277_v39  ;;  %v5279_v49 = vpop.eup %5278 }
 0x377   :  { %5282 = vrcp.f32 %v1004_v43  ;;  %v5281_v52 = vpop.eup %5280  ;;  %v1006_v7 = vadd.f32 1.0, %v5279_v49 }
 0x378   :  { %5284 = vrcp.f32 %v1005_v45 }
 0x379   :  { %5286 = vrcp.f32 %v1006_v7 }
 0x381   :  { %v5283_v51 = vpop.eup %5282 }
 0x382   :  { %v5285_v61 = vpop.eup %5284  ;;  %v1015_v33 = vmul.f32 %v5283_v51, %v5281_v52 }
 0x383   :  { %v1014_v8 = vmul.f32 %v5285_v61, %v5961_v55  ;;  %v5287_v5 = vpop.eup %5286 }
 0x385   :  { %v6007_v11 = vadd.f32 %v1015_v33, %v1014_v8 }
 0x387   :  { %5288 = vtanh.f32 %v6007_v11 }
 0x391   :  { %v5289_v12 = vpop.eup %5288 }
 0x392   :  { %v6010_v15 = vmul.f32 %v5289_v12, %v5287_v5 }
 0x394   :  { %1089 = vmatmul.mubr.f32.vlgmr.msra.gmra.mrb[6].mxu0 %v6010_v15  ;;  %1160 = vmatmul.mubr.f32.vlgmr.msra.gmra.mrb[6].mxu1 %v6010_v15 }
 0x395   :  { %4249 = vmatpush1.bf16.msra.mxu0 %v5740_v47  ;;  %4281 = vmatpush1.bf16.msra.mxu1 %v5743_v50 }
 0x396   :  { %4251 = vmatprep.subr.bf16.mxu0 %v5746_v53  ;;  %4283 = vmatprep.subr.bf16.mxu1 %v5748_v56 }
 0x397   :  { %1263 = vmatprep.mubr.f32.mxu0 %v5628_v0  ;;  %1334 = vmatprep.mubr.f32.mxu1 %v5628_v0 }
 0x399   :  { %4253 = vmatpush1.bf16.msra.mxu0 %v5751_v60  ;;  %4285 = vmatpush1.bf16.msra.mxu1 %v5755_v63 }
 0x39a   :  { %4255 = vmatprep.subr.bf16.mxu0 %v5759_v3  ;;  %4287 = vmatprep.subr.bf16.mxu1 %v5762_v6 }
 0x39d   :  { %4257 = vmatpush1.bf16.msra.mxu0 %v5765_v10  ;;  %4289 = vmatpush1.bf16.msra.mxu1 %v5769_v13 }
 0x39e   :  { %4259 = vmatprep.subr.bf16.mxu0 %v5773_v16  ;;  %4291 = vmatprep.subr.bf16.mxu1 %v5776_v19 }
 0x3a1   :  { %4261 = vmatpush1.bf16.msra.mxu0 %v5779_v23  ;;  %4293 = vmatpush1.bf16.msra.mxu1 %v5783_v26 }
 0x3a2   :  { %4263 = vmatprep.subr.bf16.mxu0 %v5787_v29  ;;  %4295 = vmatprep.subr.bf16.mxu1 %v5790_v32 }
 0x3a5   :  { %4265 = vmatpush1.bf16.msra.mxu0 %v5793_v36  ;;  %4297 = vmatpush1.bf16.msra.mxu1 %v5797_v40 }
 0x3a6   :  { %4267 = vmatprep.subr.bf16.mxu0 %v5801_v44  ;;  %4299 = vmatprep.subr.bf16.mxu1 %v5804_v48 }
 0x3a9   :  { %4269 = vmatpush1.bf16.msra.mxu0 %v5807_v54  ;;  %4301 = vmatpush1.bf16.msra.mxu1 %v5811_v58 }
 0x3aa   :  { %4271 = vmatprep.subr.bf16.mxu0 %v5815_v62  ;;  %4303 = vmatprep.subr.bf16.mxu1 %v5818_v4 }
 0x3ad   :  { %4273 = vmatpush1.bf16.msra.mxu0 %v5821_v9  ;;  %4305 = vmatpush1.bf16.msra.mxu1 %v5825_v14 }
 0x3ae   :  { %4275 = vmatprep.subr.bf16.mxu0 %v5829_v18  ;;  %4307 = vmatprep.subr.bf16.mxu1 %v5832_v22 }
 0x3b1   :  { %4277 = vmatpush1.bf16.msra.mxu0 %v5835_v25  ;;  %4309 = vmatpush1.bf16.msra.mxu1 %v5839_v27 }
 0x3b2   :  { %4311 = vmatprep.subr.bf16.mxu0 %v5736_v38  ;;  %4343 = vmatprep.subr.bf16.mxu1 %v5738_v41 }
 0x467   :  { %v1090_v55 = vpop.f32.mrb[6].mxu0  ;;  %v1161_v17 = vpop.f32.mrb[6].mxu1 }
 0x468   :  { %v5108_v20 = vadd.f32 %v1090_v55, %v5895_v35  ;;  %v1092_v21 = vpop.f32.mrb[7].mxu0  ;;  %v1163_v24 = vpop.f32.mrb[7].mxu1  ;;  %v5124_v52 = vadd.f32 %v1161_v17, %v5912_v1 }
 0x469   :  { %v5109_v28 = vadd.f32 %v1092_v21, %v5899_v37  ;;  %v5125_v45 = vadd.f32 %v1163_v24, %v5906_v57 }
 0x46a   :  { %v3832_v39 = vmul.f32 -1.442695, %v5108_v20 }
 0x46b   :  { %v3833_v43 = vmul.f32 -1.442695, %v5109_v28  ;;  %v3834_v49 = vmul.f32 -1.442695, %v5125_v45 }
 0x46c   :  { %5290 = vpow2.f32 %v3832_v39 }
 0x46d   :  { %5292 = vpow2.f32 %v3833_v43 }
 0x46e   :  { %5294 = vpow2.f32 %v3834_v49 }
 0x46f   :  { %5296 = vtanh.f32 %v5124_v52 }
 0x476   :  { %v5291_v51 = vpop.eup %5290 }
 0x477   :  { %v5293_v61 = vpop.eup %5292  ;;  %v1179_v33 = vadd.f32 1.0, %v5291_v51 }
 0x478   :  { %v1180_v7 = vadd.f32 1.0, %v5293_v61  ;;  %v5295_v8 = vpop.eup %5294 }
 0x479   :  { %5298 = vrcp.f32 %v1179_v33  ;;  %v5297_v5 = vpop.eup %5296  ;;  %v1181_v21 = vadd.f32 1.0, %v5295_v8 }
 0x47a   :  { %5300 = vrcp.f32 %v1180_v7 }
 0x47b   :  { %5302 = vrcp.f32 %v1181_v21 }
 0x483   :  { %v5299_v12 = vpop.eup %5298 }
 0x484   :  { %v5301_v55 = vpop.eup %5300  ;;  %v1190_v20 = vmul.f32 %v5299_v12, %v5297_v5 }
 0x485   :  { %v1189_v28 = vmul.f32 %v5301_v55, %v6007_v11  ;;  %v5303_v17 = vpop.eup %5302 }
 0x487   :  { %v6053_v24 = vadd.f32 %v1190_v20, %v1189_v28 }
 0x489   :  { %5304 = vtanh.f32 %v6053_v24 }
 0x493   :  { %v5305_v39 = vpop.eup %5304 }
 0x494   :  { %v6056_v43 = vmul.f32 %v5305_v39, %v5303_v17 }
 0x496   :  { %1264 = vmatmul.mubr.f32.vlgmr.msra.gmra.mrb[8].mxu0 %v6056_v43  ;;  %1335 = vmatmul.mubr.f32.vlgmr.msra.gmra.mrb[8].mxu1 %v6056_v43 }
 0x497   :  { %4313 = vmatpush1.bf16.msra.mxu0 %v5740_v47  ;;  %4345 = vmatpush1.bf16.msra.mxu1 %v5743_v50 }
 0x498   :  { %4315 = vmatprep.subr.bf16.mxu0 %v5746_v53  ;;  %4347 = vmatprep.subr.bf16.mxu1 %v5748_v56 }
 0x499   :  { %1438 = vmatprep.mubr.f32.mxu0 %v5628_v0  ;;  %1509 = vmatprep.mubr.f32.mxu1 %v5628_v0 }
 0x49b   :  { %4317 = vmatpush1.bf16.msra.mxu0 %v5751_v60  ;;  %4349 = vmatpush1.bf16.msra.mxu1 %v5755_v63 }
 0x49c   :  { %4319 = vmatprep.subr.bf16.mxu0 %v5759_v3  ;;  %4351 = vmatprep.subr.bf16.mxu1 %v5762_v6 }
 0x49f   :  { %4321 = vmatpush1.bf16.msra.mxu0 %v5765_v10  ;;  %4353 = vmatpush1.bf16.msra.mxu1 %v5769_v13 }
 0x4a0   :  { %4323 = vmatprep.subr.bf16.mxu0 %v5773_v16  ;;  %4355 = vmatprep.subr.bf16.mxu1 %v5776_v19 }
 0x4a3   :  { %4325 = vmatpush1.bf16.msra.mxu0 %v5779_v23  ;;  %4357 = vmatpush1.bf16.msra.mxu1 %v5783_v26 }
 0x4a4   :  { %4327 = vmatprep.subr.bf16.mxu0 %v5787_v29  ;;  %4359 = vmatprep.subr.bf16.mxu1 %v5790_v32 }
 0x4a7   :  { %4329 = vmatpush1.bf16.msra.mxu0 %v5793_v36  ;;  %4361 = vmatpush1.bf16.msra.mxu1 %v5797_v40 }
 0x4a8   :  { %4331 = vmatprep.subr.bf16.mxu0 %v5801_v44  ;;  %4363 = vmatprep.subr.bf16.mxu1 %v5804_v48 }
 0x4ab   :  { %4333 = vmatpush1.bf16.msra.mxu0 %v5807_v54  ;;  %4365 = vmatpush1.bf16.msra.mxu1 %v5811_v58 }
 0x4ac   :  { %4335 = vmatprep.subr.bf16.mxu0 %v5815_v62  ;;  %4367 = vmatprep.subr.bf16.mxu1 %v5818_v4 }
 0x4af   :  { %4337 = vmatpush1.bf16.msra.mxu0 %v5821_v9  ;;  %4369 = vmatpush1.bf16.msra.mxu1 %v5825_v14 }
 0x4b0   :  { %4339 = vmatprep.subr.bf16.mxu0 %v5829_v18  ;;  %4371 = vmatprep.subr.bf16.mxu1 %v5832_v22 }
 0x4b3   :  { %4341 = vmatpush1.bf16.msra.mxu0 %v5835_v25  ;;  %4373 = vmatpush1.bf16.msra.mxu1 %v5839_v27 }
 0x4b4   :  { %4375 = vmatprep.subr.bf16.mxu0 %v5736_v38  ;;  %4407 = vmatprep.subr.bf16.mxu1 %v5738_v41 }
 0x569   :  { %v1265_v11 = vpop.f32.mrb[8].mxu0  ;;  %v1336_v45 = vpop.f32.mrb[8].mxu1 }
 0x56a   :  { %v5110_v49 = vadd.f32 %v1265_v11, %v5895_v35  ;;  %v1267_v52 = vpop.f32.mrb[9].mxu0  ;;  %v1338_v51 = vpop.f32.mrb[9].mxu1  ;;  %v5126_v12 = vadd.f32 %v1336_v45, %v5912_v1 }
 0x56b   :  { %v5111_v61 = vadd.f32 %v1267_v52, %v5899_v37  ;;  %v5127_v8 = vadd.f32 %v1338_v51, %v5906_v57 }
 0x56c   :  { %v3835_v33 = vmul.f32 -1.442695, %v5110_v49 }
 0x56d   :  { %v3836_v7 = vmul.f32 -1.442695, %v5111_v61  ;;  %v3837_v5 = vmul.f32 -1.442695, %v5127_v8 }
 0x56e   :  { %5306 = vpow2.f32 %v3835_v33 }
 0x56f   :  { %5308 = vpow2.f32 %v3836_v7 }
 0x570   :  { %5310 = vpow2.f32 %v3837_v5 }
 0x571   :  { %5312 = vtanh.f32 %v5126_v12 }
 0x578   :  { %v5307_v55 = vpop.eup %5306 }
 0x579   :  { %v5309_v20 = vpop.eup %5308  ;;  %v1354_v21 = vadd.f32 1.0, %v5307_v55 }
 0x57a   :  { %v1355_v28 = vadd.f32 1.0, %v5309_v20  ;;  %v5311_v17 = vpop.eup %5310 }
 0x57b   :  { %5314 = vrcp.f32 %v1354_v21  ;;  %v5313_v39 = vpop.eup %5312  ;;  %v1356_v61 = vadd.f32 1.0, %v5311_v17 }
 0x57c   :  { %5316 = vrcp.f32 %v1355_v28 }
 0x57d   :  { %5318 = vrcp.f32 %v1356_v61 }
 0x585   :  { %v5315_v11 = vpop.eup %5314 }
 0x586   :  { %v5317_v49 = vpop.eup %5316  ;;  %v1365_v52 = vmul.f32 %v5315_v11, %v5313_v39 }
 0x587   :  { %v1364_v33 = vmul.f32 %v5317_v49, %v6053_v24  ;;  %v5319_v45 = vpop.eup %5318 }
 0x589   :  { %v6099_v51 = vadd.f32 %v1365_v52, %v1364_v33 }
 0x58b   :  { %5320 = vtanh.f32 %v6099_v51 }
 0x595   :  { %v5321_v7 = vpop.eup %5320 }
 0x596   :  { %v6102_v8 = vmul.f32 %v5321_v7, %v5319_v45 }
 0x598   :  { %1439 = vmatmul.mubr.f32.vlgmr.msra.gmra.mrb[10].mxu0 %v6102_v8  ;;  %1510 = vmatmul.mubr.f32.vlgmr.msra.gmra.mrb[10].mxu1 %v6102_v8 }
 0x599   :  { %4377 = vmatpush1.bf16.msra.mxu0 %v5740_v47  ;;  %4409 = vmatpush1.bf16.msra.mxu1 %v5743_v50 }
 0x59a   :  { %4379 = vmatprep.subr.bf16.mxu0 %v5746_v53  ;;  %4411 = vmatprep.subr.bf16.mxu1 %v5748_v56 }
 0x59b   :  { %1613 = vmatprep.mubr.f32.mxu0 %v5628_v0  ;;  %1684 = vmatprep.mubr.f32.mxu1 %v5628_v0 }
 0x59d   :  { %4381 = vmatpush1.bf16.msra.mxu0 %v5751_v60  ;;  %4413 = vmatpush1.bf16.msra.mxu1 %v5755_v63 }
 0x59e   :  { %4383 = vmatprep.subr.bf16.mxu0 %v5759_v3  ;;  %4415 = vmatprep.subr.bf16.mxu1 %v5762_v6 }
 0x5a1   :  { %4385 = vmatpush1.bf16.msra.mxu0 %v5765_v10  ;;  %4417 = vmatpush1.bf16.msra.mxu1 %v5769_v13 }
 0x5a2   :  { %4387 = vmatprep.subr.bf16.mxu0 %v5773_v16  ;;  %4419 = vmatprep.subr.bf16.mxu1 %v5776_v19 }
 0x5a5   :  { %4389 = vmatpush1.bf16.msra.mxu0 %v5779_v23  ;;  %4421 = vmatpush1.bf16.msra.mxu1 %v5783_v26 }
 0x5a6   :  { %4391 = vmatprep.subr.bf16.mxu0 %v5787_v29  ;;  %4423 = vmatprep.subr.bf16.mxu1 %v5790_v32 }
 0x5a9   :  { %4393 = vmatpush1.bf16.msra.mxu0 %v5793_v36  ;;  %4425 = vmatpush1.bf16.msra.mxu1 %v5797_v40 }
 0x5aa   :  { %4395 = vmatprep.subr.bf16.mxu0 %v5801_v44  ;;  %4427 = vmatprep.subr.bf16.mxu1 %v5804_v48 }
 0x5ad   :  { %4397 = vmatpush1.bf16.msra.mxu0 %v5807_v54  ;;  %4429 = vmatpush1.bf16.msra.mxu1 %v5811_v58 }
 0x5ae   :  { %4399 = vmatprep.subr.bf16.mxu0 %v5815_v62  ;;  %4431 = vmatprep.subr.bf16.mxu1 %v5818_v4 }
 0x5b1   :  { %4401 = vmatpush1.bf16.msra.mxu0 %v5821_v9  ;;  %4433 = vmatpush1.bf16.msra.mxu1 %v5825_v14 }
 0x5b2   :  { %4403 = vmatprep.subr.bf16.mxu0 %v5829_v18  ;;  %4435 = vmatprep.subr.bf16.mxu1 %v5832_v22 }
 0x5b5   :  { %4405 = vmatpush1.bf16.msra.mxu0 %v5835_v25  ;;  %4437 = vmatpush1.bf16.msra.mxu1 %v5839_v27 }
 0x5b6   :  { %4439 = vmatprep.subr.bf16.mxu0 %v5736_v38  ;;  %4471 = vmatprep.subr.bf16.mxu1 %v5738_v41 }
 0x66b   :  { %v1440_v24 = vpop.f32.mrb[10].mxu0  ;;  %v1511_v5 = vpop.f32.mrb[10].mxu1 }
 0x66c   :  { %v5112_v12 = vadd.f32 %v1440_v24, %v5895_v35  ;;  %v1442_v55 = vpop.f32.mrb[11].mxu0  ;;  %v1513_v20 = vpop.f32.mrb[11].mxu1  ;;  %v5128_v49 = vadd.f32 %v1511_v5, %v5912_v1 }
 0x66d   :  { %v5113_v21 = vadd.f32 %v1442_v55, %v5899_v37  ;;  %v5129_v39 = vadd.f32 %v1513_v20, %v5906_v57 }
 0x66e   :  { %v3838_v28 = vmul.f32 -1.442695, %v5112_v12 }
 0x66f   :  { %v3839_v17 = vmul.f32 -1.442695, %v5113_v21  ;;  %v3840_v11 = vmul.f32 -1.442695, %v5129_v39  ;;  %v1898_v39 = vld [vmem:[#allocation8 + $0x210] sm:$0xff] }
 0x670   :  { %5322 = vpow2.f32 %v3838_v28 }
 0x671   :  { %5324 = vpow2.f32 %v3839_v17 }
 0x672   :  { %5326 = vpow2.f32 %v3840_v11  ;;  %v1902_v11 = vld [vmem:[#allocation8 + $0x230] sm:$0xff] }
 0x673   :  { %5328 = vtanh.f32 %v5128_v49  ;;  %v1905_v49 = vld [vmem:[#allocation8 + $0x248] sm:$0xff] }
 0x67a   :  { %v5323_v38 = vpop.eup %5322 }
 0x67b   :  { %v5325_v52 = vpop.eup %5324  ;;  %v1529_v41 = vadd.f32 1.0, %v5323_v38  ;;  %v1909_v38 = vld [vmem:[#allocation8 + $0x268] sm:$0xff] }
 0x67c   :  { %v1530_v61 = vadd.f32 1.0, %v5325_v52  ;;  %v5327_v33 = vpop.eup %5326  ;;  %v1907_v52 = vld [vmem:[#allocation8 + $0x258] sm:$0xff] }
 0x67d   :  { %5330 = vrcp.f32 %v1529_v41  ;;  %v5329_v45 = vpop.eup %5328  ;;  %v1531_v55 = vadd.f32 1.0, %v5327_v33  ;;  %v1911_v41 = vld [vmem:[#allocation8 + $0x278] sm:$0xff] }
 0x67e   :  { %5332 = vrcp.f32 %v1530_v61 }
 0x67f   :  { %5334 = vrcp.f32 %v1531_v55 }
 0x687   :  { %v5331_v7 = vpop.eup %5330 }
 0x688   :  { %v5333_v24 = vpop.eup %5332  ;;  %v1540_v12 = vmul.f32 %v5331_v7, %v5329_v45  ;;  %v4536_v7 = vpack.c.bf16 %v1902_v11, %v1898_v39  ;;  %v1928_v39 = vld [vmem:[#allocation8 + $0x300] sm:$0xff] }
 0x689   :  { %v1539_v21 = vmul.f32 %v5333_v24, %v6099_v51  ;;  %v5335_v5 = vpop.eup %5334  ;;  %v1900_v51 = vld [vmem:[#allocation8 + $0x220] sm:$0xff] }
 0x68a   :  { %v1904_v24 = vld [vmem:[#allocation8 + $0x240] sm:$0xff] }
 0x68b   :  { %v6145_v20 = vadd.f32 %v1540_v12, %v1539_v21  ;;  %v1908_v12 = vld [vmem:[#allocation8 + $0x260] sm:$0xff]  ;;  %v4506_v21 = vpack.c.bf16 %v1909_v38, %v1905_v49 }
 0x68c   :  { %v1932_v11 = vld [vmem:[#allocation8 + $0x320] sm:$0xff] }
 0x68d   :  { %5336 = vtanh.f32 %v6145_v20 }
 0x697   :  { %v5337_v28 = vpop.eup %5336 }
 0x698   :  { %v6148_v17 = vmul.f32 %v5337_v28, %v5335_v5  ;;  %v1906_v5 = vld [vmem:[#allocation8 + $0x250] sm:$0xff] }
 0x699   :  { %v1910_v28 = vld [vmem:[#allocation8 + $0x270] sm:$0xff] }
 0x69a   :  { %1614 = vmatmul.mubr.f32.vlgmr.msra.gmra.mrb[12].mxu0 %v6148_v17  ;;  %1685 = vmatmul.mubr.f32.vlgmr.msra.gmra.mrb[12].mxu1 %v6148_v17 }
 0x69b   :  { %4441 = vmatpush1.bf16.msra.mxu0 %v5740_v47  ;;  %4473 = vmatpush1.bf16.msra.mxu1 %v5743_v50  ;;  %v1897_v47 = vld [vmem:[#allocation8 + $0x208] sm:$0xff] }
 0x69c   :  { %4443 = vmatprep.subr.bf16.mxu0 %v5746_v53  ;;  %4475 = vmatprep.subr.bf16.mxu1 %v5748_v56  ;;  %v1901_v50 = vld [vmem:[#allocation8 + $0x228] sm:$0xff]  ;;  %v1899_v53 = vld [vmem:[#allocation8 + $0x218] sm:$0xff] }
 0x69d   :  { %1788 = vmatprep.mubr.f32.mxu0 %v5628_v0  ;;  %1859 = vmatprep.mubr.f32.mxu1 %v5628_v0  ;;  %v4502_v56 = vpack.c.bf16 %v1901_v50, %v1897_v47  ;;  %v1913_v47 = vld [vmem:[#allocation8 + $0x288] sm:$0xff] }
 0x69e   :  { %v1917_v50 = vld [vmem:[#allocation8 + $0x2a8] sm:$0xff] }
 0x69f   :  { %4445 = vmatpush1.bf16.msra.mxu0 %v5751_v60  ;;  %4477 = vmatpush1.bf16.msra.mxu1 %v5755_v63  ;;  %v1903_v60 = vld [vmem:[#allocation8 + $0x238] sm:$0xff] }
 0x6a0   :  { %4447 = vmatprep.subr.bf16.mxu0 %v5759_v3  ;;  %4479 = vmatprep.subr.bf16.mxu1 %v5762_v6  ;;  %v4534_v63 = vpack.c.bf16 %v1903_v60, %v1899_v53  ;;  %v1915_v53 = vld [vmem:[#allocation8 + $0x298] sm:$0xff]  ;;  %v4508_v60 = vpack.c.bf16 %v1908_v12, %v1904_v24  ;;  %v4520_v24 = vpack.c.bf16 %v1932_v11, %v1928_v39  ;;  %v1963_v11 = vld [vmem:[#allocation10 + $0x210] sm:$0xff] }
 0x6a3   :  { %4449 = vmatpush1.bf16.msra.mxu0 %v5765_v10  ;;  %4481 = vmatpush1.bf16.msra.mxu1 %v5769_v13 }
 0x6a4   :  { %4451 = vmatprep.subr.bf16.mxu0 %v5773_v16  ;;  %4483 = vmatprep.subr.bf16.mxu1 %v5776_v19 }
 0x6a7   :  { %4453 = vmatpush1.bf16.msra.mxu0 %v5779_v23  ;;  %4485 = vmatpush1.bf16.msra.mxu1 %v5783_v26 }
 0x6a8   :  { %4455 = vmatprep.subr.bf16.mxu0 %v5787_v29  ;;  %4487 = vmatprep.subr.bf16.mxu1 %v5790_v32 }
 0x6ab   :  { %4457 = vmatpush1.bf16.msra.mxu0 %v5793_v36  ;;  %4489 = vmatpush1.bf16.msra.mxu1 %v5797_v40 }
 0x6ac   :  { %4459 = vmatprep.subr.bf16.mxu0 %v5801_v44  ;;  %4491 = vmatprep.subr.bf16.mxu1 %v5804_v48 }
 0x6af   :  { %4461 = vmatpush1.bf16.msra.mxu0 %v5807_v54  ;;  %4493 = vmatpush1.bf16.msra.mxu1 %v5811_v58 }
 0x6b0   :  { %4463 = vmatprep.subr.bf16.mxu0 %v5815_v62  ;;  %4495 = vmatprep.subr.bf16.mxu1 %v5818_v4 }
 0x6b3   :  { %4465 = vmatpush1.bf16.msra.mxu0 %v5821_v9  ;;  %4497 = vmatpush1.bf16.msra.mxu1 %v5825_v14 }
 0x6b4   :  { %4467 = vmatprep.subr.bf16.mxu0 %v5829_v18  ;;  %4499 = vmatprep.subr.bf16.mxu1 %v5832_v22 }
 0x6b7   :  { %4469 = vmatpush1.bf16.msra.mxu0 %v5835_v25  ;;  %4501 = vmatpush1.bf16.msra.mxu1 %v5839_v27  ;;  %v1896_v27 = vld [vmem:[#allocation8 + $0x200] sm:$0xff] }
 0x6b8   :  { %4503 = vmatprep.subr.bf16.mxu0 %v4502_v56  ;;  %4535 = vmatprep.subr.bf16.mxu1 %v4534_v63  ;;  %v4504_v45 = vpack.c.bf16 %v1900_v51, %v1896_v27  ;;  %v1919_v56 = vld [vmem:[#allocation8 + $0x2b8] sm:$0xff]  ;;  %v4540_v63 = vpack.c.bf16 %v1910_v28, %v1906_v5 }
 0x76d   :  { %v1615_v3 = vpop.f32.mrb[12].mxu0  ;;  %v1686_v6 = vpop.f32.mrb[12].mxu1 }
 0x76e   :  { %v5114_v10 = vadd.f32 %v1615_v3, %v5895_v35  ;;  %v1617_v13 = vpop.f32.mrb[13].mxu0  ;;  %v1688_v16 = vpop.f32.mrb[13].mxu1  ;;  %v5130_v36 = vadd.f32 %v1686_v6, %v5912_v1  ;;  %v1912_v3 = vld [vmem:[#allocation8 + $0x280] sm:$0xff] }
 0x76f   :  { %v5115_v19 = vadd.f32 %v1617_v13, %v5899_v37  ;;  %v5131_v29 = vadd.f32 %v1688_v16, %v5906_v57  ;;  %v1916_v6 = vld [vmem:[#allocation8 + $0x2a0] sm:$0xff]  ;;  %v4542_v13 = vpack.c.bf16 %v1919_v56, %v1915_v53  ;;  %v1914_v16 = vld [vmem:[#allocation8 + $0x290] sm:$0xff]  ;;  %v1945_v53 = vld [vmem:[#allocation8 + $0x388] sm:$0xff] }
 0x770   :  { %v3841_v23 = vmul.f32 -1.442695, %v5114_v10  ;;  %v4510_v10 = vpack.c.bf16 %v1917_v50, %v1913_v47  ;;  %v1938_v47 = vld [vmem:[#allocation8 + $0x350] sm:$0xff]  ;;  %v1949_v56 = vld [vmem:[#allocation8 + $0x3a8] sm:$0xff] }
 0x771   :  { %v3842_v26 = vmul.f32 -1.442695, %v5115_v19  ;;  %v3843_v32 = vmul.f32 -1.442695, %v5131_v29  ;;  %v1918_v19 = vld [vmem:[#allocation8 + $0x2b0] sm:$0xff]  ;;  %v1923_v29 = vld [vmem:[#allocation8 + $0x2d8] sm:$0xff] }
 0x772   :  { %5338 = vpow2.f32 %v3841_v23  ;;  %v1921_v23 = vld [vmem:[#allocation8 + $0x2c8] sm:$0xff]  ;;  %v1942_v50 = vld [vmem:[#allocation8 + $0x370] sm:$0xff] }
 0x773   :  { %5340 = vpow2.f32 %v3842_v26  ;;  %v1925_v26 = vld [vmem:[#allocation8 + $0x2e8] sm:$0xff] }
 0x774   :  { %5342 = vpow2.f32 %v3843_v32  ;;  %v1927_v32 = vld [vmem:[#allocation8 + $0x2f8] sm:$0xff] }
 0x775   :  { %5344 = vtanh.f32 %v5130_v36  ;;  %v4512_v36 = vpack.c.bf16 %v1916_v6, %v1912_v3  ;;  %v4556_v6 = vpack.c.bf16 %v1942_v50, %v1938_v47  ;;  %v1982_v47 = vld [vmem:[#allocation10 + $0x2a8] sm:$0xff]  ;;  %v1980_v50 = vld [vmem:[#allocation10 + $0x298] sm:$0xff] }
 0x77c   :  { %v5339_v40 = vpop.eup %5338 }
 0x77d   :  { %v5341_v44 = vpop.eup %5340  ;;  %v1704_v48 = vadd.f32 1.0, %v5339_v40  ;;  %v4544_v40 = vpack.c.bf16 %v1918_v19, %v1914_v16  ;;  %v4526_v16 = vpack.c.bf16 %v1949_v56, %v1945_v53  ;;  %v1984_v56 = vld [vmem:[#allocation10 + $0x2b8] sm:$0xff] }
 0x77e   :  { %v1705_v54 = vadd.f32 1.0, %v5341_v44  ;;  %v5343_v58 = vpop.eup %5342  ;;  %v1920_v44 = vld [vmem:[#allocation8 + $0x2c0] sm:$0xff] }
 0x77f   :  { %5346 = vrcp.f32 %v1704_v48  ;;  %v5345_v62 = vpop.eup %5344  ;;  %v1706_v18 = vadd.f32 1.0, %v5343_v58  ;;  %v1924_v48 = vld [vmem:[#allocation8 + $0x2e0] sm:$0xff]  ;;  %v4546_v58 = vpack.c.bf16 %v1927_v32, %v1923_v29  ;;  %v1953_v29 = vld [vmem:[#allocation8 + $0x3c8] sm:$0xff] }
 0x780   :  { %5348 = vrcp.f32 %v1705_v54  ;;  %v4514_v54 = vpack.c.bf16 %v1925_v26, %v1921_v23  ;;  %v4516_v27 = vpack.c.bf16 %v1924_v48, %v1920_v44  ;;  %v1946_v23 = vld [vmem:[#allocation8 + $0x390] sm:$0xff]  ;;  %v1957_v32 = vld [vmem:[#allocation8 + $0x3e8] sm:$0xff] }
 0x781   :  { %5350 = vrcp.f32 %v1706_v18  ;;  %v1931_v18 = vld [vmem:[#allocation8 + $0x318] sm:$0xff]  ;;  %v1950_v26 = vld [vmem:[#allocation8 + $0x3b0] sm:$0xff] }
 0x782   :  { %v4560_v48 = vpack.c.bf16 %v1950_v26, %v1946_v23  ;;  %v1990_v23 = vld [vmem:[#allocation10 + $0x2e8] sm:$0xff]  ;;  %v1988_v26 = vld [vmem:[#allocation10 + $0x2d8] sm:$0xff] }
 0x789   :  { %v5347_v4 = vpop.eup %5346 }
 0x78a   :  { %v5349_v9 = vpop.eup %5348  ;;  %v1715_v14 = vmul.f32 %v5347_v4, %v5345_v62  ;;  %v1922_v62 = vld [vmem:[#allocation8 + $0x2d0] sm:$0xff] }
 0x78b   :  { %v1714_v22 = vmul.f32 %v5349_v9, %v6145_v20  ;;  %v5351_v61 = vpop.eup %5350  ;;  %v4538_v20 = vpack.c.bf16 %v1911_v41, %v1907_v52  ;;  %v1926_v4 = vld [vmem:[#allocation8 + $0x2f0] sm:$0xff]  ;;  %v1929_v9 = vld [vmem:[#allocation8 + $0x308] sm:$0xff] }
 0x78c   :  { %v4548_v51 = vpack.c.bf16 %v1926_v4, %v1922_v62  ;;  %v1930_v52 = vld [vmem:[#allocation8 + $0x310] sm:$0xff]  ;;  %v1956_v4 = vld [vmem:[#allocation8 + $0x3e0] sm:$0xff] }
 0x78d   :  { %v6189_v25 = vadd.f32 %v1715_v14, %v1714_v22  ;;  %v1933_v14 = vld [vmem:[#allocation8 + $0x328] sm:$0xff]  ;;  %v1935_v22 = vld [vmem:[#allocation8 + $0x338] sm:$0xff]  ;;  %v1934_v41 = vld [vmem:[#allocation8 + $0x330] sm:$0xff] }
 0x78e   :  { %v4518_v49 = vpack.c.bf16 %v1933_v14, %v1929_v9  ;;  %v4550_v38 = vpack.c.bf16 %v1935_v22, %v1931_v18  ;;  %v4552_v12 = vpack.c.bf16 %v1934_v41, %v1930_v52  ;;  %v1954_v9 = vld [vmem:[#allocation8 + $0x3d0] sm:$0xff]  ;;  %v1974_v52 = vld [vmem:[#allocation10 + $0x268] sm:$0xff]  ;;  %v1972_v41 = vld [vmem:[#allocation10 + $0x258] sm:$0xff] }
 0x78f   :  { %5352 = vtanh.f32 %v6189_v25  ;;  %v1958_v14 = vld [vmem:[#allocation8 + $0x3f0] sm:$0xff] }
 0x790   :  { %v4564_v22 = vpack.c.bf16 %v1958_v14, %v1954_v9  ;;  %v1998_v9 = vld [vmem:[#allocation10 + $0x328] sm:$0xff]  ;;  %v1996_v14 = vld [vmem:[#allocation10 + $0x318] sm:$0xff] }
 0x799   :  { %v5353_v33 = vpop.eup %5352 }
 0x79a   :  { %v6192_v55 = vmul.f32 %v5353_v33, %v5351_v61  ;;  %v1937_v61 = vld [vmem:[#allocation8 + $0x348] sm:$0xff] }
 0x79b   :  { %v1941_v33 = vld [vmem:[#allocation8 + $0x368] sm:$0xff] }
 0x79c   :  { %1789 = vmatmul.mubr.f32.vlgmr.msra.gmra.mrb[14].mxu0 %v6192_v55  ;;  %1860 = vmatmul.mubr.f32.vlgmr.msra.gmra.mrb[14].mxu1 %v6192_v55  ;;  %v4522_v5 = vpack.c.bf16 %v1941_v33, %v1937_v61  ;;  %v1976_v33 = vld [vmem:[#allocation10 + $0x278] sm:$0xff] }
 0x79d   :  { %4505 = vmatpush1.bf16.msra.mxu0 %v4504_v45  ;;  %4537 = vmatpush1.bf16.msra.mxu1 %v4536_v7  ;;  %v1939_v45 = vld [vmem:[#allocation8 + $0x358] sm:$0xff] }
 0x79e   :  { %4507 = vmatprep.subr.bf16.mxu0 %v4506_v21  ;;  %4539 = vmatprep.subr.bf16.mxu1 %v4538_v20  ;;  %v1943_v7 = vld [vmem:[#allocation8 + $0x378] sm:$0xff]  ;;  %v1936_v21 = vld [vmem:[#allocation8 + $0x340] sm:$0xff] }
 0x79f   :  { %2120 = vmatprep.mubr.f32.mxu0 %v5628_v0  ;;  %2233 = vmatprep.mubr.f32.mxu1 %v5628_v0  ;;  %v1940_v20 = vld [vmem:[#allocation8 + $0x360] sm:$0xff]  ;;  %v4554_v28 = vpack.c.bf16 %v1943_v7, %v1939_v45 }
 0x7a0   :  { %v4524_v3 = vpack.c.bf16 %v1940_v20, %v1936_v21  ;;  %v1969_v45 = vld [vmem:[#allocation10 + $0x240] sm:$0xff]  ;;  %v1971_v21 = vld [vmem:[#allocation10 + $0x250] sm:$0xff] }
 0x7a1   :  { %4509 = vmatpush1.bf16.msra.mxu0 %v4508_v60  ;;  %4541 = vmatpush1.bf16.msra.mxu1 %v4540_v63  ;;  %v1947_v60 = vld [vmem:[#allocation8 + $0x398] sm:$0xff]  ;;  %v1973_v7 = vld [vmem:[#allocation10 + $0x260] sm:$0xff]  ;;  %v1975_v20 = vld [vmem:[#allocation10 + $0x270] sm:$0xff] }
 0x7a2   :  { %4511 = vmatprep.subr.bf16.mxu0 %v4510_v10  ;;  %4543 = vmatprep.subr.bf16.mxu1 %v4542_v13  ;;  %v1951_v63 = vld [vmem:[#allocation8 + $0x3b8] sm:$0xff]  ;;  %v1944_v10 = vld [vmem:[#allocation8 + $0x380] sm:$0xff] }
 0x7a3   :  { %v1948_v13 = vld [vmem:[#allocation8 + $0x3a0] sm:$0xff]  ;;  %v4558_v19 = vpack.c.bf16 %v1951_v63, %v1947_v60 }
 0x7a4   :  { %v4528_v44 = vpack.c.bf16 %v1948_v13, %v1944_v10  ;;  %v1977_v60 = vld [vmem:[#allocation10 + $0x280] sm:$0xff]  ;;  %v1979_v10 = vld [vmem:[#allocation10 + $0x290] sm:$0xff] }
 0x7a5   :  { %4513 = vmatpush1.bf16.msra.mxu0 %v4512_v36  ;;  %4545 = vmatpush1.bf16.msra.mxu1 %v4544_v40  ;;  %v1955_v36 = vld [vmem:[#allocation8 + $0x3d8] sm:$0xff]  ;;  %v1981_v63 = vld [vmem:[#allocation10 + $0x2a0] sm:$0xff]  ;;  %v1983_v13 = vld [vmem:[#allocation10 + $0x2b0] sm:$0xff] }
 0x7a6   :  { %4515 = vmatprep.subr.bf16.mxu0 %v4514_v54  ;;  %4547 = vmatprep.subr.bf16.mxu1 %v4546_v58  ;;  %v1959_v40 = vld [vmem:[#allocation8 + $0x3f8] sm:$0xff]  ;;  %v1952_v54 = vld [vmem:[#allocation8 + $0x3c0] sm:$0xff]  ;;  %v4530_v58 = vpack.c.bf16 %v1957_v32, %v1953_v29 }
 0x7a7   :  { %v4562_v62 = vpack.c.bf16 %v1959_v40, %v1955_v36  ;;  %v4532_v18 = vpack.c.bf16 %v1956_v4, %v1952_v54  ;;  %v1992_v32 = vld [vmem:[#allocation10 + $0x2f8] sm:$0xff]  ;;  %v1985_v36 = vld [vmem:[#allocation10 + $0x2c0] sm:$0xff]  ;;  %v1987_v54 = vld [vmem:[#allocation10 + $0x2d0] sm:$0xff] }
 0x7a8   :  { %v1989_v40 = vld [vmem:[#allocation10 + $0x2e0] sm:$0xff] }
 0x7a9   :  { %4517 = vmatpush1.bf16.msra.mxu0 %v4516_v27  ;;  %4549 = vmatpush1.bf16.msra.mxu1 %v4548_v51  ;;  %v1961_v27 = vld [vmem:[#allocation10 + $0x200] sm:$0xff] }
 0x7aa   :  { %4519 = vmatprep.subr.bf16.mxu0 %v4518_v49  ;;  %4551 = vmatprep.subr.bf16.mxu1 %v4550_v38  ;;  %v1967_v49 = vld [vmem:[#allocation10 + $0x230] sm:$0xff]  ;;  %v1970_v38 = vld [vmem:[#allocation10 + $0x248] sm:$0xff] }
 0x7ab   :  { %v6238_v61 = vpack.c.bf16 %v1974_v52, %v1970_v38 }
 0x7ad   :  { %4521 = vmatpush1.bf16.msra.mxu0 %v4520_v24  ;;  %4553 = vmatpush1.bf16.msra.mxu1 %v4552_v12  ;;  %v6240_v24 = vpack.c.bf16 %v1976_v33, %v1972_v41  ;;  %v6242_v12 = vpack.c.bf16 %v1973_v7, %v1969_v45  ;;  %v2004_v41 = vld [vmem:[#allocation10 + $0x358] sm:$0xff]  ;;  %v2001_v45 = vld [vmem:[#allocation10 + $0x340] sm:$0xff] }
 0x7ae   :  { %4523 = vmatprep.subr.bf16.mxu0 %v4522_v5  ;;  %4555 = vmatprep.subr.bf16.mxu1 %v4554_v28  ;;  %v6245_v5 = vpack.c.bf16 %v1975_v20, %v1971_v21  ;;  %v1978_v28 = vld [vmem:[#allocation10 + $0x288] sm:$0xff]  ;;  %v2008_v33 = vld [vmem:[#allocation10 + $0x378] sm:$0xff]  ;;  %v2005_v21 = vld [vmem:[#allocation10 + $0x360] sm:$0xff] }
 0x7af   :  { %v6250_v53 = vpack.c.bf16 %v1982_v47, %v1978_v28  ;;  %v6286_v7 = vpack.c.bf16 %v2008_v33, %v2004_v41  ;;  %v2003_v20 = vld [vmem:[#allocation10 + $0x350] sm:$0xff]  ;;  %v6289_v47 = vpack.c.bf16 %v2005_v21, %v2001_v45 }
 0x7b0   :  { %v2007_v28 = vld [vmem:[#allocation10 + $0x370] sm:$0xff] }
 0x7b1   :  { %4525 = vmatpush1.bf16.msra.mxu0 %v4524_v3  ;;  %4557 = vmatpush1.bf16.msra.mxu1 %v4556_v6  ;;  %v6252_v3 = vpack.c.bf16 %v1984_v56, %v1980_v50  ;;  %v6254_v6 = vpack.c.bf16 %v1981_v63, %v1977_v60  ;;  %v2010_v50 = vld [vmem:[#allocation10 + $0x388] sm:$0xff]  ;;  %v2012_v60 = vld [vmem:[#allocation10 + $0x398] sm:$0xff]  ;;  %v6293_v63 = vpack.c.bf16 %v2007_v28, %v2003_v20 }
 0x7b2   :  { %4527 = vmatprep.subr.bf16.mxu0 %v4526_v16  ;;  %4559 = vmatprep.subr.bf16.mxu1 %v4558_v19  ;;  %v6257_v16 = vpack.c.bf16 %v1983_v13, %v1979_v10  ;;  %v1986_v19 = vld [vmem:[#allocation10 + $0x2c8] sm:$0xff]  ;;  %v2016_v13 = vld [vmem:[#allocation10 + $0x3b8] sm:$0xff] }
 0x7b3   :  { %v6262_v29 = vpack.c.bf16 %v1990_v23, %v1986_v19  ;;  %v2014_v56 = vld [vmem:[#allocation10 + $0x3a8] sm:$0xff]  ;;  %v2009_v19 = vld [vmem:[#allocation10 + $0x380] sm:$0xff] }
 0x7b4   :  { %v6295_v10 = vpack.c.bf16 %v2014_v56, %v2010_v50  ;;  %v2013_v23 = vld [vmem:[#allocation10 + $0x3a0] sm:$0xff] }
 0x7b5   :  { %4529 = vmatpush1.bf16.msra.mxu0 %v4528_v44  ;;  %4561 = vmatpush1.bf16.msra.mxu1 %v4560_v48  ;;  %v6264_v44 = vpack.c.bf16 %v1992_v32, %v1988_v26  ;;  %v6266_v48 = vpack.c.bf16 %v1989_v40, %v1985_v36  ;;  %v6298_v26 = vpack.c.bf16 %v2016_v13, %v2012_v60  ;;  %v2011_v32 = vld [vmem:[#allocation10 + $0x390] sm:$0xff] }
 0x7b6   :  { %4531 = vmatprep.subr.bf16.mxu0 %v4530_v58  ;;  %4563 = vmatprep.subr.bf16.mxu1 %v4562_v62  ;;  %v1991_v58 = vld [vmem:[#allocation10 + $0x2f0] sm:$0xff]  ;;  %v1994_v62 = vld [vmem:[#allocation10 + $0x308] sm:$0xff]  ;;  %v6301_v40 = vpack.c.bf16 %v2013_v23, %v2009_v19 }
 0x7b7   :  { %v6269_v4 = vpack.c.bf16 %v1991_v58, %v1987_v54  ;;  %v2015_v36 = vld [vmem:[#allocation10 + $0x3b0] sm:$0xff]  ;;  %v2018_v58 = vld [vmem:[#allocation10 + $0x3c8] sm:$0xff] }
 0x7b8   :  { %v6305_v54 = vpack.c.bf16 %v2015_v36, %v2011_v32 }
 0x7b9   :  { %4533 = vmatpush1.bf16.msra.mxu0 %v4532_v18  ;;  %4565 = vmatpush1.bf16.msra.mxu1 %v4564_v22  ;;  %v2000_v18 = vld [vmem:[#allocation10 + $0x338] sm:$0xff]  ;;  %v6273_v22 = vpack.c.bf16 %v1998_v9, %v1994_v62  ;;  %v2022_v62 = vld [vmem:[#allocation10 + $0x3e8] sm:$0xff] }
 0x7ba   :  { %v2020_v9 = vld [vmem:[#allocation10 + $0x3d8] sm:$0xff] }
 0x7bc   :  { %2121 = vmatmul.mubr.f32.vlgmr.msra.gmra.mrb[16].mxu0 %v5918_v46  ;;  %2234 = vmatmul.mubr.f32.vlgmr.msra.gmra.mrb[16].mxu1 %v5918_v46  ;;  %v1962_v46 = vld [vmem:[#allocation10 + $0x208] sm:$0xff] }
 0x7bd   :  { %2126 = vmatprep.mubr.f32.mxu0 %v5628_v0  ;;  %2239 = vmatprep.mubr.f32.mxu1 %v5628_v0 }
 0x7c0   :  { %2127 = vmatmul.mubr.f32.gmra.mrb[18].mxu0 %v5964_v2  ;;  %2240 = vmatmul.mubr.f32.gmra.mrb[18].mxu1 %v5964_v2  ;;  %v1966_v2 = vld [vmem:[#allocation10 + $0x228] sm:$0xff] }
 0x7c1   :  { %2132 = vmatprep.mubr.f32.mxu0 %v5628_v0  ;;  %2245 = vmatprep.mubr.f32.mxu1 %v5628_v0 }
 0x7c4   :  { %2133 = vmatmul.mubr.f32.gmra.mrb[20].mxu0 %v6010_v15  ;;  %2246 = vmatmul.mubr.f32.gmra.mrb[20].mxu1 %v6010_v15  ;;  %v1964_v15 = vld [vmem:[#allocation10 + $0x218] sm:$0xff] }
 0x7c5   :  { %2138 = vmatprep.mubr.f32.mxu0 %v5628_v0  ;;  %2251 = vmatprep.mubr.f32.mxu1 %v5628_v0 }
 0x7c8   :  { %2139 = vmatmul.mubr.f32.gmra.mrb[22].mxu0 %v6056_v43  ;;  %2252 = vmatmul.mubr.f32.gmra.mrb[22].mxu1 %v6056_v43  ;;  %v6226_v43 = vpack.c.bf16 %v1966_v2, %v1962_v46  ;;  %v6275_v46 = vpack.c.bf16 %v2000_v18, %v1996_v14  ;;  %v1993_v2 = vld [vmem:[#allocation10 + $0x300] sm:$0xff]  ;;  %v6310_v14 = vpack.c.bf16 %v2022_v62, %v2018_v58  ;;  %v2024_v18 = vld [vmem:[#allocation10 + $0x3f8] sm:$0xff] }
 0x7c9   :  { %2144 = vmatprep.mubr.f32.mxu0 %v5628_v0  ;;  %2257 = vmatprep.mubr.f32.mxu1 %v5628_v0 }
 0x7ca   :  { %4567 = vmatprep.subr.bf16.mxu0 %v6226_v43 }
 0x7cc   :  { %2145 = vmatmul.mubr.f32.gmra.mrb[24].mxu0 %v6102_v8  ;;  %2258 = vmatmul.mubr.f32.gmra.mrb[24].mxu1 %v6102_v8  ;;  %v1968_v8 = vld [vmem:[#allocation10 + $0x238] sm:$0xff] }
 0x7cd   :  { %2150 = vmatprep.mubr.f32.mxu0 %v5628_v0  ;;  %2263 = vmatprep.mubr.f32.mxu1 %v5628_v0  ;;  %v6228_v51 = vpack.c.bf16 %v1968_v8, %v1964_v15  ;;  %v1997_v15 = vld [vmem:[#allocation10 + $0x320] sm:$0xff]  ;;  %v1995_v8 = vld [vmem:[#allocation10 + $0x310] sm:$0xff] }
 0x7cf   :  { %4599 = vmatprep.subr.bf16.mxu1 %v6228_v51 }
 0x7d0   :  { %2151 = vmatmul.mubr.f32.gmra.mrb[26].mxu0 %v6148_v17  ;;  %2264 = vmatmul.mubr.f32.gmra.mrb[26].mxu1 %v6148_v17  ;;  %v1965_v17 = vld [vmem:[#allocation10 + $0x220] sm:$0xff] }
 0x7d1   :  { %2156 = vmatprep.mubr.f32.mxu0 %v5628_v0  ;;  %2269 = vmatprep.mubr.f32.mxu1 %v5628_v0  ;;  %v6230_v39 = vpack.c.bf16 %v1965_v17, %v1961_v27  ;;  %v6278_v27 = vpack.c.bf16 %v1997_v15, %v1993_v2  ;;  %v1999_v17 = vld [vmem:[#allocation10 + $0x330] sm:$0xff]  ;;  %v2017_v2 = vld [vmem:[#allocation10 + $0x3c0] sm:$0xff] }
 0x7d2   :  { %v6282_v38 = vpack.c.bf16 %v1999_v17, %v1995_v8  ;;  %v2021_v15 = vld [vmem:[#allocation10 + $0x3e0] sm:$0xff]  ;;  %v6312_v8 = vpack.c.bf16 %v2024_v18, %v2020_v9 }
 0x7d3   :  { %4569 = vmatpush1.bf16.msra.mxu0 %v6230_v39  ;;  %v6314_v17 = vpack.c.bf16 %v2021_v15, %v2017_v2 }
 0x7d4   :  { %2157 = vmatmul.mubr.f32.gmra.mrb[28].mxu0 %v6192_v55  ;;  %2270 = vmatmul.mubr.f32.gmra.mrb[28].mxu1 %v6192_v55  ;;  %v6233_v55 = vpack.c.bf16 %v1967_v49, %v1963_v11  ;;  %v2002_v11 = vld [vmem:[#allocation10 + $0x348] sm:$0xff] }
 0x7d5   :  { %2162 = vmatprep.mubr.f32.mxu0 %v5628_v0  ;;  %2275 = vmatprep.mubr.f32.mxu1 %v5628_v0  ;;  %v2006_v49 = vld [vmem:[#allocation10 + $0x368] sm:$0xff] }
 0x7d6   :  { %4601 = vmatpush1.bf16.msra.mxu1 %v6233_v55  ;;  %4571 = vmatprep.subr.bf16.mxu0 %v6238_v61  ;;  %v6284_v52 = vpack.c.bf16 %v2006_v49, %v2002_v11  ;;  %v2019_v11 = vld [vmem:[#allocation10 + $0x3d0] sm:$0xff] }
 0x7d7   :  { %4603 = vmatprep.subr.bf16.mxu1 %v6240_v24  ;;  %4573 = vmatpush1.bf16.msra.mxu0 %v6242_v12  ;;  %v2023_v49 = vld [vmem:[#allocation10 + $0x3f0] sm:$0xff] }
 0x7d8   :  { %4575 = vmatprep.subr.bf16.mxu0 %v6250_v53  ;;  %v6317_v41 = vpack.c.bf16 %v2023_v49, %v2019_v11 }
 0x7da   :  { %4605 = vmatpush1.bf16.msra.mxu1 %v6245_v5 }
 0x7db   :  { %4607 = vmatprep.subr.bf16.mxu1 %v6252_v3  ;;  %4577 = vmatpush1.bf16.msra.mxu0 %v6254_v6 }
 0x7dc   :  { %4579 = vmatprep.subr.bf16.mxu0 %v6262_v29 }
 0x7de   :  { %4609 = vmatpush1.bf16.msra.mxu1 %v6257_v16 }
 0x7df   :  { %4611 = vmatprep.subr.bf16.mxu1 %v6264_v44  ;;  %4581 = vmatpush1.bf16.msra.mxu0 %v6266_v48 }
 0x7e0   :  { %4583 = vmatprep.subr.bf16.mxu0 %v6273_v22 }
 0x7e2   :  { %4613 = vmatpush1.bf16.msra.mxu1 %v6269_v4 }
 0x7e3   :  { %4615 = vmatprep.subr.bf16.mxu1 %v6275_v46  ;;  %4585 = vmatpush1.bf16.msra.mxu0 %v6278_v27 }
 0x7e4   :  { %4587 = vmatprep.subr.bf16.mxu0 %v6284_v52 }
 0x7e6   :  { %4617 = vmatpush1.bf16.msra.mxu1 %v6282_v38 }
 0x7e7   :  { %4619 = vmatprep.subr.bf16.mxu1 %v6286_v7  ;;  %4589 = vmatpush1.bf16.msra.mxu0 %v6289_v47 }
 0x7e8   :  { %4591 = vmatprep.subr.bf16.mxu0 %v6295_v10 }
 0x7ea   :  { %4621 = vmatpush1.bf16.msra.mxu1 %v6293_v63 }
 0x7eb   :  { %4623 = vmatprep.subr.bf16.mxu1 %v6298_v26  ;;  %4593 = vmatpush1.bf16.msra.mxu0 %v6301_v40 }
 0x7ec   :  { %4595 = vmatprep.subr.bf16.mxu0 %v6310_v14 }
 0x7ee   :  { %4625 = vmatpush1.bf16.msra.mxu1 %v6305_v54 }
 0x7ef   :  { %4627 = vmatprep.subr.bf16.mxu1 %v6312_v8  ;;  %4597 = vmatpush1.bf16.msra.mxu0 %v6314_v17 }
 0x7f0   :  { %4631 = vmatprep.subr.bf16.mxu0 %v6226_v43 }
 0x7f2   :  { %4629 = vmatpush1.bf16.msra.mxu1 %v6317_v41 }
 0x7f3   :  { %4663 = vmatprep.subr.bf16.mxu1 %v6228_v51 }
 0x86f   :  { %v1790_v33 = vpop.f32.mrb[14].mxu0  ;;  %v1861_v45 = vpop.f32.mrb[14].mxu1 }
 0x870   :  { %v5116_v21 = vadd.f32 %v1790_v33, %v5895_v35  ;;  %v1792_v20 = vpop.f32.mrb[15].mxu0  ;;  %v1863_v28 = vpop.f32.mrb[15].mxu1  ;;  %v5132_v23 = vadd.f32 %v1861_v45, %v5912_v1 }
 0x871   :  { %v5117_v50 = vadd.f32 %v1792_v20, %v5899_v37  ;;  %v5133_v13 = vadd.f32 %v1863_v28, %v5906_v57 }
 0x872   :  { %v3844_v56 = vmul.f32 -1.442695, %v5116_v21 }
 0x873   :  { %v3845_v60 = vmul.f32 -1.442695, %v5117_v50  ;;  %v3846_v19 = vmul.f32 -1.442695, %v5133_v13 }
 0x874   :  { %5354 = vpow2.f32 %v3844_v56 }
 0x875   :  { %5356 = vpow2.f32 %v3845_v60 }
 0x876   :  { %5358 = vpow2.f32 %v3846_v19 }
 0x877   :  { %5360 = vtanh.f32 %v5132_v23 }
 0x87e   :  { %v5355_v32 = vpop.eup %5354 }
 0x87f   :  { %v5357_v36 = vpop.eup %5356  ;;  %v1879_v58 = vadd.f32 1.0, %v5355_v32 }
 0x880   :  { %v1880_v62 = vadd.f32 1.0, %v5357_v36  ;;  %v5359_v35 = vpop.eup %5358 }
 0x881   :  { %5362 = vrcp.f32 %v1879_v58  ;;  %v5361_v9 = vpop.eup %5360  ;;  %v1881_v15 = vadd.f32 1.0, %v5359_v35 }
 0x882   :  { %5364 = vrcp.f32 %v1880_v62 }
 0x883   :  { %5366 = vrcp.f32 %v1881_v15 }
 0x88b   :  { %v5363_v37 = vpop.eup %5362 }
 0x88c   :  { %v5365_v18 = vpop.eup %5364  ;;  %v1890_v2 = vmul.f32 %v5363_v37, %v5361_v9 }
 0x88d   :  { %v1889_v11 = vmul.f32 %v5365_v18, %v6189_v25  ;;  %v5367_v1 = vpop.eup %5366  ;;  %v3847_v25 = vld [vmem:[%s6667_s3 + $0x4] sm:$0xf] }
 0x88e   :  { %v6372_v45 = vrot.slane %v3847_v25, %v219_v31  ;;  %v6376_v21 = vrot.slane %v3847_v25, %v223_v34  ;;  %v6382_v32 = vrot.slane %v3847_v25, %v231_v42  ;;  %v6387_v34 = vrot.slane %v3847_v25, %v227_v59 }
 0x88f   :  { %v1891_v57 = vadd.f32 %v1890_v2, %v1889_v11 }
 0x891   :  { %5368 = vtanh.f32 %v1891_v57 }
 0x89b   :  { %v5369_v49 = vpop.eup %5368 }
 0x89c   :  { %v1893_v33 = vmul.f32 %v5369_v49, %v5367_v1 }
 0x89e   :  { %2163 = vmatmul.mubr.f32.gmra.mrb[30].mxu0 %v1893_v33  ;;  %2276 = vmatmul.mubr.f32.gmra.mrb[30].mxu1 %v1893_v33 }
 0x89f   :  { %2382 = vmatprep.mubr.f32.mxu0 %v5628_v0  ;;  %2453 = vmatprep.mubr.f32.mxu1 %v5628_v0 }
 0x8a2   :  { %2383 = vmatmul.mubr.f32.vlgmr.msra.gmra.mrb[16].mxu0 %v5628_v0  ;;  %2454 = vmatmul.mubr.f32.vlgmr.msra.gmra.mrb[16].mxu1 %v5628_v0 }
 0x8a3   :  { %4633 = vmatpush1.bf16.msra.mxu0 %v6230_v39  ;;  %4665 = vmatpush1.bf16.msra.mxu1 %v6233_v55 }
 0x8a4   :  { %4635 = vmatprep.subr.bf16.mxu0 %v6238_v61  ;;  %4667 = vmatprep.subr.bf16.mxu1 %v6240_v24 }
 0x8a5   :  { %2556 = vmatprep.mubr.f32.mxu0 %v5628_v0  ;;  %2627 = vmatprep.mubr.f32.mxu1 %v5628_v0 }
 0x8a7   :  { %4637 = vmatpush1.bf16.msra.mxu0 %v6242_v12  ;;  %4669 = vmatpush1.bf16.msra.mxu1 %v6245_v5 }
 0x8a8   :  { %4639 = vmatprep.subr.bf16.mxu0 %v6250_v53  ;;  %4671 = vmatprep.subr.bf16.mxu1 %v6252_v3 }
 0x8ab   :  { %4641 = vmatpush1.bf16.msra.mxu0 %v6254_v6  ;;  %4673 = vmatpush1.bf16.msra.mxu1 %v6257_v16 }
 0x8ac   :  { %4643 = vmatprep.subr.bf16.mxu0 %v6262_v29  ;;  %4675 = vmatprep.subr.bf16.mxu1 %v6264_v44 }
 0x8af   :  { %4645 = vmatpush1.bf16.msra.mxu0 %v6266_v48  ;;  %4677 = vmatpush1.bf16.msra.mxu1 %v6269_v4 }
 0x8b0   :  { %4647 = vmatprep.subr.bf16.mxu0 %v6273_v22  ;;  %4679 = vmatprep.subr.bf16.mxu1 %v6275_v46 }
 0x8b3   :  { %4649 = vmatpush1.bf16.msra.mxu0 %v6278_v27  ;;  %4681 = vmatpush1.bf16.msra.mxu1 %v6282_v38 }
 0x8b4   :  { %4651 = vmatprep.subr.bf16.mxu0 %v6284_v52  ;;  %4683 = vmatprep.subr.bf16.mxu1 %v6286_v7 }
 0x8b7   :  { %4653 = vmatpush1.bf16.msra.mxu0 %v6289_v47  ;;  %4685 = vmatpush1.bf16.msra.mxu1 %v6293_v63 }
 0x8b8   :  { %4655 = vmatprep.subr.bf16.mxu0 %v6295_v10  ;;  %4687 = vmatprep.subr.bf16.mxu1 %v6298_v26 }
 0x8bb   :  { %4657 = vmatpush1.bf16.msra.mxu0 %v6301_v40  ;;  %4689 = vmatpush1.bf16.msra.mxu1 %v6305_v54 }
 0x8bc   :  { %4659 = vmatprep.subr.bf16.mxu0 %v6310_v14  ;;  %4691 = vmatprep.subr.bf16.mxu1 %v6312_v8 }
 0x8bf   :  { %4661 = vmatpush1.bf16.msra.mxu0 %v6314_v17  ;;  %4693 = vmatpush1.bf16.msra.mxu1 %v6317_v41 }
 0x8c0   :  { %4695 = vmatprep.subr.bf16.mxu0 %v6226_v43  ;;  %4727 = vmatprep.subr.bf16.mxu1 %v6228_v51 }
 0x975   :  { %v2384_v20 = vpop.f32.mrb[16].mxu0  ;;  %v2455_v28 = vpop.f32.mrb[16].mxu1 }
 0x976   :  { %v5134_v50 = vadd.f32 %v2384_v20, %v6372_v45  ;;  %v2386_v56 = vpop.f32.mrb[17].mxu0  ;;  %v2457_v60 = vpop.f32.mrb[17].mxu1  ;;  %v5150_v58 = vadd.f32 %v2455_v28, %v6387_v34 }
 0x977   :  { %v5135_v13 = vadd.f32 %v2386_v56, %v6376_v21  ;;  %v5151_v31 = vadd.f32 %v2457_v60, %v6382_v32 }
 0x978   :  { %v3848_v19 = vmul.f32 -1.442695, %v5134_v50 }
 0x979   :  { %v3849_v23 = vmul.f32 -1.442695, %v5135_v13  ;;  %v3850_v36 = vmul.f32 -1.442695, %v5151_v31 }
 0x97a   :  { %5370 = vpow2.f32 %v3848_v19 }
 0x97b   :  { %5372 = vpow2.f32 %v3849_v23 }
 0x97c   :  { %5374 = vpow2.f32 %v3850_v36 }
 0x97d   :  { %5376 = vtanh.f32 %v5150_v58 }
 0x984   :  { %v5371_v62 = vpop.eup %5370 }
 0x985   :  { %v5373_v35 = vpop.eup %5372  ;;  %v2473_v9 = vadd.f32 1.0, %v5371_v62 }
 0x986   :  { %v2474_v37 = vadd.f32 1.0, %v5373_v35  ;;  %v5375_v42 = vpop.eup %5374 }
 0x987   :  { %5378 = vrcp.f32 %v2473_v9  ;;  %v5377_v18 = vpop.eup %5376  ;;  %v2475_v57 = vadd.f32 1.0, %v5375_v42 }
 0x988   :  { %5380 = vrcp.f32 %v2474_v37 }
 0x989   :  { %5382 = vrcp.f32 %v2475_v57 }
 0x991   :  { %v5379_v2 = vpop.eup %5378 }
 0x992   :  { %v5381_v15 = vpop.eup %5380  ;;  %v2484_v11 = vmul.f32 %v5379_v2, %v5377_v18 }
 0x993   :  { %v2483_v30 = vmul.f32 0.0, %v5381_v15  ;;  %v5383_v1 = vpop.eup %5382 }
 0x995   :  { %v6390_v59 = vadd.f32 %v2484_v11, %v2483_v30 }
 0x997   :  { %5384 = vtanh.f32 %v6390_v59 }
 0x9a1   :  { %v5385_v49 = vpop.eup %5384 }
 0x9a2   :  { %v2487_v33 = vmul.f32 %v5385_v49, %v5383_v1 }
 0x9a4   :  { %2557 = vmatmul.mubr.f32.vlgmr.msra.gmra.mrb[18].mxu0 %v2487_v33  ;;  %2628 = vmatmul.mubr.f32.vlgmr.msra.gmra.mrb[18].mxu1 %v2487_v33 }
 0x9a5   :  { %4697 = vmatpush1.bf16.msra.mxu0 %v6230_v39  ;;  %4729 = vmatpush1.bf16.msra.mxu1 %v6233_v55 }
 0x9a6   :  { %4699 = vmatprep.subr.bf16.mxu0 %v6238_v61  ;;  %4731 = vmatprep.subr.bf16.mxu1 %v6240_v24 }
 0x9a7   :  { %2730 = vmatprep.mubr.f32.mxu0 %v5628_v0  ;;  %2801 = vmatprep.mubr.f32.mxu1 %v5628_v0 }
 0x9a9   :  { %4701 = vmatpush1.bf16.msra.mxu0 %v6242_v12  ;;  %4733 = vmatpush1.bf16.msra.mxu1 %v6245_v5 }
 0x9aa   :  { %4703 = vmatprep.subr.bf16.mxu0 %v6250_v53  ;;  %4735 = vmatprep.subr.bf16.mxu1 %v6252_v3 }
 0x9ad   :  { %4705 = vmatpush1.bf16.msra.mxu0 %v6254_v6  ;;  %4737 = vmatpush1.bf16.msra.mxu1 %v6257_v16 }
 0x9ae   :  { %4707 = vmatprep.subr.bf16.mxu0 %v6262_v29  ;;  %4739 = vmatprep.subr.bf16.mxu1 %v6264_v44 }
 0x9b1   :  { %4709 = vmatpush1.bf16.msra.mxu0 %v6266_v48  ;;  %4741 = vmatpush1.bf16.msra.mxu1 %v6269_v4 }
 0x9b2   :  { %4711 = vmatprep.subr.bf16.mxu0 %v6273_v22  ;;  %4743 = vmatprep.subr.bf16.mxu1 %v6275_v46 }
 0x9b5   :  { %4713 = vmatpush1.bf16.msra.mxu0 %v6278_v27  ;;  %4745 = vmatpush1.bf16.msra.mxu1 %v6282_v38 }
 0x9b6   :  { %4715 = vmatprep.subr.bf16.mxu0 %v6284_v52  ;;  %4747 = vmatprep.subr.bf16.mxu1 %v6286_v7 }
 0x9b9   :  { %4717 = vmatpush1.bf16.msra.mxu0 %v6289_v47  ;;  %4749 = vmatpush1.bf16.msra.mxu1 %v6293_v63 }
 0x9ba   :  { %4719 = vmatprep.subr.bf16.mxu0 %v6295_v10  ;;  %4751 = vmatprep.subr.bf16.mxu1 %v6298_v26 }
 0x9bd   :  { %4721 = vmatpush1.bf16.msra.mxu0 %v6301_v40  ;;  %4753 = vmatpush1.bf16.msra.mxu1 %v6305_v54 }
 0x9be   :  { %4723 = vmatprep.subr.bf16.mxu0 %v6310_v14  ;;  %4755 = vmatprep.subr.bf16.mxu1 %v6312_v8 }
 0x9c1   :  { %4725 = vmatpush1.bf16.msra.mxu0 %v6314_v17  ;;  %4757 = vmatpush1.bf16.msra.mxu1 %v6317_v41 }
 0x9c2   :  { %4759 = vmatprep.subr.bf16.mxu0 %v6226_v43  ;;  %4791 = vmatprep.subr.bf16.mxu1 %v6228_v51 }
 0xa77   :  { %v2558_v25 = vpop.f32.mrb[18].mxu0  ;;  %v2629_v20 = vpop.f32.mrb[18].mxu1 }
 0xa78   :  { %v5136_v28 = vadd.f32 %v2558_v25, %v6372_v45  ;;  %v2560_v50 = vpop.f32.mrb[19].mxu0  ;;  %v2631_v56 = vpop.f32.mrb[19].mxu1  ;;  %v5152_v36 = vadd.f32 %v2629_v20, %v6387_v34 }
 0xa79   :  { %v5137_v60 = vadd.f32 %v2560_v50, %v6376_v21  ;;  %v5153_v23 = vadd.f32 %v2631_v56, %v6382_v32 }
 0xa7a   :  { %v3851_v13 = vmul.f32 -1.442695, %v5136_v28 }
 0xa7b   :  { %v3852_v19 = vmul.f32 -1.442695, %v5137_v60  ;;  %v3853_v31 = vmul.f32 -1.442695, %v5153_v23 }
 0xa7c   :  { %5386 = vpow2.f32 %v3851_v13 }
 0xa7d   :  { %5388 = vpow2.f32 %v3852_v19 }
 0xa7e   :  { %5390 = vpow2.f32 %v3853_v31 }
 0xa7f   :  { %5392 = vtanh.f32 %v5152_v36 }
 0xa86   :  { %v5387_v58 = vpop.eup %5386 }
 0xa87   :  { %v5389_v62 = vpop.eup %5388  ;;  %v2647_v35 = vadd.f32 1.0, %v5387_v58 }
 0xa88   :  { %v2648_v9 = vadd.f32 1.0, %v5389_v62  ;;  %v5391_v37 = vpop.eup %5390 }
 0xa89   :  { %5394 = vrcp.f32 %v2647_v35  ;;  %v5393_v42 = vpop.eup %5392  ;;  %v2649_v11 = vadd.f32 1.0, %v5391_v37 }
 0xa8a   :  { %5396 = vrcp.f32 %v2648_v9 }
 0xa8b   :  { %5398 = vrcp.f32 %v2649_v11 }
 0xa93   :  { %v5395_v18 = vpop.eup %5394 }
 0xa94   :  { %v5397_v2 = vpop.eup %5396  ;;  %v2658_v15 = vmul.f32 %v5395_v18, %v5393_v42 }
 0xa95   :  { %v2657_v57 = vmul.f32 %v5397_v2, %v6390_v59  ;;  %v5399_v1 = vpop.eup %5398 }
 0xa97   :  { %v6432_v30 = vadd.f32 %v2658_v15, %v2657_v57 }
 0xa99   :  { %5400 = vtanh.f32 %v6432_v30 }
 0xaa3   :  { %v5401_v49 = vpop.eup %5400 }
 0xaa4   :  { %v2661_v33 = vmul.f32 %v5401_v49, %v5399_v1 }
 0xaa6   :  { %2731 = vmatmul.mubr.f32.vlgmr.msra.gmra.mrb[20].mxu0 %v2661_v33  ;;  %2802 = vmatmul.mubr.f32.vlgmr.msra.gmra.mrb[20].mxu1 %v2661_v33 }
 0xaa7   :  { %4761 = vmatpush1.bf16.msra.mxu0 %v6230_v39  ;;  %4793 = vmatpush1.bf16.msra.mxu1 %v6233_v55 }
 0xaa8   :  { %4763 = vmatprep.subr.bf16.mxu0 %v6238_v61  ;;  %4795 = vmatprep.subr.bf16.mxu1 %v6240_v24 }
 0xaa9   :  { %2904 = vmatprep.mubr.f32.mxu0 %v5628_v0  ;;  %2975 = vmatprep.mubr.f32.mxu1 %v5628_v0 }
 0xaab   :  { %4765 = vmatpush1.bf16.msra.mxu0 %v6242_v12  ;;  %4797 = vmatpush1.bf16.msra.mxu1 %v6245_v5 }
 0xaac   :  { %4767 = vmatprep.subr.bf16.mxu0 %v6250_v53  ;;  %4799 = vmatprep.subr.bf16.mxu1 %v6252_v3 }
 0xaaf   :  { %4769 = vmatpush1.bf16.msra.mxu0 %v6254_v6  ;;  %4801 = vmatpush1.bf16.msra.mxu1 %v6257_v16 }
 0xab0   :  { %4771 = vmatprep.subr.bf16.mxu0 %v6262_v29  ;;  %4803 = vmatprep.subr.bf16.mxu1 %v6264_v44 }
 0xab3   :  { %4773 = vmatpush1.bf16.msra.mxu0 %v6266_v48  ;;  %4805 = vmatpush1.bf16.msra.mxu1 %v6269_v4 }
 0xab4   :  { %4775 = vmatprep.subr.bf16.mxu0 %v6273_v22  ;;  %4807 = vmatprep.subr.bf16.mxu1 %v6275_v46 }
 0xab7   :  { %4777 = vmatpush1.bf16.msra.mxu0 %v6278_v27  ;;  %4809 = vmatpush1.bf16.msra.mxu1 %v6282_v38 }
 0xab8   :  { %4779 = vmatprep.subr.bf16.mxu0 %v6284_v52  ;;  %4811 = vmatprep.subr.bf16.mxu1 %v6286_v7 }
 0xabb   :  { %4781 = vmatpush1.bf16.msra.mxu0 %v6289_v47  ;;  %4813 = vmatpush1.bf16.msra.mxu1 %v6293_v63 }
 0xabc   :  { %4783 = vmatprep.subr.bf16.mxu0 %v6295_v10  ;;  %4815 = vmatprep.subr.bf16.mxu1 %v6298_v26 }
 0xabf   :  { %4785 = vmatpush1.bf16.msra.mxu0 %v6301_v40  ;;  %4817 = vmatpush1.bf16.msra.mxu1 %v6305_v54 }
 0xac0   :  { %4787 = vmatprep.subr.bf16.mxu0 %v6310_v14  ;;  %4819 = vmatprep.subr.bf16.mxu1 %v6312_v8 }
 0xac3   :  { %4789 = vmatpush1.bf16.msra.mxu0 %v6314_v17  ;;  %4821 = vmatpush1.bf16.msra.mxu1 %v6317_v41 }
 0xac4   :  { %4823 = vmatprep.subr.bf16.mxu0 %v6226_v43  ;;  %4855 = vmatprep.subr.bf16.mxu1 %v6228_v51 }
 0xb79   :  { %v2732_v59 = vpop.f32.mrb[20].mxu0  ;;  %v2803_v25 = vpop.f32.mrb[20].mxu1 }
 0xb7a   :  { %v5138_v20 = vadd.f32 %v2732_v59, %v6372_v45  ;;  %v2734_v28 = vpop.f32.mrb[21].mxu0  ;;  %v2805_v50 = vpop.f32.mrb[21].mxu1  ;;  %v5154_v31 = vadd.f32 %v2803_v25, %v6387_v34 }
 0xb7b   :  { %v5139_v56 = vadd.f32 %v2734_v28, %v6376_v21  ;;  %v5155_v19 = vadd.f32 %v2805_v50, %v6382_v32 }
 0xb7c   :  { %v3854_v60 = vmul.f32 -1.442695, %v5138_v20 }
 0xb7d   :  { %v3855_v13 = vmul.f32 -1.442695, %v5139_v56  ;;  %v3856_v23 = vmul.f32 -1.442695, %v5155_v19 }
 0xb7e   :  { %5402 = vpow2.f32 %v3854_v60 }
 0xb7f   :  { %5404 = vpow2.f32 %v3855_v13 }
 0xb80   :  { %5406 = vpow2.f32 %v3856_v23 }
 0xb81   :  { %5408 = vtanh.f32 %v5154_v31 }
 0xb88   :  { %v5403_v36 = vpop.eup %5402 }
 0xb89   :  { %v5405_v58 = vpop.eup %5404  ;;  %v2821_v62 = vadd.f32 1.0, %v5403_v36 }
 0xb8a   :  { %v2822_v35 = vadd.f32 1.0, %v5405_v58  ;;  %v5407_v9 = vpop.eup %5406 }
 0xb8b   :  { %5410 = vrcp.f32 %v2821_v62  ;;  %v5409_v37 = vpop.eup %5408  ;;  %v2823_v15 = vadd.f32 1.0, %v5407_v9 }
 0xb8c   :  { %5412 = vrcp.f32 %v2822_v35 }
 0xb8d   :  { %5414 = vrcp.f32 %v2823_v15 }
 0xb95   :  { %v5411_v42 = vpop.eup %5410 }
 0xb96   :  { %v5413_v18 = vpop.eup %5412  ;;  %v2832_v2 = vmul.f32 %v5411_v42, %v5409_v37 }
 0xb97   :  { %v2831_v11 = vmul.f32 %v5413_v18, %v6432_v30  ;;  %v5415_v1 = vpop.eup %5414 }
 0xb99   :  { %v6474_v57 = vadd.f32 %v2832_v2, %v2831_v11 }
 0xb9b   :  { %5416 = vtanh.f32 %v6474_v57 }
 0xba5   :  { %v5417_v49 = vpop.eup %5416 }
 0xba6   :  { %v2835_v33 = vmul.f32 %v5417_v49, %v5415_v1 }
 0xba8   :  { %2905 = vmatmul.mubr.f32.vlgmr.msra.gmra.mrb[22].mxu0 %v2835_v33  ;;  %2976 = vmatmul.mubr.f32.vlgmr.msra.gmra.mrb[22].mxu1 %v2835_v33 }
 0xba9   :  { %4825 = vmatpush1.bf16.msra.mxu0 %v6230_v39  ;;  %4857 = vmatpush1.bf16.msra.mxu1 %v6233_v55 }
 0xbaa   :  { %4827 = vmatprep.subr.bf16.mxu0 %v6238_v61  ;;  %4859 = vmatprep.subr.bf16.mxu1 %v6240_v24 }
 0xbab   :  { %3078 = vmatprep.mubr.f32.mxu0 %v5628_v0  ;;  %3149 = vmatprep.mubr.f32.mxu1 %v5628_v0 }
 0xbad   :  { %4829 = vmatpush1.bf16.msra.mxu0 %v6242_v12  ;;  %4861 = vmatpush1.bf16.msra.mxu1 %v6245_v5 }
 0xbae   :  { %4831 = vmatprep.subr.bf16.mxu0 %v6250_v53  ;;  %4863 = vmatprep.subr.bf16.mxu1 %v6252_v3 }
 0xbb1   :  { %4833 = vmatpush1.bf16.msra.mxu0 %v6254_v6  ;;  %4865 = vmatpush1.bf16.msra.mxu1 %v6257_v16 }
 0xbb2   :  { %4835 = vmatprep.subr.bf16.mxu0 %v6262_v29  ;;  %4867 = vmatprep.subr.bf16.mxu1 %v6264_v44 }
 0xbb5   :  { %4837 = vmatpush1.bf16.msra.mxu0 %v6266_v48  ;;  %4869 = vmatpush1.bf16.msra.mxu1 %v6269_v4 }
 0xbb6   :  { %4839 = vmatprep.subr.bf16.mxu0 %v6273_v22  ;;  %4871 = vmatprep.subr.bf16.mxu1 %v6275_v46 }
 0xbb9   :  { %4841 = vmatpush1.bf16.msra.mxu0 %v6278_v27  ;;  %4873 = vmatpush1.bf16.msra.mxu1 %v6282_v38 }
 0xbba   :  { %4843 = vmatprep.subr.bf16.mxu0 %v6284_v52  ;;  %4875 = vmatprep.subr.bf16.mxu1 %v6286_v7 }
 0xbbd   :  { %4845 = vmatpush1.bf16.msra.mxu0 %v6289_v47  ;;  %4877 = vmatpush1.bf16.msra.mxu1 %v6293_v63 }
 0xbbe   :  { %4847 = vmatprep.subr.bf16.mxu0 %v6295_v10  ;;  %4879 = vmatprep.subr.bf16.mxu1 %v6298_v26 }
 0xbc1   :  { %4849 = vmatpush1.bf16.msra.mxu0 %v6301_v40  ;;  %4881 = vmatpush1.bf16.msra.mxu1 %v6305_v54 }
 0xbc2   :  { %4851 = vmatprep.subr.bf16.mxu0 %v6310_v14  ;;  %4883 = vmatprep.subr.bf16.mxu1 %v6312_v8 }
 0xbc5   :  { %4853 = vmatpush1.bf16.msra.mxu0 %v6314_v17  ;;  %4885 = vmatpush1.bf16.msra.mxu1 %v6317_v41 }
 0xbc6   :  { %4887 = vmatprep.subr.bf16.mxu0 %v6226_v43  ;;  %4919 = vmatprep.subr.bf16.mxu1 %v6228_v51 }
 0xc7b   :  { %v2906_v30 = vpop.f32.mrb[22].mxu0  ;;  %v2977_v59 = vpop.f32.mrb[22].mxu1 }
 0xc7c   :  { %v5140_v25 = vadd.f32 %v2906_v30, %v6372_v45  ;;  %v2908_v20 = vpop.f32.mrb[23].mxu0  ;;  %v2979_v28 = vpop.f32.mrb[23].mxu1  ;;  %v5156_v23 = vadd.f32 %v2977_v59, %v6387_v34 }
 0xc7d   :  { %v5141_v50 = vadd.f32 %v2908_v20, %v6376_v21  ;;  %v5157_v13 = vadd.f32 %v2979_v28, %v6382_v32 }
 0xc7e   :  { %v3857_v56 = vmul.f32 -1.442695, %v5140_v25 }
 0xc7f   :  { %v3858_v60 = vmul.f32 -1.442695, %v5141_v50  ;;  %v3859_v19 = vmul.f32 -1.442695, %v5157_v13 }
 0xc80   :  { %5418 = vpow2.f32 %v3857_v56 }
 0xc81   :  { %5420 = vpow2.f32 %v3858_v60 }
 0xc82   :  { %5422 = vpow2.f32 %v3859_v19 }
 0xc83   :  { %5424 = vtanh.f32 %v5156_v23 }
 0xc8a   :  { %v5419_v31 = vpop.eup %5418 }
 0xc8b   :  { %v5421_v36 = vpop.eup %5420  ;;  %v2995_v58 = vadd.f32 1.0, %v5419_v31 }
 0xc8c   :  { %v2996_v62 = vadd.f32 1.0, %v5421_v36  ;;  %v5423_v35 = vpop.eup %5422 }
 0xc8d   :  { %5426 = vrcp.f32 %v2995_v58  ;;  %v5425_v9 = vpop.eup %5424  ;;  %v2997_v2 = vadd.f32 1.0, %v5423_v35 }
 0xc8e   :  { %5428 = vrcp.f32 %v2996_v62 }
 0xc8f   :  { %5430 = vrcp.f32 %v2997_v2 }
 0xc97   :  { %v5427_v37 = vpop.eup %5426 }
 0xc98   :  { %v5429_v42 = vpop.eup %5428  ;;  %v3006_v18 = vmul.f32 %v5427_v37, %v5425_v9 }
 0xc99   :  { %v3005_v15 = vmul.f32 %v5429_v42, %v6474_v57  ;;  %v5431_v1 = vpop.eup %5430 }
 0xc9b   :  { %v6516_v11 = vadd.f32 %v3006_v18, %v3005_v15 }
 0xc9d   :  { %5432 = vtanh.f32 %v6516_v11 }
 0xca7   :  { %v5433_v49 = vpop.eup %5432 }
 0xca8   :  { %v3009_v33 = vmul.f32 %v5433_v49, %v5431_v1 }
 0xcaa   :  { %3079 = vmatmul.mubr.f32.vlgmr.msra.gmra.mrb[24].mxu0 %v3009_v33  ;;  %3150 = vmatmul.mubr.f32.vlgmr.msra.gmra.mrb[24].mxu1 %v3009_v33 }
 0xcab   :  { %4889 = vmatpush1.bf16.msra.mxu0 %v6230_v39  ;;  %4921 = vmatpush1.bf16.msra.mxu1 %v6233_v55 }
 0xcac   :  { %4891 = vmatprep.subr.bf16.mxu0 %v6238_v61  ;;  %4923 = vmatprep.subr.bf16.mxu1 %v6240_v24 }
 0xcad   :  { %3252 = vmatprep.mubr.f32.mxu0 %v5628_v0  ;;  %3323 = vmatprep.mubr.f32.mxu1 %v5628_v0 }
 0xcaf   :  { %4893 = vmatpush1.bf16.msra.mxu0 %v6242_v12  ;;  %4925 = vmatpush1.bf16.msra.mxu1 %v6245_v5 }
 0xcb0   :  { %4895 = vmatprep.subr.bf16.mxu0 %v6250_v53  ;;  %4927 = vmatprep.subr.bf16.mxu1 %v6252_v3 }
 0xcb3   :  { %4897 = vmatpush1.bf16.msra.mxu0 %v6254_v6  ;;  %4929 = vmatpush1.bf16.msra.mxu1 %v6257_v16 }
 0xcb4   :  { %4899 = vmatprep.subr.bf16.mxu0 %v6262_v29  ;;  %4931 = vmatprep.subr.bf16.mxu1 %v6264_v44 }
 0xcb7   :  { %4901 = vmatpush1.bf16.msra.mxu0 %v6266_v48  ;;  %4933 = vmatpush1.bf16.msra.mxu1 %v6269_v4 }
 0xcb8   :  { %4903 = vmatprep.subr.bf16.mxu0 %v6273_v22  ;;  %4935 = vmatprep.subr.bf16.mxu1 %v6275_v46 }
 0xcbb   :  { %4905 = vmatpush1.bf16.msra.mxu0 %v6278_v27  ;;  %4937 = vmatpush1.bf16.msra.mxu1 %v6282_v38 }
 0xcbc   :  { %4907 = vmatprep.subr.bf16.mxu0 %v6284_v52  ;;  %4939 = vmatprep.subr.bf16.mxu1 %v6286_v7 }
 0xcbf   :  { %4909 = vmatpush1.bf16.msra.mxu0 %v6289_v47  ;;  %4941 = vmatpush1.bf16.msra.mxu1 %v6293_v63 }
 0xcc0   :  { %4911 = vmatprep.subr.bf16.mxu0 %v6295_v10  ;;  %4943 = vmatprep.subr.bf16.mxu1 %v6298_v26 }
 0xcc3   :  { %4913 = vmatpush1.bf16.msra.mxu0 %v6301_v40  ;;  %4945 = vmatpush1.bf16.msra.mxu1 %v6305_v54 }
 0xcc4   :  { %4915 = vmatprep.subr.bf16.mxu0 %v6310_v14  ;;  %4947 = vmatprep.subr.bf16.mxu1 %v6312_v8 }
 0xcc7   :  { %4917 = vmatpush1.bf16.msra.mxu0 %v6314_v17  ;;  %4949 = vmatpush1.bf16.msra.mxu1 %v6317_v41 }
 0xcc8   :  { %4951 = vmatprep.subr.bf16.mxu0 %v6226_v43  ;;  %4983 = vmatprep.subr.bf16.mxu1 %v6228_v51 }
 0xd7d   :  { %v3080_v57 = vpop.f32.mrb[24].mxu0  ;;  %v3151_v30 = vpop.f32.mrb[24].mxu1 }
 0xd7e   :  { %v5142_v59 = vadd.f32 %v3080_v57, %v6372_v45  ;;  %v3082_v25 = vpop.f32.mrb[25].mxu0  ;;  %v3153_v20 = vpop.f32.mrb[25].mxu1  ;;  %v5158_v19 = vadd.f32 %v3151_v30, %v6387_v34 }
 0xd7f   :  { %v5143_v28 = vadd.f32 %v3082_v25, %v6376_v21  ;;  %v5159_v60 = vadd.f32 %v3153_v20, %v6382_v32 }
 0xd80   :  { %v3860_v50 = vmul.f32 -1.442695, %v5142_v59 }
 0xd81   :  { %v3861_v56 = vmul.f32 -1.442695, %v5143_v28  ;;  %v3862_v13 = vmul.f32 -1.442695, %v5159_v60 }
 0xd82   :  { %5434 = vpow2.f32 %v3860_v50 }
 0xd83   :  { %5436 = vpow2.f32 %v3861_v56 }
 0xd84   :  { %5438 = vpow2.f32 %v3862_v13 }
 0xd85   :  { %5440 = vtanh.f32 %v5158_v19 }
 0xd8c   :  { %v5435_v23 = vpop.eup %5434 }
 0xd8d   :  { %v5437_v31 = vpop.eup %5436  ;;  %v3169_v36 = vadd.f32 1.0, %v5435_v23 }
 0xd8e   :  { %v3170_v58 = vadd.f32 1.0, %v5437_v31  ;;  %v5439_v62 = vpop.eup %5438 }
 0xd8f   :  { %5442 = vrcp.f32 %v3169_v36  ;;  %v5441_v35 = vpop.eup %5440  ;;  %v3171_v18 = vadd.f32 1.0, %v5439_v62 }
 0xd90   :  { %5444 = vrcp.f32 %v3170_v58 }
 0xd91   :  { %5446 = vrcp.f32 %v3171_v18 }
 0xd99   :  { %v5443_v9 = vpop.eup %5442 }
 0xd9a   :  { %v5445_v37 = vpop.eup %5444  ;;  %v3180_v42 = vmul.f32 %v5443_v9, %v5441_v35 }
 0xd9b   :  { %v3179_v2 = vmul.f32 %v5445_v37, %v6516_v11  ;;  %v5447_v1 = vpop.eup %5446 }
 0xd9d   :  { %v6558_v15 = vadd.f32 %v3180_v42, %v3179_v2 }
 0xd9f   :  { %5448 = vtanh.f32 %v6558_v15 }
 0xda9   :  { %v5449_v49 = vpop.eup %5448 }
 0xdaa   :  { %v3183_v33 = vmul.f32 %v5449_v49, %v5447_v1  ;;  %v3709_v49 = vld [vmem:[#allocation11 + $0x18] sm:$0xff] }
 0xdac   :  { %3253 = vmatmul.mubr.f32.vlgmr.msra.gmra.mrb[26].mxu0 %v3183_v33  ;;  %3324 = vmatmul.mubr.f32.vlgmr.msra.gmra.mrb[26].mxu1 %v3183_v33 }
 0xdad   :  { %4953 = vmatpush1.bf16.msra.mxu0 %v6230_v39  ;;  %4985 = vmatpush1.bf16.msra.mxu1 %v6233_v55 }
 0xdae   :  { %4955 = vmatprep.subr.bf16.mxu0 %v6238_v61  ;;  %4987 = vmatprep.subr.bf16.mxu1 %v6240_v24 }
 0xdaf   :  { %3426 = vmatprep.mubr.f32.mxu0 %v5628_v0  ;;  %3497 = vmatprep.mubr.f32.mxu1 %v5628_v0 }
 0xdb1   :  { %4957 = vmatpush1.bf16.msra.mxu0 %v6242_v12  ;;  %4989 = vmatpush1.bf16.msra.mxu1 %v6245_v5 }
 0xdb2   :  { %4959 = vmatprep.subr.bf16.mxu0 %v6250_v53  ;;  %4991 = vmatprep.subr.bf16.mxu1 %v6252_v3 }
 0xdb5   :  { %4961 = vmatpush1.bf16.msra.mxu0 %v6254_v6  ;;  %4993 = vmatpush1.bf16.msra.mxu1 %v6257_v16 }
 0xdb6   :  { %4963 = vmatprep.subr.bf16.mxu0 %v6262_v29  ;;  %4995 = vmatprep.subr.bf16.mxu1 %v6264_v44 }
 0xdb9   :  { %4965 = vmatpush1.bf16.msra.mxu0 %v6266_v48  ;;  %4997 = vmatpush1.bf16.msra.mxu1 %v6269_v4 }
 0xdba   :  { %4967 = vmatprep.subr.bf16.mxu0 %v6273_v22  ;;  %4999 = vmatprep.subr.bf16.mxu1 %v6275_v46 }
 0xdbd   :  { %4969 = vmatpush1.bf16.msra.mxu0 %v6278_v27  ;;  %5001 = vmatpush1.bf16.msra.mxu1 %v6282_v38 }
 0xdbe   :  { %4971 = vmatprep.subr.bf16.mxu0 %v6284_v52  ;;  %5003 = vmatprep.subr.bf16.mxu1 %v6286_v7 }
 0xdc1   :  { %4973 = vmatpush1.bf16.msra.mxu0 %v6289_v47  ;;  %5005 = vmatpush1.bf16.msra.mxu1 %v6293_v63 }
 0xdc2   :  { %4975 = vmatprep.subr.bf16.mxu0 %v6295_v10  ;;  %5007 = vmatprep.subr.bf16.mxu1 %v6298_v26 }
 0xdc5   :  { %4977 = vmatpush1.bf16.msra.mxu0 %v6301_v40  ;;  %5009 = vmatpush1.bf16.msra.mxu1 %v6305_v54 }
 0xdc6   :  { %4979 = vmatprep.subr.bf16.mxu0 %v6310_v14  ;;  %5011 = vmatprep.subr.bf16.mxu1 %v6312_v8 }
 0xdc9   :  { %4981 = vmatpush1.bf16.msra.mxu0 %v6314_v17  ;;  %5013 = vmatpush1.bf16.msra.mxu1 %v6317_v41 }
 0xdca   :  { %5015 = vmatprep.subr.bf16.mxu0 %v6226_v43  ;;  %5047 = vmatprep.subr.bf16.mxu1 %v6228_v51 }
 0xe7f   :  { %v3254_v11 = vpop.f32.mrb[26].mxu0  ;;  %v3325_v57 = vpop.f32.mrb[26].mxu1 }
 0xe80   :  { %v5144_v30 = vadd.f32 %v3254_v11, %v6372_v45  ;;  %v3256_v59 = vpop.f32.mrb[27].mxu0  ;;  %v3327_v25 = vpop.f32.mrb[27].mxu1  ;;  %v5160_v13 = vadd.f32 %v3325_v57, %v6387_v34  ;;  %v3710_v11 = vld [vmem:[#allocation11 + $0x20] sm:$0xff]  ;;  %v3711_v57 = vld [vmem:[#allocation11 + $0x28] sm:$0xff] }
 0xe81   :  { %v5145_v20 = vadd.f32 %v3256_v59, %v6376_v21  ;;  %v5161_v56 = vadd.f32 %v3327_v25, %v6382_v32  ;;  %v3712_v59 = vld [vmem:[#allocation11 + $0x30] sm:$0xff]  ;;  %v3713_v25 = vld [vmem:[#allocation11 + $0x38] sm:$0xff] }
 0xe82   :  { %v3863_v28 = vmul.f32 -1.442695, %v5144_v30  ;;  %v5085_v30 = vpack.c.bf16 %v3711_v57, %v3710_v11 }
 0xe83   :  { %v3864_v50 = vmul.f32 -1.442695, %v5145_v20  ;;  %v3865_v60 = vmul.f32 -1.442695, %v5161_v56  ;;  %v5088_v20 = vpack.c.bf16 %v3713_v25, %v3712_v59 }
 0xe84   :  { %5450 = vpow2.f32 %v3863_v28  ;;  %v3714_v28 = vld [vmem:[#allocation11 + $0x40] sm:$0xff] }
 0xe85   :  { %5452 = vpow2.f32 %v3864_v50  ;;  %v3715_v50 = vld [vmem:[#allocation11 + $0x48] sm:$0xff] }
 0xe86   :  { %5454 = vpow2.f32 %v3865_v60  ;;  %v5091_v56 = vpack.c.bf16 %v3715_v50, %v3714_v28  ;;  %v3716_v60 = vld [vmem:[#allocation11 + $0x50] sm:$0xff] }
 0xe87   :  { %5456 = vtanh.f32 %v5160_v13  ;;  %v3717_v13 = vld [vmem:[#allocation11 + $0x58] sm:$0xff] }
 0xe8e   :  { %v5451_v43 = vpop.eup %5450 }
 0xe8f   :  { %v5453_v19 = vpop.eup %5452  ;;  %v3343_v51 = vadd.f32 1.0, %v5451_v43  ;;  %v3718_v43 = vld [vmem:[#allocation11 + $0x60] sm:$0xff] }
 0xe90   :  { %v3344_v23 = vadd.f32 1.0, %v5453_v19  ;;  %v5455_v31 = vpop.eup %5454  ;;  %v5094_v19 = vpack.c.bf16 %v3717_v13, %v3716_v60 }
 0xe91   :  { %5458 = vrcp.f32 %v3343_v51  ;;  %v5457_v36 = vpop.eup %5456  ;;  %v3345_v9 = vadd.f32 1.0, %v5455_v31  ;;  %v3719_v51 = vld [vmem:[#allocation11 + $0x68] sm:$0xff]  ;;  %v3720_v31 = vld [vmem:[#allocation11 + $0x70] sm:$0xff] }
 0xe92   :  { %5460 = vrcp.f32 %v3344_v23  ;;  %v5097_v23 = vpack.c.bf16 %v3719_v51, %v3718_v43 }
 0xe93   :  { %5462 = vrcp.f32 %v3345_v9 }
 0xe9b   :  { %v5459_v58 = vpop.eup %5458 }
 0xe9c   :  { %v5461_v62 = vpop.eup %5460  ;;  %v3354_v35 = vmul.f32 %v5459_v58, %v5457_v36  ;;  %v3721_v36 = vld [vmem:[#allocation11 + $0x78] sm:$0xff] }
 0xe9d   :  { %v3353_v37 = vmul.f32 %v5461_v62, %v6558_v15  ;;  %v5463_v18 = vpop.eup %5462  ;;  %v3708_v15 = vld [vmem:[#allocation11 + $0x10] sm:$0xff]  ;;  %v5100_v58 = vpack.c.bf16 %v3721_v36, %v3720_v31 }
 0xe9e   :  { %v5082_v33 = vpack.c.bf16 %v3709_v49, %v3708_v15 }
 0xe9f   :  { %v6600_v42 = vadd.f32 %v3354_v35, %v3353_v37 }
 0xea1   :  { %5464 = vtanh.f32 %v6600_v42 }
 0xeab   :  { %v5465_v2 = vpop.eup %5464 }
 0xeac   :  { %v3357_v1 = vmul.f32 %v5465_v2, %v5463_v18 }
 0xeae   :  { %3427 = vmatmul.mubr.f32.vlgmr.msra.gmra.mrb[28].mxu0 %v3357_v1  ;;  %3498 = vmatmul.mubr.f32.vlgmr.msra.gmra.mrb[28].mxu1 %v3357_v1 }
 0xeaf   :  { %5017 = vmatpush1.bf16.msra.mxu0 %v6230_v39  ;;  %5049 = vmatpush1.bf16.msra.mxu1 %v6233_v55 }
 0xeb0   :  { %5019 = vmatprep.subr.bf16.mxu0 %v6238_v61  ;;  %5051 = vmatprep.subr.bf16.mxu1 %v6240_v24 }
 0xeb1   :  { %3600 = vmatprep.mubr.f32.mxu0 %v5628_v0  ;;  %3671 = vmatprep.mubr.f32.mxu1 %v5628_v0 }
 0xeb3   :  { %5021 = vmatpush1.bf16.msra.mxu0 %v6242_v12  ;;  %5053 = vmatpush1.bf16.msra.mxu1 %v6245_v5 }
 0xeb4   :  { %5023 = vmatprep.subr.bf16.mxu0 %v6250_v53  ;;  %5055 = vmatprep.subr.bf16.mxu1 %v6252_v3 }
 0xeb7   :  { %5025 = vmatpush1.bf16.msra.mxu0 %v6254_v6  ;;  %5057 = vmatpush1.bf16.msra.mxu1 %v6257_v16 }
 0xeb8   :  { %5027 = vmatprep.subr.bf16.mxu0 %v6262_v29  ;;  %5059 = vmatprep.subr.bf16.mxu1 %v6264_v44 }
 0xebb   :  { %5029 = vmatpush1.bf16.msra.mxu0 %v6266_v48  ;;  %5061 = vmatpush1.bf16.msra.mxu1 %v6269_v4 }
 0xebc   :  { %5031 = vmatprep.subr.bf16.mxu0 %v6273_v22  ;;  %5063 = vmatprep.subr.bf16.mxu1 %v6275_v46 }
 0xebf   :  { %5033 = vmatpush1.bf16.msra.mxu0 %v6278_v27  ;;  %5065 = vmatpush1.bf16.msra.mxu1 %v6282_v38 }
 0xec0   :  { %5035 = vmatprep.subr.bf16.mxu0 %v6284_v52  ;;  %5067 = vmatprep.subr.bf16.mxu1 %v6286_v7 }
 0xec3   :  { %5037 = vmatpush1.bf16.msra.mxu0 %v6289_v47  ;;  %5069 = vmatpush1.bf16.msra.mxu1 %v6293_v63 }
 0xec4   :  { %5039 = vmatprep.subr.bf16.mxu0 %v6295_v10  ;;  %5071 = vmatprep.subr.bf16.mxu1 %v6298_v26 }
 0xec7   :  { %5041 = vmatpush1.bf16.msra.mxu0 %v6301_v40  ;;  %5073 = vmatpush1.bf16.msra.mxu1 %v6305_v54 }
 0xec8   :  { %5043 = vmatprep.subr.bf16.mxu0 %v6310_v14  ;;  %5075 = vmatprep.subr.bf16.mxu1 %v6312_v8  ;;  %v3706_v14 = vld [vmem:[#allocation11] sm:$0xff]  ;;  %v3707_v8 = vld [vmem:[#allocation11 + $0x8] sm:$0xff] }
 0xecb   :  { %5045 = vmatpush1.bf16.msra.mxu0 %v6314_v17  ;;  %5077 = vmatpush1.bf16.msra.mxu1 %v6317_v41  ;;  %v5079_v17 = vpack.c.bf16 %v3707_v8, %v3706_v14  ;;  %v5629_v41 = vmov 0.0|0.0  }
 0xecc   :  { %5078 = vmatprep.subr.bf16.mxu0 %v5629_v41 }
 0xf81   :  { %v3428_v39 = vpop.f32.mrb[28].mxu0  ;;  %v3499_v55 = vpop.f32.mrb[28].mxu1 }
 0xf82   :  { %v5146_v61 = vadd.f32 %v3428_v39, %v6372_v45  ;;  %v3430_v24 = vpop.f32.mrb[29].mxu0  ;;  %v3501_v12 = vpop.f32.mrb[29].mxu1  ;;  %v5162_v29 = vadd.f32 %v3499_v55, %v6387_v34 }
 0xf83   :  { %v5147_v5 = vadd.f32 %v3430_v24, %v6376_v21  ;;  %v5163_v6 = vadd.f32 %v3501_v12, %v6382_v32 }
 0xf84   :  { %v3866_v53 = vmul.f32 -1.442695, %v5146_v61 }
 0xf85   :  { %v3867_v3 = vmul.f32 -1.442695, %v5147_v5  ;;  %v3868_v16 = vmul.f32 -1.442695, %v5163_v6 }
 0xf86   :  { %5466 = vpow2.f32 %v3866_v53 }
 0xf87   :  { %5468 = vpow2.f32 %v3867_v3 }
 0xf88   :  { %5470 = vpow2.f32 %v3868_v16 }
 0xf89   :  { %5472 = vtanh.f32 %v5162_v29 }
 0xf90   :  { %v5467_v44 = vpop.eup %5466 }
 0xf91   :  { %v5469_v48 = vpop.eup %5468  ;;  %v3517_v4 = vadd.f32 1.0, %v5467_v44 }
 0xf92   :  { %v3518_v22 = vadd.f32 1.0, %v5469_v48  ;;  %v5471_v46 = vpop.eup %5470 }
 0xf93   :  { %5474 = vrcp.f32 %v3517_v4  ;;  %v5473_v27 = vpop.eup %5472  ;;  %v3519_v47 = vadd.f32 1.0, %v5471_v46  ;;  %v3872_v4 = vld [vmem:[%s6669_s5] ss:$0 sm:$0xff] }
 0xf94   :  { %5476 = vrcp.f32 %v3518_v22 }
 0xf95   :  { %5478 = vrcp.f32 %v3519_v47 }
 0xf9d   :  { %v5475_v38 = vpop.eup %5474 }
 0xf9e   :  { %v5477_v52 = vpop.eup %5476  ;;  %v3528_v7 = vmul.f32 %v5475_v38, %v5473_v27 }
 0xf9f   :  { %v3527_v63 = vmul.f32 %v5477_v52, %v6600_v42  ;;  %v5479_v26 = vpop.eup %5478 }
 0xfa1   :  { %v6640_v10 = vadd.f32 %v3528_v7, %v3527_v63 }
 0xfa3   :  { %5480 = vtanh.f32 %v6640_v10 }
 0xfad   :  { %v5481_v40 = vpop.eup %5480 }
 0xfae   :  { %v3531_v54 = vmul.f32 %v5481_v40, %v5479_v26 }
 0xfb0   :  { %3601 = vmatmul.mubr.f32.vlgmr.msra.gmra.mrb[30].mxu0 %v3531_v54  ;;  %3672 = vmatmul.mubr.f32.vlgmr.msra.gmra.mrb[30].mxu1 %v3531_v54 }
 0xfb1   :  { %5080 = vmatpush3.bf16.msra.mxu0 %v5079_v17  ;;  %3923 = vmatprep.mubr.msk.f32.mxu0 %vm5630_vm0, %v5628_v0 }
 0xfb2   :  { %5081 = vmatprep.subr.bf16.mxu0 %v5629_v41 }
 0xfb5   :  { %5083 = vmatpush3.bf16.msra.mxu0 %v5082_v33 }
 0xfb6   :  { %5084 = vmatprep.subr.bf16.mxu0 %v5629_v41 }
 0xfb9   :  { %5086 = vmatpush3.bf16.msra.mxu0 %v5085_v30 }
 0xfba   :  { %5087 = vmatprep.subr.bf16.mxu0 %v5629_v41 }
 0xfbd   :  { %5089 = vmatpush3.bf16.msra.mxu0 %v5088_v20 }
 0xfbe   :  { %5090 = vmatprep.subr.bf16.mxu0 %v5629_v41 }
 0xfc1   :  { %5092 = vmatpush3.bf16.msra.mxu0 %v5091_v56 }
 0xfc2   :  { %5093 = vmatprep.subr.bf16.mxu0 %v5629_v41 }
 0xfc5   :  { %5095 = vmatpush3.bf16.msra.mxu0 %v5094_v19 }
 0xfc6   :  { %5096 = vmatprep.subr.bf16.mxu0 %v5629_v41 }
 0xfc9   :  { %5098 = vmatpush3.bf16.msra.mxu0 %v5097_v23 }
 0xfca   :  { %5099 = vmatprep.subr.bf16.mxu0 %v5629_v41 }
 0xfcd   :  { %5101 = vmatpush3.bf16.msra.mxu0 %v5100_v58 }
0x1083   :  { %v3602_v62 = vpop.f32.mrb[30].mxu0  ;;  %v3673_v35 = vpop.f32.mrb[30].mxu1 }
0x1084   :  { %v5148_v9 = vadd.f32 %v3602_v62, %v6372_v45  ;;  %v3604_v37 = vpop.f32.mrb[31].mxu0  ;;  %v3675_v42 = vpop.f32.mrb[31].mxu1  ;;  %v5164_v55 = vadd.f32 %v3673_v35, %v6387_v34 }
0x1085   :  { %v5149_v18 = vadd.f32 %v3604_v37, %v6376_v21  ;;  %v5165_v0 = vadd.f32 %v3675_v42, %v6382_v32 }
0x1086   :  { %v3869_v2 = vmul.f32 -1.442695, %v5148_v9 }
0x1087   :  { %v3870_v1 = vmul.f32 -1.442695, %v5149_v18  ;;  %v3871_v39 = vmul.f32 -1.442695, %v5165_v0 }
0x1088   :  { %5482 = vpow2.f32 %v3869_v2 }
0x1089   :  { %5484 = vpow2.f32 %v3870_v1 }
0x108a   :  { %5486 = vpow2.f32 %v3871_v39 }
0x108b   :  { %5488 = vtanh.f32 %v5164_v55 }
0x1092   :  { %v5483_v61 = vpop.eup %5482 }
0x1093   :  { %v5485_v24 = vpop.eup %5484  ;;  %v3691_v12 = vadd.f32 1.0, %v5483_v61 }
0x1094   :  { %v3692_v5 = vadd.f32 1.0, %v5485_v24  ;;  %v5487_v45 = vpop.eup %5486 }
0x1095   :  { %5490 = vrcp.f32 %v3691_v12  ;;  %v5489_v53 = vpop.eup %5488  ;;  %v3693_v16 = vadd.f32 1.0, %v5487_v45 }
0x1096   :  { %5492 = vrcp.f32 %v3692_v5 }
0x1097   :  { %5494 = vrcp.f32 %v3693_v16 }
0x109f   :  { %v5491_v21 = vpop.eup %5490 }
0x10a0   :  { %v5493_v3 = vpop.eup %5492  ;;  %v3702_v6 = vmul.f32 %v5491_v21, %v5489_v53 }
0x10a1   :  { %v3701_v29 = vmul.f32 %v5493_v3, %v6640_v10  ;;  %v5495_v34 = vpop.eup %5494 }
0x10a3   :  { %v3703_v32 = vadd.f32 %v3702_v6, %v3701_v29 }
0x10a5   :  { %5496 = vtanh.f32 %v3703_v32 }
0x10af   :  { %v5497_v44 = vpop.eup %5496 }
0x10b0   :  { %v3705_v48 = vmul.f32 %v5497_v44, %v5495_v34 }
0x10b2   :  { %3924 = vmatmul.mubr.f32.vlgmr.msra.gmra.mrb[32].mxu0 %v3705_v48 }
0x1185   :  { %v3795_v22 = vpop.f32.mrb[32].mxu0 }
0x1186   :  { %v3796_v46 = vadd.f32 %v3872_v4, %v3795_v22  ;;  %v3925_v27 = vpop.f32.mrb[33].mxu0 }
0x1188   :  { %v3873_v38 = vmul.f32 -1.442695, %v3796_v46 }
0x118a   :  { %5498 = vpow2.f32 %v3873_v38 }
0x1194   :  { %v5499_v52 = vpop.eup %5498 }
0x1195   :  { %v3802_v7 = vadd.f32 1.0, %v5499_v52 }
0x1197   :  { %5500 = vrcp.f32 %v3802_v7 }
0x11a1   :  { %v5501_v47 = vpop.eup %5500 }
0x11a2   :  { %3805 = vst [vmem:[#allocation13] sm:$0xff] %v5501_v47 }
0x11a3   :  { %5601 = shalt.err (!%p5598_p8)
}
0x11a4   :  { %s5602_s29 = scalar_lea.hbm %s6670_s6, 128 }
0x11a5   :  { %p5603_p9 = scmp.ne.s32.totalorder %s6670_s6, %s5602_s29  ;;  %p5606_p10 = scmp.lt.u32.totalorder %s5602_s29, %s6670_s6 }
0x11a7   :  { %p5608_p11 = pnand %p5606_p10, %p5603_p9 }
0x11a9   :  { %5611 = shalt.err (!%p5608_p11)
}
0x11aa   :  { %3815 = dma.vmem_to_hbm [thread:$0]  %s3813_s26, 128, %s6670_s6, [#allocation7]  }
0x11ab   :  { %5618 = dma.done.wait [#allocation7], 128  }
0x11ac   :  { %5619 = vsyncadd [#allocation7], 4294967168 }
0x11ad   :  { %3819 = vsyncpa [#allocation6], 1 }
0x11ae   :  { %3820 = vsyncpa [#allocation9], 1 }
0x11af   :  { %3821 = vsyncpa [#allocation12], 1 }
0x11b0   :  { %3822 = vsyncpa [#allocation7], 1 }

</bundles_post_ra>
